<compile_context>
chip_gen: v5e
topology: v5e:2x2
jax: 0.10.0
libtpu: 0.0.40
codegen_flags: <defaults>
</compile_context>

<pallas_src>
import functools
import math

import jax
import jax.numpy as jnp
from jax.experimental import pallas as pl
from jax.experimental.pallas import tpu as pltpu


def _layernorm(x, g, b, eps=1e-5):
    """LayerNorm over the last axis (f32), matching nn.LayerNorm defaults."""
    mu = jnp.mean(x, axis=-1, keepdims=True)
    xc = x - mu
    var = jnp.mean(xc * xc, axis=-1, keepdims=True)
    return xc * jax.lax.rsqrt(var + eps) * g + b


def _gelu_tanh(x):
    # TODO(synk): nn.GELU() is the exact erf form; the tanh approximation is used
    # here (max abs deviation ~1e-3) because erf lowering in Mosaic is not guaranteed.
    c = math.sqrt(2.0 / math.pi)
    return 0.5 * x * (1.0 + jnp.tanh(c * (x + 0.044715 * (x * x * x))))


def _token_decoder_kernel(x_ref, m_ref, pos_ref,
                          g1_ref, b1_ref,
                          wq_ref, wk_ref, wv_ref, wo_ref, bo_ref,
                          g2_ref, b2_ref,
                          w1_ref, bf1_ref, w2_ref, bf2_ref,
                          o_ref, *, heads, dim_head, scale):
    f32 = jnp.float32
    cdt = wq_ref.dtype                      # bf16 MXU-operand dtype
    inner = heads * dim_head

    # --- positional embedding + residual-stream input (f32) ---
    x = x_ref[0].astype(f32) + pos_ref[...]          # (N, C)
    mem = m_ref[0].astype(f32)                       # (L, C)

    # --- PreNorm2: the SAME LayerNorm is applied to both query stream and memory ---
    ln_x = _layernorm(x, g1_ref[...], b1_ref[...])
    ln_m = _layernorm(mem, g1_ref[...], b1_ref[...])

    # --- q/k/v projections: bf16 operands on the MXU, f32 accumulation ---
    q = jnp.dot(ln_x.astype(cdt), wq_ref[...], preferred_element_type=f32)   # (N, inner)
    k = jnp.dot(ln_m.astype(cdt), wk_ref[...], preferred_element_type=f32)   # (L, inner)
    v = jnp.dot(ln_m.astype(cdt), wv_ref[...], preferred_element_type=f32)   # (L, inner)

    # Fold the softmax scale into q once (not into every (N, L) logits matrix).
    qb = (q * scale).astype(cdt)
    kb = k.astype(cdt)
    vb = v.astype(cdt)

    # Per-head attention. dim_head == 1 for this module, so heads are separated
    # with lane masks: keeps every matmul contraction at inner/L (>= 8), avoids
    # 1-wide slices and K=1 matmuls, and each head's output is written directly
    # into its own lane block of `acc` (no concat, no lane shuffles).
    lane = jax.lax.broadcasted_iota(jnp.int32, (1, inner), 1)
    acc = jnp.zeros((q.shape[0], inner), dtype=f32)
    for h in range(heads):                                   # small static loop
        head_mask = (lane >= h * dim_head) & (lane < (h + 1) * dim_head)
        q_h = jnp.where(head_mask, qb, 0.0)                  # (N, inner)
        # QK^T without an explicit transpose: contract the last dims.
        logits = jax.lax.dot_general(
            q_h, kb, dimension_numbers=(((1,), (1,)), ((), ())),
            preferred_element_type=f32)                      # (N, L), f32
        logits = logits - jnp.max(logits, axis=-1, keepdims=True)
        e = jnp.exp(logits)
        p = e * pl.reciprocal(jnp.sum(e, axis=-1, keepdims=True), approx=True)
        v_h = jnp.where(head_mask, vb, 0.0)                  # (L, inner)
        acc = acc + jnp.dot(p.astype(cdt), v_h, preferred_element_type=f32)

    # Attention output projection: Linear(inner, C) with bias.
    att = jnp.dot(acc.astype(cdt), wo_ref[...], preferred_element_type=f32) + bo_ref[...]

    # --- residual 1 (Residual2 adds the un-normed, pos-added x) ---
    y = x + att

    # --- PreNorm + FeedForward (Linear -> GELU -> Linear) + residual 2 ---
    ln_y = _layernorm(y, g2_ref[...], b2_ref[...])
    h1 = jnp.dot(ln_y.astype(cdt), w1_ref[...], preferred_element_type=f32) + bf1_ref[...]
    h1 = _gelu_tanh(h1)
    ffn = jnp.dot(h1.astype(cdt), w2_ref[...], preferred_element_type=f32) + bf2_ref[...]

    o_ref[0] = (y + ffn).astype(o_ref.dtype)


def token_decoder_forward(x, m, params, *, heads, dim_head,
                          compute_dtype=jnp.bfloat16):
    """x: (B, C, H, W) f32 feature map, m: (B, L, C) f32 memory tokens."""
    B, C, H, W = x.shape
    N = H * W
    L = m.shape[1]
    inner = heads * dim_head
    hidden = params["w1_t"].shape[1]
    scale = float(C) ** -0.5          # Cross_Attention uses dim ** -0.5 (intentional)

    # NCHW -> sequence-major (B, N, C); pos (1, C, H, W) -> (N, C).
    x_seq = jnp.transpose(x, (0, 2, 3, 1)).reshape(B, N, C)
    pos_seq = jnp.transpose(params["pos"], (0, 2, 3, 1)).reshape(N, C)

    cd = compute_dtype
    kernel = functools.partial(_token_decoder_kernel, heads=heads,
                               dim_head=dim_head, scale=scale)
    rep = lambda b: (0, 0)            # parameters: same full block every grid step

    out_seq = pl.pallas_call(
        kernel,
        out_shape=jax.ShapeDtypeStruct((B, N, C), jnp.float32),
        grid_spec=pltpu.PrefetchScalarGridSpec(
            num_scalar_prefetch=0,
            grid=(B,),                                       # >=2 steps -> both v7x TCs busy
            in_specs=[
                pl.BlockSpec((1, N, C), lambda b: (b, 0, 0)),   # x (bf16)
                pl.BlockSpec((1, L, C), lambda b: (b, 0, 0)),   # m (bf16)
                pl.BlockSpec((N, C), rep),                      # pos (f32)
                pl.BlockSpec((1, C), rep),                      # LN1 gamma
                pl.BlockSpec((1, C), rep),                      # LN1 beta
                pl.BlockSpec((C, inner), rep),                  # Wq^T
                pl.BlockSpec((C, inner), rep),                  # Wk^T
                pl.BlockSpec((C, inner), rep),                  # Wv^T
                pl.BlockSpec((inner, C), rep),                  # Wo^T
                pl.BlockSpec((1, C), rep),                      # bo
                pl.BlockSpec((1, C), rep),                      # LN2 gamma
                pl.BlockSpec((1, C), rep),                      # LN2 beta
                pl.BlockSpec((C, hidden), rep),                 # W1^T
                pl.BlockSpec((1, hidden), rep),                 # b1 (FFN)
                pl.BlockSpec((hidden, C), rep),                 # W2^T
                pl.BlockSpec((1, C), rep),                      # b2 (FFN)
            ],
            out_specs=pl.BlockSpec((1, N, C), lambda b: (b, 0, 0)),
        ),
        compiler_params=pltpu.CompilerParams(
            dimension_semantics=("parallel",),
            # Per-step footprint is tiny (a few hundred KiB); explicit cap keeps
            # this tiling safe on v7x's 64 MiB VMEM as well as v5e/v6e's 128 MiB.
            vmem_limit_bytes=32 * 1024 * 1024),
    )(
        x_seq.astype(cd), m.astype(cd), pos_seq,
        params["g1"], params["b1"],
        params["wq_t"].astype(cd), params["wk_t"].astype(cd),
        params["wv_t"].astype(cd), params["wo_t"].astype(cd), params["bo"],
        params["g2"], params["b2"],
        params["w1_t"].astype(cd), params["bf1"],
        params["w2_t"].astype(cd), params["bf2"],
    )

    # TODO(synk): output lane width is C=32 (<128) so stores are masked; a fully
    # lane-dense (rows, 128) output slab would need an in-kernel relayout.
    return out_seq.reshape(B, H, W, C).transpose(0, 3, 1, 2)


def token_decoder_ref(x, m, params, *, heads, dim_head, compute_dtype=jnp.bfloat16):
    """Pure-JAX f32 reference mirroring the PyTorch forward, fed with the same
    bf16-rounded x/m/weights the kernel consumes."""
    f32 = jnp.float32
    rnd = lambda a: a.astype(compute_dtype).astype(f32)
    B, C, H, W = x.shape
    N = H * W
    scale = float(C) ** -0.5

    x_seq = (jnp.transpose(rnd(x), (0, 2, 3, 1)).reshape(B, N, C)
             + jnp.transpose(params["pos"], (0, 2, 3, 1)).reshape(1, N, C))
    m_seq = rnd(m)

    wq, wk, wv, wo = (rnd(params[kk]) for kk in ("wq_t", "wk_t", "wv_t", "wo_t"))
    w1, w2 = rnd(params["w1_t"]), rnd(params["w2_t"])

    lx = _layernorm(x_seq, params["g1"], params["b1"])
    lm = _layernorm(m_seq, params["g1"], params["b1"])
    q, k, v = lx @ wq, lm @ wk, lm @ wv

    def split(t):
        b, n, _ = t.shape
        return t.reshape(b, n, heads, dim_head).transpose(0, 2, 1, 3)   # b h n d

    qh, kh, vh = split(q), split(k), split(v)
    dots = jnp.einsum("bhid,bhjd->bhij", qh, kh) * scale
    attn = jax.nn.softmax(dots, axis=-1)
    out = jnp.einsum("bhij,bhjd->bhid", attn, vh)
    out = out.transpose(0, 2, 1, 3).reshape(B, N, heads * dim_head)
    att = out @ wo + params["bo"]

    y = x_seq + att
    ffn = _gelu_tanh(_layernorm(y, params["g2"], params["b2"]) @ w1
                     + params["bf1"]) @ w2 + params["bf2"]
    out_seq = y + ffn
    return out_seq.reshape(B, H, W, C).transpose(0, 3, 1, 2)


if __name__ == "__main__":
    # Small config consistent with token_decoder(in_chan=32, size=SIZE, heads=8).
    B = 2
    C = 32            # in_chan == transformer dim
    SIZE = 8          # spatial H = W; N = 64 query tokens
    L = 8             # number of memory tokens in m
    HEADS = 8
    DIM_HEAD = 1      # ctor passes dim_head=True -> dim_head == 1, inner_dim == heads
    INNER = HEADS * DIM_HEAD
    HIDDEN = 2 * C    # mlp_dim = in_chan * 2

    f32 = jnp.float32
    key = jax.random.PRNGKey(0)
    ks = jax.random.split(key, 16)

    def wmat(k, shape, s=0.05):
        return jax.random.normal(k, shape, dtype=f32) * s

    x = jax.random.normal(ks[0], (B, C, SIZE, SIZE), dtype=f32)
    m = jax.random.normal(ks[1], (B, L, C), dtype=f32)

    params = dict(
        pos=jax.random.normal(ks[2], (1, C, SIZE, SIZE), dtype=f32),
        # nn.Linear weights are (out, in); stored pre-transposed as (in, out).
        wq_t=wmat(ks[3], (INNER, C)).T,
        wk_t=wmat(ks[4], (INNER, C)).T,
        wv_t=wmat(ks[5], (INNER, C)).T,
        wo_t=wmat(ks[6], (C, INNER)).T,
        bo=wmat(ks[7], (1, C)),
        g1=1.0 + wmat(ks[8], (1, C), 0.1), b1=wmat(ks[9], (1, C), 0.1),
        g2=1.0 + wmat(ks[10], (1, C), 0.1), b2=wmat(ks[11], (1, C), 0.1),
        w1_t=wmat(ks[12], (HIDDEN, C)).T, bf1=wmat(ks[13], (1, HIDDEN)),
        w2_t=wmat(ks[14], (C, HIDDEN)).T, bf2=wmat(ks[15], (1, C)),
    )

    out = token_decoder_forward(x, m, params, heads=HEADS, dim_head=DIM_HEAD)
    out = jax.block_until_ready(out)

    ref = token_decoder_ref(x, m, params, heads=HEADS, dim_head=DIM_HEAD)

    assert out.shape == (B, C, SIZE, SIZE), out.shape
    max_err = float(jnp.max(jnp.abs(out - ref)))
    # bf16 MXU operands + approx reciprocal -> loosened tolerance vs pure-f32 ref.
    assert jnp.allclose(out, ref, atol=2e-2, rtol=2e-2), max_err

    print("KERNEL_OK")
</pallas_src>

<mosaic_0001>
module attributes {stable_mosaic.version = 11 : i64} {
  func.func @_token_decoder_kernel(%arg0: i32, %arg1: memref<1x64x32xbf16, #tpu.memory_space<vmem>>, %arg2: memref<1x8x32xbf16, #tpu.memory_space<vmem>>, %arg3: memref<64x32xf32, #tpu.memory_space<vmem>>, %arg4: memref<1x32xf32, #tpu.memory_space<vmem>>, %arg5: memref<1x32xf32, #tpu.memory_space<vmem>>, %arg6: memref<32x8xbf16, #tpu.memory_space<vmem>>, %arg7: memref<32x8xbf16, #tpu.memory_space<vmem>>, %arg8: memref<32x8xbf16, #tpu.memory_space<vmem>>, %arg9: memref<8x32xbf16, #tpu.memory_space<vmem>>, %arg10: memref<1x32xf32, #tpu.memory_space<vmem>>, %arg11: memref<1x32xf32, #tpu.memory_space<vmem>>, %arg12: memref<1x32xf32, #tpu.memory_space<vmem>>, %arg13: memref<32x64xbf16, #tpu.memory_space<vmem>>, %arg14: memref<1x64xf32, #tpu.memory_space<vmem>>, %arg15: memref<64x32xbf16, #tpu.memory_space<vmem>>, %arg16: memref<1x32xf32, #tpu.memory_space<vmem>>, %arg17: memref<1x64x32xf32, #tpu.memory_space<vmem>>) attributes {dimension_semantics = [#tpu.dimension_semantics<parallel>], iteration_bounds = array<i64: 2>, scalar_prefetch = 0 : i64, scratch_operands = 0 : i64, tpu.core_type = #tpu.core_type<tc>, window_params = [{transform_indices = @transform_0, window_bounds = array<i64: 1, 64, 32>}, {transform_indices = @transform_1, window_bounds = array<i64: 1, 8, 32>}, {pipeline_mode = #tpu.pipeline_mode<synchronous>, transform_indices = @transform_2, window_bounds = array<i64: 64, 32>}, {pipeline_mode = #tpu.pipeline_mode<synchronous>, transform_indices = @transform_3, window_bounds = array<i64: 1, 32>}, {pipeline_mode = #tpu.pipeline_mode<synchronous>, transform_indices = @transform_4, window_bounds = array<i64: 1, 32>}, {pipeline_mode = #tpu.pipeline_mode<synchronous>, transform_indices = @transform_5, window_bounds = array<i64: 32, 8>}, {pipeline_mode = #tpu.pipeline_mode<synchronous>, transform_indices = @transform_6, window_bounds = array<i64: 32, 8>}, {pipeline_mode = #tpu.pipeline_mode<synchronous>, transform_indices = @transform_7, window_bounds = array<i64: 32, 8>}, {pipeline_mode = #tpu.pipeline_mode<synchronous>, transform_indices = @transform_8, window_bounds = array<i64: 8, 32>}, {pipeline_mode = #tpu.pipeline_mode<synchronous>, transform_indices = @transform_9, window_bounds = array<i64: 1, 32>}, {pipeline_mode = #tpu.pipeline_mode<synchronous>, transform_indices = @transform_10, window_bounds = array<i64: 1, 32>}, {pipeline_mode = #tpu.pipeline_mode<synchronous>, transform_indices = @transform_11, window_bounds = array<i64: 1, 32>}, {pipeline_mode = #tpu.pipeline_mode<synchronous>, transform_indices = @transform_12, window_bounds = array<i64: 32, 64>}, {pipeline_mode = #tpu.pipeline_mode<synchronous>, transform_indices = @transform_13, window_bounds = array<i64: 1, 64>}, {pipeline_mode = #tpu.pipeline_mode<synchronous>, transform_indices = @transform_14, window_bounds = array<i64: 64, 32>}, {pipeline_mode = #tpu.pipeline_mode<synchronous>, transform_indices = @transform_15, window_bounds = array<i64: 1, 32>}, {transform_indices = @transform_16, window_bounds = array<i64: 1, 64, 32>}]} {
    %c0 = arith.constant 0 : index
    %c0_0 = arith.constant 0 : index
    %c0_1 = arith.constant 0 : index
    %0 = vector.load %arg1[%c0, %c0_0, %c0_1] : memref<1x64x32xbf16, #tpu.memory_space<vmem>>, vector<1x64x32xbf16>
    %1 = vector.shape_cast %0 : vector<1x64x32xbf16> to vector<64x32xbf16>
    %2 = arith.extf %1 : vector<64x32xbf16> to vector<64x32xf32>
    %c0_2 = arith.constant 0 : index
    %c0_3 = arith.constant 0 : index
    %3 = vector.load %arg3[%c0_2, %c0_3] : memref<64x32xf32, #tpu.memory_space<vmem>>, vector<64x32xf32>
    %4 = arith.addf %2, %3 : vector<64x32xf32>
    %c0_4 = arith.constant 0 : index
    %c0_5 = arith.constant 0 : index
    %c0_6 = arith.constant 0 : index
    %5 = vector.load %arg2[%c0_4, %c0_5, %c0_6] : memref<1x8x32xbf16, #tpu.memory_space<vmem>>, vector<1x8x32xbf16>
    %6 = vector.shape_cast %5 : vector<1x8x32xbf16> to vector<8x32xbf16>
    %7 = arith.extf %6 : vector<8x32xbf16> to vector<8x32xf32>
    %c0_7 = arith.constant 0 : index
    %c0_8 = arith.constant 0 : index
    %8 = vector.load %arg4[%c0_7, %c0_8] : memref<1x32xf32, #tpu.memory_space<vmem>>, vector<1x32xf32>
    %c0_9 = arith.constant 0 : index
    %c0_10 = arith.constant 0 : index
    %9 = vector.load %arg5[%c0_9, %c0_10] : memref<1x32xf32, #tpu.memory_space<vmem>>, vector<1x32xf32>
    %cst = arith.constant dense<0.000000e+00> : vector<64xf32>
    %10 = vector.multi_reduction <add>, %4, %cst [1] : vector<64x32xf32> to vector<64xf32>
    %11 = vector.shape_cast %10 : vector<64xf32> to vector<64x1xf32>
    %cst_11 = arith.constant 3.200000e+01 : f32
    %12 = vector.broadcast %cst_11 : f32 to vector<64x1xf32>
    %13 = arith.divf %11, %12 : vector<64x1xf32>
    %14 = vector.broadcast %13 : vector<64x1xf32> to vector<64x32xf32>
    %15 = arith.subf %4, %14 : vector<64x32xf32>
    %16 = arith.mulf %15, %15 : vector<64x32xf32>
    %cst_12 = arith.constant dense<0.000000e+00> : vector<64xf32>
    %17 = vector.multi_reduction <add>, %16, %cst_12 [1] : vector<64x32xf32> to vector<64xf32>
    %18 = vector.shape_cast %17 : vector<64xf32> to vector<64x1xf32>
    %cst_13 = arith.constant 3.200000e+01 : f32
    %19 = vector.broadcast %cst_13 : f32 to vector<64x1xf32>
    %20 = arith.divf %18, %19 : vector<64x1xf32>
    %cst_14 = arith.constant 9.99999974E-6 : f32
    %21 = vector.broadcast %cst_14 : f32 to vector<64x1xf32>
    %22 = arith.addf %20, %21 : vector<64x1xf32>
    %23 = math.rsqrt %22 : vector<64x1xf32>
    %24 = vector.broadcast %23 : vector<64x1xf32> to vector<64x32xf32>
    %25 = arith.mulf %15, %24 : vector<64x32xf32>
    %26 = vector.broadcast %8 : vector<1x32xf32> to vector<64x32xf32>
    %27 = arith.mulf %25, %26 : vector<64x32xf32>
    %28 = vector.broadcast %9 : vector<1x32xf32> to vector<64x32xf32>
    %29 = arith.addf %27, %28 : vector<64x32xf32>
    %c0_15 = arith.constant 0 : index
    %c0_16 = arith.constant 0 : index
    %30 = vector.load %arg4[%c0_15, %c0_16] : memref<1x32xf32, #tpu.memory_space<vmem>>, vector<1x32xf32>
    %c0_17 = arith.constant 0 : index
    %c0_18 = arith.constant 0 : index
    %31 = vector.load %arg5[%c0_17, %c0_18] : memref<1x32xf32, #tpu.memory_space<vmem>>, vector<1x32xf32>
    %cst_19 = arith.constant dense<0.000000e+00> : vector<8xf32>
    %32 = vector.multi_reduction <add>, %7, %cst_19 [1] : vector<8x32xf32> to vector<8xf32>
    %33 = vector.shape_cast %32 : vector<8xf32> to vector<8x1xf32>
    %cst_20 = arith.constant 3.200000e+01 : f32
    %34 = vector.broadcast %cst_20 : f32 to vector<8x1xf32>
    %35 = arith.divf %33, %34 : vector<8x1xf32>
    %36 = vector.broadcast %35 : vector<8x1xf32> to vector<8x32xf32>
    %37 = arith.subf %7, %36 : vector<8x32xf32>
    %38 = arith.mulf %37, %37 : vector<8x32xf32>
    %cst_21 = arith.constant dense<0.000000e+00> : vector<8xf32>
    %39 = vector.multi_reduction <add>, %38, %cst_21 [1] : vector<8x32xf32> to vector<8xf32>
    %40 = vector.shape_cast %39 : vector<8xf32> to vector<8x1xf32>
    %cst_22 = arith.constant 3.200000e+01 : f32
    %41 = vector.broadcast %cst_22 : f32 to vector<8x1xf32>
    %42 = arith.divf %40, %41 : vector<8x1xf32>
    %cst_23 = arith.constant 9.99999974E-6 : f32
    %43 = vector.broadcast %cst_23 : f32 to vector<8x1xf32>
    %44 = arith.addf %42, %43 : vector<8x1xf32>
    %45 = math.rsqrt %44 : vector<8x1xf32>
    %46 = vector.broadcast %45 : vector<8x1xf32> to vector<8x32xf32>
    %47 = arith.mulf %37, %46 : vector<8x32xf32>
    %48 = vector.broadcast %30 : vector<1x32xf32> to vector<8x32xf32>
    %49 = arith.mulf %47, %48 : vector<8x32xf32>
    %50 = vector.broadcast %31 : vector<1x32xf32> to vector<8x32xf32>
    %51 = arith.addf %49, %50 : vector<8x32xf32>
    %52 = arith.truncf %29 : vector<64x32xf32> to vector<64x32xbf16>
    %c0_24 = arith.constant 0 : index
    %c0_25 = arith.constant 0 : index
    %53 = vector.load %arg6[%c0_24, %c0_25] : memref<32x8xbf16, #tpu.memory_space<vmem>>, vector<32x8xbf16>
    %cst_26 = arith.constant dense<0.000000e+00> : vector<64x8xf32>
    %54 = tpu.matmul %52, %53, %cst_26 {dimension_numbers = #tpu.dot_dimension_numbers<[1], [0], [0], [1], [0, 0, 1, 1], [], []>} : vector<64x32xbf16>, vector<32x8xbf16>, vector<64x8xf32> -> vector<64x8xf32>
    %55 = arith.truncf %51 : vector<8x32xf32> to vector<8x32xbf16>
    %c0_27 = arith.constant 0 : index
    %c0_28 = arith.constant 0 : index
    %56 = vector.load %arg7[%c0_27, %c0_28] : memref<32x8xbf16, #tpu.memory_space<vmem>>, vector<32x8xbf16>
    %cst_29 = arith.constant dense<0.000000e+00> : vector<8x8xf32>
    %57 = tpu.matmul %55, %56, %cst_29 {dimension_numbers = #tpu.dot_dimension_numbers<[1], [0], [0], [1], [0, 0, 1, 1], [], []>} : vector<8x32xbf16>, vector<32x8xbf16>, vector<8x8xf32> -> vector<8x8xf32>
    %58 = arith.truncf %51 : vector<8x32xf32> to vector<8x32xbf16>
    %c0_30 = arith.constant 0 : index
    %c0_31 = arith.constant 0 : index
    %59 = vector.load %arg8[%c0_30, %c0_31] : memref<32x8xbf16, #tpu.memory_space<vmem>>, vector<32x8xbf16>
    %cst_32 = arith.constant dense<0.000000e+00> : vector<8x8xf32>
    %60 = tpu.matmul %58, %59, %cst_32 {dimension_numbers = #tpu.dot_dimension_numbers<[1], [0], [0], [1], [0, 0, 1, 1], [], []>} : vector<8x32xbf16>, vector<32x8xbf16>, vector<8x8xf32> -> vector<8x8xf32>
    %cst_33 = arith.constant 0.176776692 : f32
    %61 = vector.broadcast %cst_33 : f32 to vector<64x8xf32>
    %62 = arith.mulf %54, %61 : vector<64x8xf32>
    %63 = arith.truncf %62 : vector<64x8xf32> to vector<64x8xbf16>
    %64 = arith.truncf %57 : vector<8x8xf32> to vector<8x8xbf16>
    %65 = arith.truncf %60 : vector<8x8xf32> to vector<8x8xbf16>
    %66 = tpu.iota {dimensions = array<i32: 1>} : vector<1x8xi32>
    %cst_34 = arith.constant 0.000000e+00 : f32
    %67 = vector.broadcast %cst_34 : f32 to vector<64x8xf32>
    %c0_i32 = arith.constant 0 : i32
    %68 = vector.broadcast %c0_i32 : i32 to vector<1x8xi32>
    %69 = arith.cmpi sge, %66, %68 : vector<1x8xi32>
    %c1_i32 = arith.constant 1 : i32
    %70 = vector.broadcast %c1_i32 : i32 to vector<1x8xi32>
    %71 = arith.cmpi slt, %66, %70 : vector<1x8xi32>
    %72 = arith.andi %69, %71 : vector<1x8xi1>
    %cst_35 = arith.constant 0.000000e+00 : f32
    %73 = arith.truncf %cst_35 : f32 to bf16
    %74 = vector.shape_cast %72 : vector<1x8xi1> to vector<1x8xi1>
    %75 = vector.broadcast %74 : vector<1x8xi1> to vector<64x8xi1>
    %76 = vector.broadcast %73 : bf16 to vector<64x8xbf16>
    %77 = arith.select %75, %63, %76 : vector<64x8xi1>, vector<64x8xbf16>
    %cst_36 = arith.constant dense<0.000000e+00> : vector<64x8xf32>
    %78 = tpu.matmul %77, %64, %cst_36 {dimension_numbers = #tpu.dot_dimension_numbers<[1], [1], [0], [0], [0, 0, 1, 0], [], []>} : vector<64x8xbf16>, vector<8x8xbf16>, vector<64x8xf32> -> vector<64x8xf32>
    %cst_37 = arith.constant dense<0xFF800000> : vector<64xf32>
    %79 = vector.multi_reduction <maximumf>, %78, %cst_37 [1] : vector<64x8xf32> to vector<64xf32>
    %80 = vector.shape_cast %79 : vector<64xf32> to vector<64x1xf32>
    %81 = vector.broadcast %80 : vector<64x1xf32> to vector<64x8xf32>
    %82 = arith.subf %78, %81 : vector<64x8xf32>
    %83 = math.exp %82 : vector<64x8xf32>
    %cst_38 = arith.constant dense<0.000000e+00> : vector<64xf32>
    %84 = vector.multi_reduction <add>, %83, %cst_38 [1] : vector<64x8xf32> to vector<64xf32>
    %85 = vector.shape_cast %84 : vector<64xf32> to vector<64x1xf32>
    %86 = tpu.reciprocal %85 {approx = true} : vector<64x1xf32> -> vector<64x1xf32>
    %87 = vector.broadcast %86 : vector<64x1xf32> to vector<64x8xf32>
    %88 = arith.mulf %83, %87 : vector<64x8xf32>
    %cst_39 = arith.constant 0.000000e+00 : f32
    %89 = arith.truncf %cst_39 : f32 to bf16
    %90 = vector.shape_cast %72 : vector<1x8xi1> to vector<1x8xi1>
    %91 = vector.broadcast %90 : vector<1x8xi1> to vector<8x8xi1>
    %92 = vector.broadcast %89 : bf16 to vector<8x8xbf16>
    %93 = arith.select %91, %65, %92 : vector<8x8xi1>, vector<8x8xbf16>
    %94 = arith.truncf %88 : vector<64x8xf32> to vector<64x8xbf16>
    %cst_40 = arith.constant dense<0.000000e+00> : vector<64x8xf32>
    %95 = tpu.matmul %94, %93, %cst_40 {dimension_numbers = #tpu.dot_dimension_numbers<[1], [0], [0], [1], [0, 0, 1, 1], [], []>} : vector<64x8xbf16>, vector<8x8xbf16>, vector<64x8xf32> -> vector<64x8xf32>
    %96 = arith.addf %67, %95 : vector<64x8xf32>
    %c1_i32_41 = arith.constant 1 : i32
    %97 = vector.broadcast %c1_i32_41 : i32 to vector<1x8xi32>
    %98 = arith.cmpi sge, %66, %97 : vector<1x8xi32>
    %c2_i32 = arith.constant 2 : i32
    %99 = vector.broadcast %c2_i32 : i32 to vector<1x8xi32>
    %100 = arith.cmpi slt, %66, %99 : vector<1x8xi32>
    %101 = arith.andi %98, %100 : vector<1x8xi1>
    %cst_42 = arith.constant 0.000000e+00 : f32
    %102 = arith.truncf %cst_42 : f32 to bf16
    %103 = vector.shape_cast %101 : vector<1x8xi1> to vector<1x8xi1>
    %104 = vector.broadcast %103 : vector<1x8xi1> to vector<64x8xi1>
    %105 = vector.broadcast %102 : bf16 to vector<64x8xbf16>
    %106 = arith.select %104, %63, %105 : vector<64x8xi1>, vector<64x8xbf16>
    %cst_43 = arith.constant dense<0.000000e+00> : vector<64x8xf32>
    %107 = tpu.matmul %106, %64, %cst_43 {dimension_numbers = #tpu.dot_dimension_numbers<[1], [1], [0], [0], [0, 0, 1, 0], [], []>} : vector<64x8xbf16>, vector<8x8xbf16>, vector<64x8xf32> -> vector<64x8xf32>
    %cst_44 = arith.constant dense<0xFF800000> : vector<64xf32>
    %108 = vector.multi_reduction <maximumf>, %107, %cst_44 [1] : vector<64x8xf32> to vector<64xf32>
    %109 = vector.shape_cast %108 : vector<64xf32> to vector<64x1xf32>
    %110 = vector.broadcast %109 : vector<64x1xf32> to vector<64x8xf32>
    %111 = arith.subf %107, %110 : vector<64x8xf32>
    %112 = math.exp %111 : vector<64x8xf32>
    %cst_45 = arith.constant dense<0.000000e+00> : vector<64xf32>
    %113 = vector.multi_reduction <add>, %112, %cst_45 [1] : vector<64x8xf32> to vector<64xf32>
    %114 = vector.shape_cast %113 : vector<64xf32> to vector<64x1xf32>
    %115 = tpu.reciprocal %114 {approx = true} : vector<64x1xf32> -> vector<64x1xf32>
    %116 = vector.broadcast %115 : vector<64x1xf32> to vector<64x8xf32>
    %117 = arith.mulf %112, %116 : vector<64x8xf32>
    %cst_46 = arith.constant 0.000000e+00 : f32
    %118 = arith.truncf %cst_46 : f32 to bf16
    %119 = vector.shape_cast %101 : vector<1x8xi1> to vector<1x8xi1>
    %120 = vector.broadcast %119 : vector<1x8xi1> to vector<8x8xi1>
    %121 = vector.broadcast %118 : bf16 to vector<8x8xbf16>
    %122 = arith.select %120, %65, %121 : vector<8x8xi1>, vector<8x8xbf16>
    %123 = arith.truncf %117 : vector<64x8xf32> to vector<64x8xbf16>
    %cst_47 = arith.constant dense<0.000000e+00> : vector<64x8xf32>
    %124 = tpu.matmul %123, %122, %cst_47 {dimension_numbers = #tpu.dot_dimension_numbers<[1], [0], [0], [1], [0, 0, 1, 1], [], []>} : vector<64x8xbf16>, vector<8x8xbf16>, vector<64x8xf32> -> vector<64x8xf32>
    %125 = arith.addf %96, %124 : vector<64x8xf32>
    %c2_i32_48 = arith.constant 2 : i32
    %126 = vector.broadcast %c2_i32_48 : i32 to vector<1x8xi32>
    %127 = arith.cmpi sge, %66, %126 : vector<1x8xi32>
    %c3_i32 = arith.constant 3 : i32
    %128 = vector.broadcast %c3_i32 : i32 to vector<1x8xi32>
    %129 = arith.cmpi slt, %66, %128 : vector<1x8xi32>
    %130 = arith.andi %127, %129 : vector<1x8xi1>
    %cst_49 = arith.constant 0.000000e+00 : f32
    %131 = arith.truncf %cst_49 : f32 to bf16
    %132 = vector.shape_cast %130 : vector<1x8xi1> to vector<1x8xi1>
    %133 = vector.broadcast %132 : vector<1x8xi1> to vector<64x8xi1>
    %134 = vector.broadcast %131 : bf16 to vector<64x8xbf16>
    %135 = arith.select %133, %63, %134 : vector<64x8xi1>, vector<64x8xbf16>
    %cst_50 = arith.constant dense<0.000000e+00> : vector<64x8xf32>
    %136 = tpu.matmul %135, %64, %cst_50 {dimension_numbers = #tpu.dot_dimension_numbers<[1], [1], [0], [0], [0, 0, 1, 0], [], []>} : vector<64x8xbf16>, vector<8x8xbf16>, vector<64x8xf32> -> vector<64x8xf32>
    %cst_51 = arith.constant dense<0xFF800000> : vector<64xf32>
    %137 = vector.multi_reduction <maximumf>, %136, %cst_51 [1] : vector<64x8xf32> to vector<64xf32>
    %138 = vector.shape_cast %137 : vector<64xf32> to vector<64x1xf32>
    %139 = vector.broadcast %138 : vector<64x1xf32> to vector<64x8xf32>
    %140 = arith.subf %136, %139 : vector<64x8xf32>
    %141 = math.exp %140 : vector<64x8xf32>
    %cst_52 = arith.constant dense<0.000000e+00> : vector<64xf32>
    %142 = vector.multi_reduction <add>, %141, %cst_52 [1] : vector<64x8xf32> to vector<64xf32>
    %143 = vector.shape_cast %142 : vector<64xf32> to vector<64x1xf32>
    %144 = tpu.reciprocal %143 {approx = true} : vector<64x1xf32> -> vector<64x1xf32>
    %145 = vector.broadcast %144 : vector<64x1xf32> to vector<64x8xf32>
    %146 = arith.mulf %141, %145 : vector<64x8xf32>
    %cst_53 = arith.constant 0.000000e+00 : f32
    %147 = arith.truncf %cst_53 : f32 to bf16
    %148 = vector.shape_cast %130 : vector<1x8xi1> to vector<1x8xi1>
    %149 = vector.broadcast %148 : vector<1x8xi1> to vector<8x8xi1>
    %150 = vector.broadcast %147 : bf16 to vector<8x8xbf16>
    %151 = arith.select %149, %65, %150 : vector<8x8xi1>, vector<8x8xbf16>
    %152 = arith.truncf %146 : vector<64x8xf32> to vector<64x8xbf16>
    %cst_54 = arith.constant dense<0.000000e+00> : vector<64x8xf32>
    %153 = tpu.matmul %152, %151, %cst_54 {dimension_numbers = #tpu.dot_dimension_numbers<[1], [0], [0], [1], [0, 0, 1, 1], [], []>} : vector<64x8xbf16>, vector<8x8xbf16>, vector<64x8xf32> -> vector<64x8xf32>
    %154 = arith.addf %125, %153 : vector<64x8xf32>
    %c3_i32_55 = arith.constant 3 : i32
    %155 = vector.broadcast %c3_i32_55 : i32 to vector<1x8xi32>
    %156 = arith.cmpi sge, %66, %155 : vector<1x8xi32>
    %c4_i32 = arith.constant 4 : i32
    %157 = vector.broadcast %c4_i32 : i32 to vector<1x8xi32>
    %158 = arith.cmpi slt, %66, %157 : vector<1x8xi32>
    %159 = arith.andi %156, %158 : vector<1x8xi1>
    %cst_56 = arith.constant 0.000000e+00 : f32
    %160 = arith.truncf %cst_56 : f32 to bf16
    %161 = vector.shape_cast %159 : vector<1x8xi1> to vector<1x8xi1>
    %162 = vector.broadcast %161 : vector<1x8xi1> to vector<64x8xi1>
    %163 = vector.broadcast %160 : bf16 to vector<64x8xbf16>
    %164 = arith.select %162, %63, %163 : vector<64x8xi1>, vector<64x8xbf16>
    %cst_57 = arith.constant dense<0.000000e+00> : vector<64x8xf32>
    %165 = tpu.matmul %164, %64, %cst_57 {dimension_numbers = #tpu.dot_dimension_numbers<[1], [1], [0], [0], [0, 0, 1, 0], [], []>} : vector<64x8xbf16>, vector<8x8xbf16>, vector<64x8xf32> -> vector<64x8xf32>
    %cst_58 = arith.constant dense<0xFF800000> : vector<64xf32>
    %166 = vector.multi_reduction <maximumf>, %165, %cst_58 [1] : vector<64x8xf32> to vector<64xf32>
    %167 = vector.shape_cast %166 : vector<64xf32> to vector<64x1xf32>
    %168 = vector.broadcast %167 : vector<64x1xf32> to vector<64x8xf32>
    %169 = arith.subf %165, %168 : vector<64x8xf32>
    %170 = math.exp %169 : vector<64x8xf32>
    %cst_59 = arith.constant dense<0.000000e+00> : vector<64xf32>
    %171 = vector.multi_reduction <add>, %170, %cst_59 [1] : vector<64x8xf32> to vector<64xf32>
    %172 = vector.shape_cast %171 : vector<64xf32> to vector<64x1xf32>
    %173 = tpu.reciprocal %172 {approx = true} : vector<64x1xf32> -> vector<64x1xf32>
    %174 = vector.broadcast %173 : vector<64x1xf32> to vector<64x8xf32>
    %175 = arith.mulf %170, %174 : vector<64x8xf32>
    %cst_60 = arith.constant 0.000000e+00 : f32
    %176 = arith.truncf %cst_60 : f32 to bf16
    %177 = vector.shape_cast %159 : vector<1x8xi1> to vector<1x8xi1>
    %178 = vector.broadcast %177 : vector<1x8xi1> to vector<8x8xi1>
    %179 = vector.broadcast %176 : bf16 to vector<8x8xbf16>
    %180 = arith.select %178, %65, %179 : vector<8x8xi1>, vector<8x8xbf16>
    %181 = arith.truncf %175 : vector<64x8xf32> to vector<64x8xbf16>
    %cst_61 = arith.constant dense<0.000000e+00> : vector<64x8xf32>
    %182 = tpu.matmul %181, %180, %cst_61 {dimension_numbers = #tpu.dot_dimension_numbers<[1], [0], [0], [1], [0, 0, 1, 1], [], []>} : vector<64x8xbf16>, vector<8x8xbf16>, vector<64x8xf32> -> vector<64x8xf32>
    %183 = arith.addf %154, %182 : vector<64x8xf32>
    %c4_i32_62 = arith.constant 4 : i32
    %184 = vector.broadcast %c4_i32_62 : i32 to vector<1x8xi32>
    %185 = arith.cmpi sge, %66, %184 : vector<1x8xi32>
    %c5_i32 = arith.constant 5 : i32
    %186 = vector.broadcast %c5_i32 : i32 to vector<1x8xi32>
    %187 = arith.cmpi slt, %66, %186 : vector<1x8xi32>
    %188 = arith.andi %185, %187 : vector<1x8xi1>
    %cst_63 = arith.constant 0.000000e+00 : f32
    %189 = arith.truncf %cst_63 : f32 to bf16
    %190 = vector.shape_cast %188 : vector<1x8xi1> to vector<1x8xi1>
    %191 = vector.broadcast %190 : vector<1x8xi1> to vector<64x8xi1>
    %192 = vector.broadcast %189 : bf16 to vector<64x8xbf16>
    %193 = arith.select %191, %63, %192 : vector<64x8xi1>, vector<64x8xbf16>
    %cst_64 = arith.constant dense<0.000000e+00> : vector<64x8xf32>
    %194 = tpu.matmul %193, %64, %cst_64 {dimension_numbers = #tpu.dot_dimension_numbers<[1], [1], [0], [0], [0, 0, 1, 0], [], []>} : vector<64x8xbf16>, vector<8x8xbf16>, vector<64x8xf32> -> vector<64x8xf32>
    %cst_65 = arith.constant dense<0xFF800000> : vector<64xf32>
    %195 = vector.multi_reduction <maximumf>, %194, %cst_65 [1] : vector<64x8xf32> to vector<64xf32>
    %196 = vector.shape_cast %195 : vector<64xf32> to vector<64x1xf32>
    %197 = vector.broadcast %196 : vector<64x1xf32> to vector<64x8xf32>
    %198 = arith.subf %194, %197 : vector<64x8xf32>
    %199 = math.exp %198 : vector<64x8xf32>
    %cst_66 = arith.constant dense<0.000000e+00> : vector<64xf32>
    %200 = vector.multi_reduction <add>, %199, %cst_66 [1] : vector<64x8xf32> to vector<64xf32>
    %201 = vector.shape_cast %200 : vector<64xf32> to vector<64x1xf32>
    %202 = tpu.reciprocal %201 {approx = true} : vector<64x1xf32> -> vector<64x1xf32>
    %203 = vector.broadcast %202 : vector<64x1xf32> to vector<64x8xf32>
    %204 = arith.mulf %199, %203 : vector<64x8xf32>
    %cst_67 = arith.constant 0.000000e+00 : f32
    %205 = arith.truncf %cst_67 : f32 to bf16
    %206 = vector.shape_cast %188 : vector<1x8xi1> to vector<1x8xi1>
    %207 = vector.broadcast %206 : vector<1x8xi1> to vector<8x8xi1>
    %208 = vector.broadcast %205 : bf16 to vector<8x8xbf16>
    %209 = arith.select %207, %65, %208 : vector<8x8xi1>, vector<8x8xbf16>
    %210 = arith.truncf %204 : vector<64x8xf32> to vector<64x8xbf16>
    %cst_68 = arith.constant dense<0.000000e+00> : vector<64x8xf32>
    %211 = tpu.matmul %210, %209, %cst_68 {dimension_numbers = #tpu.dot_dimension_numbers<[1], [0], [0], [1], [0, 0, 1, 1], [], []>} : vector<64x8xbf16>, vector<8x8xbf16>, vector<64x8xf32> -> vector<64x8xf32>
    %212 = arith.addf %183, %211 : vector<64x8xf32>
    %c5_i32_69 = arith.constant 5 : i32
    %213 = vector.broadcast %c5_i32_69 : i32 to vector<1x8xi32>
    %214 = arith.cmpi sge, %66, %213 : vector<1x8xi32>
    %c6_i32 = arith.constant 6 : i32
    %215 = vector.broadcast %c6_i32 : i32 to vector<1x8xi32>
    %216 = arith.cmpi slt, %66, %215 : vector<1x8xi32>
    %217 = arith.andi %214, %216 : vector<1x8xi1>
    %cst_70 = arith.constant 0.000000e+00 : f32
    %218 = arith.truncf %cst_70 : f32 to bf16
    %219 = vector.shape_cast %217 : vector<1x8xi1> to vector<1x8xi1>
    %220 = vector.broadcast %219 : vector<1x8xi1> to vector<64x8xi1>
    %221 = vector.broadcast %218 : bf16 to vector<64x8xbf16>
    %222 = arith.select %220, %63, %221 : vector<64x8xi1>, vector<64x8xbf16>
    %cst_71 = arith.constant dense<0.000000e+00> : vector<64x8xf32>
    %223 = tpu.matmul %222, %64, %cst_71 {dimension_numbers = #tpu.dot_dimension_numbers<[1], [1], [0], [0], [0, 0, 1, 0], [], []>} : vector<64x8xbf16>, vector<8x8xbf16>, vector<64x8xf32> -> vector<64x8xf32>
    %cst_72 = arith.constant dense<0xFF800000> : vector<64xf32>
    %224 = vector.multi_reduction <maximumf>, %223, %cst_72 [1] : vector<64x8xf32> to vector<64xf32>
    %225 = vector.shape_cast %224 : vector<64xf32> to vector<64x1xf32>
    %226 = vector.broadcast %225 : vector<64x1xf32> to vector<64x8xf32>
    %227 = arith.subf %223, %226 : vector<64x8xf32>
    %228 = math.exp %227 : vector<64x8xf32>
    %cst_73 = arith.constant dense<0.000000e+00> : vector<64xf32>
    %229 = vector.multi_reduction <add>, %228, %cst_73 [1] : vector<64x8xf32> to vector<64xf32>
    %230 = vector.shape_cast %229 : vector<64xf32> to vector<64x1xf32>
    %231 = tpu.reciprocal %230 {approx = true} : vector<64x1xf32> -> vector<64x1xf32>
    %232 = vector.broadcast %231 : vector<64x1xf32> to vector<64x8xf32>
    %233 = arith.mulf %228, %232 : vector<64x8xf32>
    %cst_74 = arith.constant 0.000000e+00 : f32
    %234 = arith.truncf %cst_74 : f32 to bf16
    %235 = vector.shape_cast %217 : vector<1x8xi1> to vector<1x8xi1>
    %236 = vector.broadcast %235 : vector<1x8xi1> to vector<8x8xi1>
    %237 = vector.broadcast %234 : bf16 to vector<8x8xbf16>
    %238 = arith.select %236, %65, %237 : vector<8x8xi1>, vector<8x8xbf16>
    %239 = arith.truncf %233 : vector<64x8xf32> to vector<64x8xbf16>
    %cst_75 = arith.constant dense<0.000000e+00> : vector<64x8xf32>
    %240 = tpu.matmul %239, %238, %cst_75 {dimension_numbers = #tpu.dot_dimension_numbers<[1], [0], [0], [1], [0, 0, 1, 1], [], []>} : vector<64x8xbf16>, vector<8x8xbf16>, vector<64x8xf32> -> vector<64x8xf32>
    %241 = arith.addf %212, %240 : vector<64x8xf32>
    %c6_i32_76 = arith.constant 6 : i32
    %242 = vector.broadcast %c6_i32_76 : i32 to vector<1x8xi32>
    %243 = arith.cmpi sge, %66, %242 : vector<1x8xi32>
    %c7_i32 = arith.constant 7 : i32
    %244 = vector.broadcast %c7_i32 : i32 to vector<1x8xi32>
    %245 = arith.cmpi slt, %66, %244 : vector<1x8xi32>
    %246 = arith.andi %243, %245 : vector<1x8xi1>
    %cst_77 = arith.constant 0.000000e+00 : f32
    %247 = arith.truncf %cst_77 : f32 to bf16
    %248 = vector.shape_cast %246 : vector<1x8xi1> to vector<1x8xi1>
    %249 = vector.broadcast %248 : vector<1x8xi1> to vector<64x8xi1>
    %250 = vector.broadcast %247 : bf16 to vector<64x8xbf16>
    %251 = arith.select %249, %63, %250 : vector<64x8xi1>, vector<64x8xbf16>
    %cst_78 = arith.constant dense<0.000000e+00> : vector<64x8xf32>
    %252 = tpu.matmul %251, %64, %cst_78 {dimension_numbers = #tpu.dot_dimension_numbers<[1], [1], [0], [0], [0, 0, 1, 0], [], []>} : vector<64x8xbf16>, vector<8x8xbf16>, vector<64x8xf32> -> vector<64x8xf32>
    %cst_79 = arith.constant dense<0xFF800000> : vector<64xf32>
    %253 = vector.multi_reduction <maximumf>, %252, %cst_79 [1] : vector<64x8xf32> to vector<64xf32>
    %254 = vector.shape_cast %253 : vector<64xf32> to vector<64x1xf32>
    %255 = vector.broadcast %254 : vector<64x1xf32> to vector<64x8xf32>
    %256 = arith.subf %252, %255 : vector<64x8xf32>
    %257 = math.exp %256 : vector<64x8xf32>
    %cst_80 = arith.constant dense<0.000000e+00> : vector<64xf32>
    %258 = vector.multi_reduction <add>, %257, %cst_80 [1] : vector<64x8xf32> to vector<64xf32>
    %259 = vector.shape_cast %258 : vector<64xf32> to vector<64x1xf32>
    %260 = tpu.reciprocal %259 {approx = true} : vector<64x1xf32> -> vector<64x1xf32>
    %261 = vector.broadcast %260 : vector<64x1xf32> to vector<64x8xf32>
    %262 = arith.mulf %257, %261 : vector<64x8xf32>
    %cst_81 = arith.constant 0.000000e+00 : f32
    %263 = arith.truncf %cst_81 : f32 to bf16
    %264 = vector.shape_cast %246 : vector<1x8xi1> to vector<1x8xi1>
    %265 = vector.broadcast %264 : vector<1x8xi1> to vector<8x8xi1>
    %266 = vector.broadcast %263 : bf16 to vector<8x8xbf16>
    %267 = arith.select %265, %65, %266 : vector<8x8xi1>, vector<8x8xbf16>
    %268 = arith.truncf %262 : vector<64x8xf32> to vector<64x8xbf16>
    %cst_82 = arith.constant dense<0.000000e+00> : vector<64x8xf32>
    %269 = tpu.matmul %268, %267, %cst_82 {dimension_numbers = #tpu.dot_dimension_numbers<[1], [0], [0], [1], [0, 0, 1, 1], [], []>} : vector<64x8xbf16>, vector<8x8xbf16>, vector<64x8xf32> -> vector<64x8xf32>
    %270 = arith.addf %241, %269 : vector<64x8xf32>
    %c7_i32_83 = arith.constant 7 : i32
    %271 = vector.broadcast %c7_i32_83 : i32 to vector<1x8xi32>
    %272 = arith.cmpi sge, %66, %271 : vector<1x8xi32>
    %c8_i32 = arith.constant 8 : i32
    %273 = vector.broadcast %c8_i32 : i32 to vector<1x8xi32>
    %274 = arith.cmpi slt, %66, %273 : vector<1x8xi32>
    %275 = arith.andi %272, %274 : vector<1x8xi1>
    %cst_84 = arith.constant 0.000000e+00 : f32
    %276 = arith.truncf %cst_84 : f32 to bf16
    %277 = vector.shape_cast %275 : vector<1x8xi1> to vector<1x8xi1>
    %278 = vector.broadcast %277 : vector<1x8xi1> to vector<64x8xi1>
    %279 = vector.broadcast %276 : bf16 to vector<64x8xbf16>
    %280 = arith.select %278, %63, %279 : vector<64x8xi1>, vector<64x8xbf16>
    %cst_85 = arith.constant dense<0.000000e+00> : vector<64x8xf32>
    %281 = tpu.matmul %280, %64, %cst_85 {dimension_numbers = #tpu.dot_dimension_numbers<[1], [1], [0], [0], [0, 0, 1, 0], [], []>} : vector<64x8xbf16>, vector<8x8xbf16>, vector<64x8xf32> -> vector<64x8xf32>
    %cst_86 = arith.constant dense<0xFF800000> : vector<64xf32>
    %282 = vector.multi_reduction <maximumf>, %281, %cst_86 [1] : vector<64x8xf32> to vector<64xf32>
    %283 = vector.shape_cast %282 : vector<64xf32> to vector<64x1xf32>
    %284 = vector.broadcast %283 : vector<64x1xf32> to vector<64x8xf32>
    %285 = arith.subf %281, %284 : vector<64x8xf32>
    %286 = math.exp %285 : vector<64x8xf32>
    %cst_87 = arith.constant dense<0.000000e+00> : vector<64xf32>
    %287 = vector.multi_reduction <add>, %286, %cst_87 [1] : vector<64x8xf32> to vector<64xf32>
    %288 = vector.shape_cast %287 : vector<64xf32> to vector<64x1xf32>
    %289 = tpu.reciprocal %288 {approx = true} : vector<64x1xf32> -> vector<64x1xf32>
    %290 = vector.broadcast %289 : vector<64x1xf32> to vector<64x8xf32>
    %291 = arith.mulf %286, %290 : vector<64x8xf32>
    %cst_88 = arith.constant 0.000000e+00 : f32
    %292 = arith.truncf %cst_88 : f32 to bf16
    %293 = vector.shape_cast %275 : vector<1x8xi1> to vector<1x8xi1>
    %294 = vector.broadcast %293 : vector<1x8xi1> to vector<8x8xi1>
    %295 = vector.broadcast %292 : bf16 to vector<8x8xbf16>
    %296 = arith.select %294, %65, %295 : vector<8x8xi1>, vector<8x8xbf16>
    %297 = arith.truncf %291 : vector<64x8xf32> to vector<64x8xbf16>
    %cst_89 = arith.constant dense<0.000000e+00> : vector<64x8xf32>
    %298 = tpu.matmul %297, %296, %cst_89 {dimension_numbers = #tpu.dot_dimension_numbers<[1], [0], [0], [1], [0, 0, 1, 1], [], []>} : vector<64x8xbf16>, vector<8x8xbf16>, vector<64x8xf32> -> vector<64x8xf32>
    %299 = arith.addf %270, %298 : vector<64x8xf32>
    %300 = arith.truncf %299 : vector<64x8xf32> to vector<64x8xbf16>
    %c0_90 = arith.constant 0 : index
    %c0_91 = arith.constant 0 : index
    %301 = vector.load %arg9[%c0_90, %c0_91] : memref<8x32xbf16, #tpu.memory_space<vmem>>, vector<8x32xbf16>
    %cst_92 = arith.constant dense<0.000000e+00> : vector<64x32xf32>
    %302 = tpu.matmul %300, %301, %cst_92 {dimension_numbers = #tpu.dot_dimension_numbers<[1], [0], [0], [1], [0, 0, 1, 1], [], []>} : vector<64x8xbf16>, vector<8x32xbf16>, vector<64x32xf32> -> vector<64x32xf32>
    %c0_93 = arith.constant 0 : index
    %c0_94 = arith.constant 0 : index
    %303 = vector.load %arg10[%c0_93, %c0_94] : memref<1x32xf32, #tpu.memory_space<vmem>>, vector<1x32xf32>
    %304 = vector.broadcast %303 : vector<1x32xf32> to vector<64x32xf32>
    %305 = arith.addf %302, %304 : vector<64x32xf32>
    %306 = arith.addf %4, %305 : vector<64x32xf32>
    %c0_95 = arith.constant 0 : index
    %c0_96 = arith.constant 0 : index
    %307 = vector.load %arg11[%c0_95, %c0_96] : memref<1x32xf32, #tpu.memory_space<vmem>>, vector<1x32xf32>
    %c0_97 = arith.constant 0 : index
    %c0_98 = arith.constant 0 : index
    %308 = vector.load %arg12[%c0_97, %c0_98] : memref<1x32xf32, #tpu.memory_space<vmem>>, vector<1x32xf32>
    %cst_99 = arith.constant dense<0.000000e+00> : vector<64xf32>
    %309 = vector.multi_reduction <add>, %306, %cst_99 [1] : vector<64x32xf32> to vector<64xf32>
    %310 = vector.shape_cast %309 : vector<64xf32> to vector<64x1xf32>
    %cst_100 = arith.constant 3.200000e+01 : f32
    %311 = vector.broadcast %cst_100 : f32 to vector<64x1xf32>
    %312 = arith.divf %310, %311 : vector<64x1xf32>
    %313 = vector.broadcast %312 : vector<64x1xf32> to vector<64x32xf32>
    %314 = arith.subf %306, %313 : vector<64x32xf32>
    %315 = arith.mulf %314, %314 : vector<64x32xf32>
    %cst_101 = arith.constant dense<0.000000e+00> : vector<64xf32>
    %316 = vector.multi_reduction <add>, %315, %cst_101 [1] : vector<64x32xf32> to vector<64xf32>
    %317 = vector.shape_cast %316 : vector<64xf32> to vector<64x1xf32>
    %cst_102 = arith.constant 3.200000e+01 : f32
    %318 = vector.broadcast %cst_102 : f32 to vector<64x1xf32>
    %319 = arith.divf %317, %318 : vector<64x1xf32>
    %cst_103 = arith.constant 9.99999974E-6 : f32
    %320 = vector.broadcast %cst_103 : f32 to vector<64x1xf32>
    %321 = arith.addf %319, %320 : vector<64x1xf32>
    %322 = math.rsqrt %321 : vector<64x1xf32>
    %323 = vector.broadcast %322 : vector<64x1xf32> to vector<64x32xf32>
    %324 = arith.mulf %314, %323 : vector<64x32xf32>
    %325 = vector.broadcast %307 : vector<1x32xf32> to vector<64x32xf32>
    %326 = arith.mulf %324, %325 : vector<64x32xf32>
    %327 = vector.broadcast %308 : vector<1x32xf32> to vector<64x32xf32>
    %328 = arith.addf %326, %327 : vector<64x32xf32>
    %329 = arith.truncf %328 : vector<64x32xf32> to vector<64x32xbf16>
    %c0_104 = arith.constant 0 : index
    %c0_105 = arith.constant 0 : index
    %330 = vector.load %arg13[%c0_104, %c0_105] : memref<32x64xbf16, #tpu.memory_space<vmem>>, vector<32x64xbf16>
    %cst_106 = arith.constant dense<0.000000e+00> : vector<64x64xf32>
    %331 = tpu.matmul %329, %330, %cst_106 {dimension_numbers = #tpu.dot_dimension_numbers<[1], [0], [0], [1], [0, 0, 1, 1], [], []>} : vector<64x32xbf16>, vector<32x64xbf16>, vector<64x64xf32> -> vector<64x64xf32>
    %c0_107 = arith.constant 0 : index
    %c0_108 = arith.constant 0 : index
    %332 = vector.load %arg14[%c0_107, %c0_108] : memref<1x64xf32, #tpu.memory_space<vmem>>, vector<1x64xf32>
    %333 = vector.broadcast %332 : vector<1x64xf32> to vector<64x64xf32>
    %334 = arith.addf %331, %333 : vector<64x64xf32>
    %cst_109 = arith.constant 5.000000e-01 : f32
    %335 = vector.broadcast %cst_109 : f32 to vector<64x64xf32>
    %336 = arith.mulf %335, %334 : vector<64x64xf32>
    %337 = arith.mulf %334, %334 : vector<64x64xf32>
    %338 = arith.mulf %337, %334 : vector<64x64xf32>
    %cst_110 = arith.constant 4.471500e-02 : f32
    %339 = vector.broadcast %cst_110 : f32 to vector<64x64xf32>
    %340 = arith.mulf %339, %338 : vector<64x64xf32>
    %341 = arith.addf %334, %340 : vector<64x64xf32>
    %cst_111 = arith.constant 0.797884583 : f32
    %342 = vector.broadcast %cst_111 : f32 to vector<64x64xf32>
    %343 = arith.mulf %342, %341 : vector<64x64xf32>
    %344 = math.tanh %343 : vector<64x64xf32>
    %cst_112 = arith.constant 1.000000e+00 : f32
    %345 = vector.broadcast %cst_112 : f32 to vector<64x64xf32>
    %346 = arith.addf %345, %344 : vector<64x64xf32>
    %347 = arith.mulf %336, %346 : vector<64x64xf32>
    %348 = arith.truncf %347 : vector<64x64xf32> to vector<64x64xbf16>
    %c0_113 = arith.constant 0 : index
    %c0_114 = arith.constant 0 : index
    %349 = vector.load %arg15[%c0_113, %c0_114] : memref<64x32xbf16, #tpu.memory_space<vmem>>, vector<64x32xbf16>
    %cst_115 = arith.constant dense<0.000000e+00> : vector<64x32xf32>
    %350 = tpu.matmul %348, %349, %cst_115 {dimension_numbers = #tpu.dot_dimension_numbers<[1], [0], [0], [1], [0, 0, 1, 1], [], []>} : vector<64x64xbf16>, vector<64x32xbf16>, vector<64x32xf32> -> vector<64x32xf32>
    %c0_116 = arith.constant 0 : index
    %c0_117 = arith.constant 0 : index
    %351 = vector.load %arg16[%c0_116, %c0_117] : memref<1x32xf32, #tpu.memory_space<vmem>>, vector<1x32xf32>
    %352 = vector.broadcast %351 : vector<1x32xf32> to vector<64x32xf32>
    %353 = arith.addf %350, %352 : vector<64x32xf32>
    %354 = arith.addf %306, %353 : vector<64x32xf32>
    %c0_118 = arith.constant 0 : index
    %c0_119 = arith.constant 0 : index
    %c0_120 = arith.constant 0 : index
    %355 = vector.load %arg17[%c0_118, %c0_119, %c0_120] : memref<1x64x32xf32, #tpu.memory_space<vmem>>, vector<1x64x32xf32>
    %356 = vector.shape_cast %355 : vector<1x64x32xf32> to vector<64x32xf32>
    %357 = vector.shape_cast %354 : vector<64x32xf32> to vector<1x64x32xf32>
    tpu.vector_store %arg17[%c0_118, %c0_119, %c0_120], %357 {strides = array<i32>} : memref<1x64x32xf32, #tpu.memory_space<vmem>>, vector<1x64x32xf32>,
    return
  }
  func.func @transform_0(%arg0: i32) -> (i32, i32, i32) {
    %c0_i32 = arith.constant 0 : i32
    %c0_i32_0 = arith.constant 0 : i32
    %c0_i32_1 = arith.constant 0 : i32
    return %arg0, %c0_i32, %c0_i32_0 : i32, i32, i32
  }
  func.func @transform_1(%arg0: i32) -> (i32, i32, i32) {
    %c0_i32 = arith.constant 0 : i32
    %c0_i32_0 = arith.constant 0 : i32
    %c0_i32_1 = arith.constant 0 : i32
    return %arg0, %c0_i32, %c0_i32_0 : i32, i32, i32
  }
  func.func @transform_2(%arg0: i32) -> (i32, i32) {
    %c0_i32 = arith.constant 0 : i32
    %c0_i32_0 = arith.constant 0 : i32
    %c0_i32_1 = arith.constant 0 : i32
    return %c0_i32, %c0_i32_0 : i32, i32
  }
  func.func @transform_3(%arg0: i32) -> (i32, i32) {
    %c0_i32 = arith.constant 0 : i32
    %c0_i32_0 = arith.constant 0 : i32
    %c0_i32_1 = arith.constant 0 : i32
    return %c0_i32, %c0_i32_0 : i32, i32
  }
  func.func @transform_4(%arg0: i32) -> (i32, i32) {
    %c0_i32 = arith.constant 0 : i32
    %c0_i32_0 = arith.constant 0 : i32
    %c0_i32_1 = arith.constant 0 : i32
    return %c0_i32, %c0_i32_0 : i32, i32
  }
  func.func @transform_5(%arg0: i32) -> (i32, i32) {
    %c0_i32 = arith.constant 0 : i32
    %c0_i32_0 = arith.constant 0 : i32
    %c0_i32_1 = arith.constant 0 : i32
    return %c0_i32, %c0_i32_0 : i32, i32
  }
  func.func @transform_6(%arg0: i32) -> (i32, i32) {
    %c0_i32 = arith.constant 0 : i32
    %c0_i32_0 = arith.constant 0 : i32
    %c0_i32_1 = arith.constant 0 : i32
    return %c0_i32, %c0_i32_0 : i32, i32
  }
  func.func @transform_7(%arg0: i32) -> (i32, i32) {
    %c0_i32 = arith.constant 0 : i32
    %c0_i32_0 = arith.constant 0 : i32
    %c0_i32_1 = arith.constant 0 : i32
    return %c0_i32, %c0_i32_0 : i32, i32
  }
  func.func @transform_8(%arg0: i32) -> (i32, i32) {
    %c0_i32 = arith.constant 0 : i32
    %c0_i32_0 = arith.constant 0 : i32
    %c0_i32_1 = arith.constant 0 : i32
    return %c0_i32, %c0_i32_0 : i32, i32
  }
  func.func @transform_9(%arg0: i32) -> (i32, i32) {
    %c0_i32 = arith.constant 0 : i32
    %c0_i32_0 = arith.constant 0 : i32
    %c0_i32_1 = arith.constant 0 : i32
    return %c0_i32, %c0_i32_0 : i32, i32
  }
  func.func @transform_10(%arg0: i32) -> (i32, i32) {
    %c0_i32 = arith.constant 0 : i32
    %c0_i32_0 = arith.constant 0 : i32
    %c0_i32_1 = arith.constant 0 : i32
    return %c0_i32, %c0_i32_0 : i32, i32
  }
  func.func @transform_11(%arg0: i32) -> (i32, i32) {
    %c0_i32 = arith.constant 0 : i32
    %c0_i32_0 = arith.constant 0 : i32
    %c0_i32_1 = arith.constant 0 : i32
    return %c0_i32, %c0_i32_0 : i32, i32
  }
  func.func @transform_12(%arg0: i32) -> (i32, i32) {
    %c0_i32 = arith.constant 0 : i32
    %c0_i32_0 = arith.constant 0 : i32
    %c0_i32_1 = arith.constant 0 : i32
    return %c0_i32, %c0_i32_0 : i32, i32
  }
  func.func @transform_13(%arg0: i32) -> (i32, i32) {
    %c0_i32 = arith.constant 0 : i32
    %c0_i32_0 = arith.constant 0 : i32
    %c0_i32_1 = arith.constant 0 : i32
    return %c0_i32, %c0_i32_0 : i32, i32
  }
  func.func @transform_14(%arg0: i32) -> (i32, i32) {
    %c0_i32 = arith.constant 0 : i32
    %c0_i32_0 = arith.constant 0 : i32
    %c0_i32_1 = arith.constant 0 : i32
    return %c0_i32, %c0_i32_0 : i32, i32
  }
  func.func @transform_15(%arg0: i32) -> (i32, i32) {
    %c0_i32 = arith.constant 0 : i32
    %c0_i32_0 = arith.constant 0 : i32
    %c0_i32_1 = arith.constant 0 : i32
    return %c0_i32, %c0_i32_0 : i32, i32
  }
  func.func @transform_16(%arg0: i32) -> (i32, i32, i32) {
    %c0_i32 = arith.constant 0 : i32
    %c0_i32_0 = arith.constant 0 : i32
    %c0_i32_1 = arith.constant 0 : i32
    return %arg0, %c0_i32, %c0_i32_0 : i32, i32, i32
  }
}

</mosaic_0001>

<bundles_post_ra>
// kernel: tpu_custom_call.1
= control target key start
LH: loop header
LB: loop body
LE: loop exit
PB: predicated region body
PF: predicated region fallthrough
CT: control target
= control target key end

     0   :  { %s3854_s21 = smov 0   ;;  %s5563_s0 = inlined_call_operand.vmem [shape: bf16[2,64,32], index: 0, kind: input, shape index: {}]   ;;  %s5564_s1 = inlined_call_operand.vmem [shape: bf16[2,8,32], index: 1, kind: input, shape index: {}]   ;;  %s5565_s2 = inlined_call_operand.vmem [shape: f32[64,32], index: 2, kind: input, shape index: {}]   ;;  %s5566_s3 = inlined_call_operand.vmem [shape: f32[1,32], index: 3, kind: input, shape index: {}]   ;;  %s5567_s4 = inlined_call_operand.vmem [shape: f32[1,32], index: 4, kind: input, shape index: {}]   ;;  %s5568_s5 = inlined_call_operand.vmem [shape: bf16[32,8], index: 5, kind: input, shape index: {}]   ;;  %s5569_s6 = inlined_call_operand.vmem [shape: bf16[32,8], index: 6, kind: input, shape index: {}]   ;;  %s5570_s7 = inlined_call_operand.vmem [shape: bf16[32,8], index: 7, kind: input, shape index: {}]   ;;  %s5571_s8 = inlined_call_operand.vmem [shape: bf16[8,32], index: 8, kind: input, shape index: {}]   ;;  %s5572_s9 = inlined_call_operand.vmem [shape: f32[1,32], index: 9, kind: input, shape index: {}]   ;;  %s5573_s10 = inlined_call_operand.vmem [shape: f32[1,32], index: 10, kind: input, shape index: {}]   ;;  %s5574_s11 = inlined_call_operand.vmem [shape: f32[1,32], index: 11, kind: input, shape index: {}]   ;;  %s5575_s12 = inlined_call_operand.vmem [shape: bf16[32,64], index: 12, kind: input, shape index: {}]   ;;  %s5576_s13 = inlined_call_operand.vmem [shape: f32[1,64], index: 13, kind: input, shape index: {}]   ;;  %s5577_s14 = inlined_call_operand.vmem [shape: bf16[64,32], index: 14, kind: input, shape index: {}]   ;;  %s5578_s15 = inlined_call_operand.vmem [shape: f32[1,32], index: 15, kind: input, shape index: {}]   ;;  %s5579_s16 = inlined_call_operand.vmem [shape: f32[2,64,32], index: 16, kind: output, shape index: {}]  }
   0x1   :  { %5595 = sst [smem:[#allocation15_spill]] %s5563_s0 }
   0x2 LB: > { %s3261_s22 = sadd.s32 4294967295, %s3766_s21   ;;  %p3265_p0 = scmp.ge.s32.totalorder %s3766_s21, 1  ;;  %s3766_s21 = sphi %s3854_s21, %s26_s21  }
   0x3   : > { %p471_p1 = scmp.lt.s32.totalorder %s3766_s21, 3 }
   0x5   : > { %p472_p2 = pnand %p3265_p0, %p471_p1 }
   0x7   : > { %475 = sbr.rel (%p472_p2) target bundleno = 2534 (0x9e6), region = 84 }
   0xc   : > { %p525_p3 = scmp.lt.s32.totalorder %s3261_s22, 1  ;;  %vm5580_vm0 = vcmask 261120   ;;  %s5596_s30 = sld [smem:[#allocation15_spill]]  ;;  %v556_v2 = vld [vmem:[%s5565_s2] sm:$0xff]  ;;  %v558_v5 = vld [vmem:[%s5565_s2 + $0x10] sm:$0xff]  ;;  %v559_v9 = vld [vmem:[%s5565_s2 + $0x18] sm:$0xff] }
   0xd   : > { %v557_v15 = vld [vmem:[%s5565_s2 + $0x8] sm:$0xff]  ;;  %v560_v19 = vld [vmem:[%s5565_s2 + $0x20] sm:$0xff]  ;;  %v562_v32 = vld [vmem:[%s5565_s2 + $0x30] sm:$0xff]  ;;  %v3768_v35 = vmov 32.0  }
   0xe   : > { %s5696_s22 = smov (!%p525_p3, %s3261_s22), 1  ;;  %v561_v26 = vld [vmem:[%s5565_s2 + $0x28] sm:$0xff]  ;;  %3452 = vrcp.f32 %v3768_v35  ;;  %v563_v51 = vld [vmem:[%s5565_s2 + $0x38] sm:$0xff] }
   0xf   : > { %s3268_s23 = sshll.u32 %s5696_s22, 2  ;;  %s3403_s27 = sshll.u32 %s5696_s22, 5 }
  0x10   : > { %s533_s26 = scalar_lea.vmem %s5564_s1, %s3268_s23  ;;  %s3404_s23 = sshll.u32 %s5696_s22, 6 }
  0x11   : > { %v3868_v0 = vld [vmem:[%s533_s26] sm:$0xf]  ;;  %s538_s26 = scalar_lea.vmem %s5579_s16, %s3404_s23 }
  0x12   : > { %v573_v1 = vunpack.c.l.bf16 %v3868_v0  ;;  %s3875_s0 = scalar_lea.vmem %s5596_s30, %s3403_s27 }
  0x13   : > { %v3418_v3 = vld [vmem:[%s3875_s0] sm:$0xff]   ;;  %v3433_v4 = vld [vmem:[%s3875_s0 + $0x8] sm:$0xff]   ;;  %v3434_v14 = vld [vmem:[%s3875_s0 + $0x10] sm:$0xff]  }
  0x14   : > { %v782_v6 = vsel %vm5580_vm0, %v573_v1, 0.0  ;;  %v3419_v7 = vunpack.c.l.bf16 %v3418_v3  ;;  %v3423_v8 = vunpack.c.l.bf16 %v3433_v4  ;;  %v3424_v10 = vunpack.c.h.bf16 %v3433_v4  ;;  %v3435_v29 = vld [vmem:[%s3875_s0 + $0x18] sm:$0xff]   ;;  %v3453_v36 = vpop.eup %3452 }
  0x15   : > { %783 = vadd.xlane.f32.xlu1 %v782_v6  ;;  %v3420_v13 = vunpack.c.h.bf16 %v3418_v3  ;;  %v3427_v17 = vunpack.c.l.bf16 %v3434_v14  ;;  %v3428_v25 = vunpack.c.h.bf16 %v3434_v14  ;;  %v3431_v31 = vunpack.c.l.bf16 %v3435_v29 }
  0x16   : > { %v3891_v11 = vadd.f32 %v3419_v7, %v556_v2  ;;  %v3893_v12 = vadd.f32 %v3423_v8, %v558_v5  ;;  %v3899_v16 = vadd.f32 %v3424_v10, %v559_v9  ;;  %v602_v37 = vmul.f32 32.0, %v3453_v36 }
  0x17   : > { %v3910_v22 = vadd.f32 %v3420_v13, %v557_v15  ;;  %v3912_v23 = vadd.f32 %v3427_v17, %v560_v19  ;;  %v3921_v28 = vadd.f32 %v3428_v25, %v561_v26  ;;  %v3929_v33 = vadd.f32 %v3431_v31, %v562_v32 }
  0x18   : > { %5597 = vst [vmem:[#allocation2_spill] sm:$0xff] %v3891_v11  ;;  %v577_v18 = vsel %vm5580_vm0, %v3891_v11, 0.0  ;;  %v586_v20 = vsel %vm5580_vm0, %v3899_v16, 0.0  ;;  %v583_v21 = vsel %vm5580_vm0, %v3893_v12, 0.0  ;;  %v603_v38 = vsub.f32 1.0, %v602_v37 }
  0x19   : > { %5598 = vst [vmem:[#allocation3_spill] sm:$0xff] %v3893_v12  ;;  %578 = vadd.xlane.f32.xlu0 %v577_v18  ;;  %587 = vadd.xlane.f32.xlu2 %v586_v20  ;;  %v580_v24 = vsel %vm5580_vm0, %v3910_v22, 0.0  ;;  %v589_v27 = vsel %vm5580_vm0, %v3912_v23, 0.0  ;;  %v592_v30 = vsel %vm5580_vm0, %v3921_v28, 0.0  ;;  %v595_v34 = vsel %vm5580_vm0, %v3929_v33, 0.0 }
  0x1a   : > { %5599 = vst [vmem:[#allocation4_spill] sm:$0xff] %v3899_v16  ;;  %v604_v39 = vmul.f32 %v3453_v36, %v603_v38  ;;  %vm606_vm1 = vweird.f32 %v3453_v36  ;;  %v3432_v48 = vunpack.c.h.bf16 %v3435_v29  ;;  %v3406_v29 = vld [vmem:[%s5568_s5 + $0x8] sm:$0xff] }
  0x1b   : > { %5600 = vst [vmem:[#allocation5_spill] sm:$0xff] %v3910_v22  ;;  %844 = vmatpush.bf16.msra.mxu0 %v3406_v29 }
  0x1c   : > { %5601 = vst [vmem:[#allocation6_spill] sm:$0xff] %v3912_v23  ;;  %v605_v40 = vadd.f32 %v3453_v36, %v604_v39  ;;  %v3949_v55 = vadd.f32 %v3432_v48, %v563_v51  ;;  %v3408_v39 = vld [vmem:[%s5569_s6 + $0x8] sm:$0xff] }
  0x1d   : > { %584 = vadd.xlane.f32.xlu1 %v583_v21  ;;  %5602 = vst [vmem:[#allocation7_spill] sm:$0xff] %v3921_v28  ;;  %893 = vmatpush.bf16.msra.mxu1 %v3408_v39 }
  0x1e   : > { %5603 = vst [vmem:[#allocation8_spill] sm:$0xff] %v3929_v33  ;;  %v3933_v42 = vsel %vm606_vm1, %v3453_v36, %v605_v40  ;;  %v598_v2 = vsel %vm5580_vm0, %v3949_v55, 0.0  ;;  %v3410_v40 = vld [vmem:[%s5570_s7 + $0x8] sm:$0xff] }
  0x1f   : > { %5604 = vst [vmem:[#allocation9_spill] sm:$0xff] %v3933_v42  ;;  %922 = vmatpush.bf16.msra.mxu2 %v3410_v40 }
  0x20   : > { %5605 = vst [vmem:[#allocation10_spill] sm:$0xff] %v3949_v55 }
  0x21   : > { %581 = vadd.xlane.f32.xlu0 %v580_v24  ;;  %590 = vadd.xlane.f32.xlu2 %v589_v27 }
  0x29   : > { %593 = vadd.xlane.f32.xlu0 %v592_v30 }
  0x31   : > { %596 = vadd.xlane.f32.xlu0 %v595_v34  ;;  %v3405_v34 = vld [vmem:[%s5568_s5] sm:$0xff] }
  0x32   : > { %845 = vmatpush.bf16.msra.mxu0 %v3405_v34 }
  0x88   : > { %v784_v41 = vpop.xlane.xlu1 %783 }
  0x89   : > { %v785_v56 = vmul.f32 %v784_v41, %v3933_v42 }
  0x8b   : > { %v3962_v62 = vsub.f32 %v573_v1, %v785_v56 }
  0x8c   : > { %v579_v43 = vpop.xlane.xlu0 %578  ;;  %v588_v47 = vpop.xlane.xlu2 %587 }
  0x8d   : > { %v608_v44 = vmul.f32 %v3933_v42, %v579_v43  ;;  %v611_v59 = vmul.f32 %v3933_v42, %v588_v47  ;;  %v787_v8 = vmul.f32 %v3962_v62, %v3962_v62 }
  0x8f   : > { %v3937_v45 = vsub.f32 %v3891_v11, %v608_v44  ;;  %v3965_v63 = vsub.f32 %v3899_v16, %v611_v59  ;;  %v788_v14 = vsel %vm5580_vm0, %v787_v8, 0.0 }
  0x90   : > { %v585_v46 = vpop.xlane.xlu1 %584 }
  0x91   : > { %v610_v49 = vmul.f32 %v3933_v42, %v585_v46  ;;  %v624_v50 = vmul.f32 %v3937_v45, %v3937_v45  ;;  %v627_v1 = vmul.f32 %v3965_v63, %v3965_v63 }
  0x93   : > { %v3946_v52 = vsub.f32 %v3893_v12, %v610_v49  ;;  %v632_v53 = vsel %vm5580_vm0, %v624_v50, 0.0  ;;  %v641_v13 = vsel %vm5580_vm0, %v627_v1, 0.0  ;;  %v3407_v49 = vld [vmem:[%s5569_s6] sm:$0xff] }
  0x94   : > { %633 = vadd.xlane.f32.xlu1 %v632_v53  ;;  %v582_v54 = vpop.xlane.xlu0 %581  ;;  %v591_v4 = vpop.xlane.xlu2 %590  ;;  %v3409_v50 = vld [vmem:[%s5570_s7] sm:$0xff]  ;;  %894 = vmatpush.bf16.msra.mxu1 %v3407_v49 }
  0x95   : > { %v609_v57 = vmul.f32 %v3933_v42, %v582_v54  ;;  %v626_v58 = vmul.f32 %v3946_v52, %v3946_v52  ;;  %v612_v0 = vmul.f32 %v3933_v42, %v591_v4  ;;  %923 = vmatpush.bf16.msra.mxu2 %v3409_v50 }
  0x97   : > { %v3957_v60 = vsub.f32 %v3910_v22, %v609_v57  ;;  %v638_v61 = vsel %vm5580_vm0, %v626_v58, 0.0  ;;  %v3982_v10 = vsub.f32 %v3912_v23, %v612_v0 }
  0x98   : > { %639 = vadd.xlane.f32.xlu0 %v638_v61 }
  0x99   : > { %v625_v3 = vmul.f32 %v3957_v60, %v3957_v60  ;;  %v628_v20 = vmul.f32 %v3982_v10, %v3982_v10 }
  0x9b   : > { %v635_v5 = vsel %vm5580_vm0, %v625_v3, 0.0  ;;  %v644_v24 = vsel %vm5580_vm0, %v628_v20, 0.0 }
  0x9c   : > { %599 = vadd.xlane.f32.xlu1 %v598_v2  ;;  %636 = vadd.xlane.f32.xlu2 %v635_v5  ;;  %v594_v6 = vpop.xlane.xlu0 %593 }
  0x9d   : > { %v613_v7 = vmul.f32 %v3933_v42, %v594_v6 }
  0x9f   : > { %v3979_v9 = vsub.f32 %v3921_v28, %v613_v7 }
  0xa1   : > { %v629_v15 = vmul.f32 %v3979_v9, %v3979_v9 }
  0xa3   : > { %v647_v17 = vsel %vm5580_vm0, %v629_v15, 0.0 }
  0xa4   : > { %642 = vadd.xlane.f32.xlu1 %v641_v13  ;;  %789 = vadd.xlane.f32.xlu2 %v788_v14  ;;  %v597_v18 = vpop.xlane.xlu0 %596 }
  0xa5   : > { %648 = vadd.xlane.f32.xlu0 %v647_v17  ;;  %v614_v19 = vmul.f32 %v3933_v42, %v597_v18 }
  0xa7   : > { %v3993_v21 = vsub.f32 %v3929_v33, %v614_v19 }
  0xa9   : > { %v630_v25 = vmul.f32 %v3993_v21, %v3993_v21 }
  0xab   : > { %v650_v26 = vsel %vm5580_vm0, %v630_v25, 0.0 }
  0xac   : > { %645 = vadd.xlane.f32.xlu2 %v644_v24  ;;  %651 = vadd.xlane.f32.xlu1 %v650_v26 }
 0x107   : > { %v634_v27 = vpop.xlane.xlu1 %633 }
 0x108   : > { %v656_v30 = vmul.f32 %v634_v27, %v3933_v42 }
 0x10a   : > { %v664_v31 = vadd.f32 1e-05, %v656_v30  ;;  %v4048_v30 = vld [vmem:[%s5566_s3] ss:$0 sm:$0xff] }
 0x10b   : > { %v640_v32 = vpop.xlane.xlu0 %639 }
 0x10c   : > { %3454 = vrsqrt.f32 %v664_v31  ;;  %v658_v35 = vmul.f32 %v640_v32, %v3933_v42  ;;  %vm678_vm3 = vweird.f32 %v664_v31 }
 0x10e   : > { %v4007_v36 = vadd.f32 1e-05, %v658_v35 }
 0x10f   : > { %v600_v37 = vpop.xlane.xlu1 %599  ;;  %v637_v38 = vpop.xlane.xlu2 %636 }
 0x110   : > { %v615_v41 = vmul.f32 %v3933_v42, %v600_v37  ;;  %v657_v43 = vmul.f32 %v637_v38, %v3933_v42  ;;  %3456 = vrsqrt.f32 %v4007_v36  ;;  %vm698_vm12 = vweird.f32 %v4007_v36 }
 0x112   : > { %v3455_v44 = vpop.eup %3454  ;;  %v4019_v46 = vsub.f32 %v3949_v55, %v615_v41  ;;  %v665_v47 = vadd.f32 1e-05, %v657_v43 }
 0x113   : > { %v673_v48 = vmul.f32 %v3455_v44, %v664_v31  ;;  %vm679_vm2 = vweird.f32 %v3455_v44 }
 0x114   : > { %3458 = vrsqrt.f32 %v665_v47  ;;  %v631_v51 = vmul.f32 %v4019_v46, %v4019_v46  ;;  %vm680_vm4 = vmor %vm678_vm3, %vm679_vm2  ;;  %vm688_vm5 = vweird.f32 %v665_v47 }
 0x115   : > { %v674_v53 = vmul.f32 %v3455_v44, %v673_v48 }
 0x116   : > { %v653_v54 = vsel %vm5580_vm0, %v631_v51, 0.0  ;;  %v4030_v59 = vpop.eup %3456 }
 0x117   : > { %v675_v56 = vmul.f32 0.5, %v674_v53  ;;  %v643_v57 = vpop.xlane.xlu1 %642  ;;  %654 = vadd.xlane.f32.xlu2 %v653_v54  ;;  %v790_v58 = vpop.xlane.xlu2 %789  ;;  %v693_v8 = vmul.f32 %v4030_v59, %v4007_v36  ;;  %vm699_vm13 = vweird.f32 %v4030_v59 }
 0x118   : > { %v659_v61 = vmul.f32 %v643_v57, %v3933_v42  ;;  %v791_v2 = vmul.f32 %v790_v58, %v3933_v42  ;;  %v649_v3 = vpop.xlane.xlu0 %648  ;;  %vm700_vm1 = vmor %vm698_vm12, %vm699_vm13 }
 0x119   : > { %v676_v4 = vsub.f32 1.5, %v675_v56  ;;  %v661_v0 = vmul.f32 %v649_v3, %v3933_v42  ;;  %v694_v18 = vmul.f32 %v4030_v59, %v693_v8 }
 0x11a   : > { %v3459_v5 = vpop.eup %3458  ;;  %v667_v6 = vadd.f32 1e-05, %v659_v61  ;;  %v792_v7 = vadd.f32 1e-05, %v791_v2 }
 0x11b   : > { %v677_v1 = vmul.f32 %v3455_v44, %v676_v4  ;;  %v683_v13 = vmul.f32 %v3459_v5, %v665_v47  ;;  %v4037_v15 = vadd.f32 1e-05, %v661_v0  ;;  %vm689_vm6 = vweird.f32 %v3459_v5 }
 0x11c   : > { %3460 = vrsqrt.f32 %v667_v6  ;;  %vm690_vm7 = vmor %vm688_vm5, %vm689_vm6  ;;  %v695_v32 = vmul.f32 0.5, %v694_v18  ;;  %vm708_vm8 = vweird.f32 %v667_v6  ;;  %vm799_vm10 = vweird.f32 %v792_v7 }
 0x11d   : > { %v684_v14 = vmul.f32 %v3459_v5, %v683_v13  ;;  %3462 = vrsqrt.f32 %v792_v7  ;;  %v681_v17 = vsel %vm680_vm4, %v3455_v44, %v677_v1  ;;  %vm728_vm4 = vweird.f32 %v4037_v15 }
 0x11e   : > { %3464 = vrsqrt.f32 %v4037_v15  ;;  %v752_v29 = vmul.f32 %v681_v17, %v3937_v45  ;;  %v4056_v45 = vld [vmem:[%s5567_s4] ss:$0 sm:$0xff]  ;;  %v696_v44 = vsub.f32 1.5, %v695_v32 }
 0x11f   : > { %v685_v19 = vmul.f32 0.5, %v684_v14  ;;  %v646_v20 = vpop.xlane.xlu2 %645 }
 0x120   : > { %v660_v24 = vmul.f32 %v646_v20, %v3933_v42  ;;  %v763_v43 = vmul.f32 %v4048_v30, %v752_v29  ;;  %v697_v58 = vmul.f32 %v4030_v59, %v696_v44 }
 0x121   : > { %v686_v25 = vsub.f32 1.5, %v685_v19 }
 0x122   : > { %v3461_v26 = vpop.eup %3460  ;;  %v4042_v27 = vadd.f32 1e-05, %v660_v24  ;;  %v774_v56 = vadd.f32 %v4056_v45, %v763_v43  ;;  %v701_v0 = vsel %vm700_vm1, %v4030_v59, %v697_v58  ;;  %v652_v43 = vpop.xlane.xlu1 %651 }
 0x123   : > { %v3463_v31 = vpop.eup %3462  ;;  %v687_v34 = vmul.f32 %v3459_v5, %v686_v25  ;;  %v703_v35 = vmul.f32 %v3461_v26, %v667_v6  ;;  %vm709_vm9 = vweird.f32 %v3461_v26  ;;  %v754_v18 = vmul.f32 %v701_v0, %v3946_v52 }
 0x124   : > { %v794_v37 = vmul.f32 %v3463_v31, %v792_v7  ;;  %3466 = vrsqrt.f32 %v4042_v27  ;;  %v3465_v48 = vpop.eup %3464  ;;  %vm800_vm11 = vweird.f32 %v3463_v31  ;;  %vm4061_vm14 = vmor %vm708_vm8, %vm709_vm9  ;;  %vm718_vm2 = vweird.f32 %v4042_v27 }
 0x125   : > { %v691_v38 = vsel %vm690_vm7, %v3459_v5, %v687_v34  ;;  %v704_v39 = vmul.f32 %v3461_v26, %v703_v35  ;;  %vm801_vm15 = vmor %vm799_vm10, %vm800_vm11  ;;  %v723_v2 = vmul.f32 %v3465_v48, %v4037_v15  ;;  %v765_v29 = vmul.f32 %v4048_v30, %v754_v18 }
 0x126   : > { %v795_v40 = vmul.f32 %v3463_v31, %v794_v37  ;;  %v753_v41 = vmul.f32 %v691_v38, %v3957_v60  ;;  %vm729_vm5 = vweird.f32 %v3465_v48  ;;  %v662_v44 = vmul.f32 %v652_v43, %v3933_v42 }
 0x127   : > { %v705_v47 = vmul.f32 0.5, %v704_v39  ;;  %v724_v1 = vmul.f32 %v3465_v48, %v723_v2  ;;  %vm730_vm7 = vmor %vm728_vm4, %vm729_vm5 }
 0x128   : > { %v796_v49 = vmul.f32 0.5, %v795_v40  ;;  %v764_v50 = vmul.f32 %v4048_v30, %v753_v41 }
 0x129   : > { %v706_v60 = vsub.f32 1.5, %v705_v47  ;;  %v725_v19 = vmul.f32 0.5, %v724_v1  ;;  %v670_v47 = vadd.f32 1e-05, %v662_v44 }
 0x12a   : > { %v3467_v51 = vpop.eup %3466  ;;  %v797_v54 = vsub.f32 1.5, %v796_v49  ;;  %v775_v57 = vadd.f32 %v4056_v45, %v764_v50 }
 0x12b   : > { %v707_v61 = vmul.f32 %v3461_v26, %v706_v60  ;;  %v713_v36 = vmul.f32 %v3467_v51, %v4042_v27  ;;  %v726_v59 = vsub.f32 1.5, %v725_v19  ;;  %vm719_vm3 = vweird.f32 %v3467_v51 }
 0x12c   : > { %v798_v3 = vmul.f32 %v3463_v31, %v797_v54  ;;  %v806_v4 = vpack.c.bf16 %v775_v57, %v774_v56  ;;  %vm720_vm6 = vmor %vm718_vm2, %vm719_vm3  ;;  %3468 = vrsqrt.f32 %v670_v47  ;;  %vm738_vm8 = vweird.f32 %v670_v47 }
 0x12d   : > { %v711_v5 = vsel %vm4061_vm14, %v3461_v26, %v707_v61  ;;  %v714_v6 = vmul.f32 %v3467_v51, %v713_v36  ;;  %v947_v36 = vlaneseq }
 0x12e   : > { %3279 = vmatmul.msk.bf16.vlgmr.msra.gmra.mxu0 %vm5580_vm0, %v806_v4  ;;  %v802_v7 = vsel %vm801_vm15, %v3463_v31, %v798_v3  ;;  %v755_v13 = vmul.f32 %v711_v5, %v3965_v63  ;;  %v776_v63 = vadd.f32 %v4056_v45, %v765_v29  ;;  %v727_v31 = vmul.f32 %v3465_v48, %v726_v59 }
 0x12f   : > { %v803_v8 = vmul.f32 %v802_v7, %v3962_v62  ;;  %v715_v14 = vmul.f32 0.5, %v714_v6  ;;  %v4098_v6 = vand.u32 127, %v947_v36 }
 0x130   : > { %v766_v24 = vmul.f32 %v4048_v30, %v755_v13  ;;  %v731_v27 = vsel %vm730_vm7, %v3465_v48, %v727_v31 }
 0x131   : > { %v804_v17 = vmul.f32 %v4048_v30, %v803_v8  ;;  %v716_v25 = vsub.f32 1.5, %v715_v14  ;;  %v757_v37 = vmul.f32 %v731_v27, %v3979_v9  ;;  %vm1121_vm14 = vcmp.ge.s32.totalorder %v4098_v6, 1 }
 0x132   : > { %v777_v62 = vadd.f32 %v4056_v45, %v766_v24  ;;  %v3469_v48 = vpop.eup %3468  ;;  %vm1122_vm15 = vcmp.lt.s32.totalorder %v4098_v6, 2  ;;  %vm1378_vm1 = vcmp.ge.s32.totalorder %v4098_v6, 2  ;;  %vm1379_vm2 = vcmp.lt.s32.totalorder %v4098_v6, 3 }
 0x133   : > { %v805_v20 = vadd.f32 %v4056_v45, %v804_v17  ;;  %v717_v52 = vmul.f32 %v3467_v51, %v716_v25  ;;  %v768_v15 = vmul.f32 %v4048_v30, %v757_v37  ;;  %vm739_vm9 = vweird.f32 %v3469_v48  ;;  %vm1123_vm4 = vmand %vm1121_vm14, %vm1122_vm15 }
 0x134   : > { %v807_v32 = vpack.c.bf16 %v777_v62, %v776_v63  ;;  %vm740_vm10 = vmor %vm738_vm8, %vm739_vm9  ;;  %vm950_vm3 = vcmp.lt.s32.totalorder %v4098_v6, 1  ;;  %vm1598_vm7 = vcmp.ge.s32.totalorder %v4098_v6, 3  ;;  %vm1599_vm8 = vcmp.lt.s32.totalorder %v4098_v6, 4 }
 0x135   : > { %v867_v26 = vpack.c.bf16 %v805_v20, %v805_v20  ;;  %v721_v34 = vsel %vm720_vm6, %v3467_v51, %v717_v52  ;;  %v779_v40 = vadd.f32 %v4056_v45, %v768_v15  ;;  %vm1380_vm5 = vmand %vm1378_vm1, %vm1379_vm2  ;;  %vm1819_vm14 = vcmp.lt.s32.totalorder %v4098_v6, 5 }
 0x136   : > { %v756_v35 = vmul.f32 %v721_v34, %v3982_v10  ;;  %v733_v10 = vmul.f32 %v3469_v48, %v670_v47  ;;  %vm4110_vm6 = vmpackc.low %vm950_vm3, %vm950_vm3  ;;  %vm2258_vm1 = vcmp.ge.s32.totalorder %v4098_v6, 6  ;;  %vm2259_vm2 = vcmp.lt.s32.totalorder %v4098_v6, 7 }
 0x137   : > { %3291 = vmatmul.msk.bf16.vlgmr.msra.gmra.mxu1 %vm5580_vm0, %v867_v26  ;;  %3300 = vmatmul.msk.bf16.vlgmr.msra.gmra.mxu2 %vm5580_vm0, %v867_v26  ;;  %vm4117_vm9 = vmpackc.low %vm1123_vm4, %vm1123_vm4  ;;  %v5620_v26 = vmov 0 }
 0x138   : > { %v767_v38 = vmul.f32 %v4048_v30, %v756_v35  ;;  %v734_v49 = vmul.f32 %v3469_v48, %v733_v10  ;;  %vm4129_vm15 = vmand %vm1598_vm7, %vm1599_vm8 }
 0x13a   : > { %v778_v39 = vadd.f32 %v4056_v45, %v767_v38  ;;  %v735_v51 = vmul.f32 0.5, %v734_v49 }
 0x13c   : > { %v808_v41 = vpack.c.bf16 %v779_v40, %v778_v39  ;;  %v736_v53 = vsub.f32 1.5, %v735_v51 }
 0x13e   : > { %3280 = vmatmul.msk.bf16.gmra.mxu0 %vm5580_vm0, %v807_v32  ;;  %v737_v56 = vmul.f32 %v3469_v48, %v736_v53 }
 0x140   : > { %v741_v61 = vsel %vm740_vm10, %v3469_v48, %v737_v56  ;;  %vm2038_vm10 = vcmp.ge.s32.totalorder %v4098_v6, 5 }
 0x141   : > { %v758_v4 = vmul.f32 %v741_v61, %v3993_v21 }
 0x143   : > { %v769_v1 = vmul.f32 %v4048_v30, %v758_v4 }
 0x145   : > { %v780_v21 = vadd.f32 %v4056_v45, %v769_v1 }
 0x14e   : > { %3281 = vmatmul.msk.bf16.gmra.mxu0 %vm5580_vm0, %v808_v41 }
 0x18a   : > { %v655_v9 = vpop.xlane.xlu2 %654 }
 0x18b   : > { %v663_v50 = vmul.f32 %v655_v9, %v3933_v42 }
 0x18d   : > { %v671_v60 = vadd.f32 1e-05, %v663_v50 }
 0x18f   : > { %3470 = vrsqrt.f32 %v671_v60  ;;  %vm748_vm12 = vweird.f32 %v671_v60 }
 0x195   : > { %v3471_v54 = vpop.eup %3470 }
 0x196   : > { %v743_v57 = vmul.f32 %v3471_v54, %v671_v60  ;;  %vm749_vm11 = vweird.f32 %v3471_v54 }
 0x197   : > { %vm750_vm13 = vmor %vm748_vm12, %vm749_vm11  ;;  %vm2039_vm11 = vcmp.lt.s32.totalorder %v4098_v6, 6 }
 0x198   : > { %v744_v58 = vmul.f32 %v3471_v54, %v743_v57  ;;  %vm4123_vm12 = vmpackc.low %vm1380_vm5, %vm1380_vm5 }
 0x199   : > { %vm2040_vm3 = vmand %vm2038_vm10, %vm2039_vm11  ;;  %vm983_vm10 = vcmask 64512  }
 0x19a   : > { %v745_v2 = vmul.f32 0.5, %v744_v58  ;;  %vm2260_vm5 = vmand %vm2258_vm1, %vm2259_vm2  ;;  %vm2479_vm1 = vcmp.lt.s32.totalorder %v4098_v6, 8 }
 0x19b   : > { %vm4145_vm7 = vmpackc.low %vm2260_vm5, %vm2260_vm5 }
 0x19c   : > { %v746_v3 = vsub.f32 1.5, %v745_v2  ;;  %v5621_v26 = vsel %vm4145_vm7, 4294967295, %v5620_v26  ;;  %vm4164_vm11 = vmpackc.low %vm4129_vm15, %vm4129_vm15 }
 0x19d   : > { %5622 = vst [vmem:[#allocation11_spill] sm:$0xff] %v5621_v26 }
 0x19e   : > { %v747_v5 = vmul.f32 %v3471_v54, %v746_v3 }
 0x1a0   : > { %v751_v7 = vsel %vm750_vm13, %v3471_v54, %v747_v5  ;;  %vm1818_vm13 = vcmp.ge.s32.totalorder %v4098_v6, 4 }
 0x1a1   : > { %v759_v0 = vmul.f32 %v751_v7, %v4019_v46  ;;  %vm1820_vm4 = vmand %vm1818_vm13, %vm1819_vm14  ;;  %vm1301_vm13 = vcmask 1043456   ;;  %vm2478_vm14 = vcmp.ge.s32.totalorder %v4098_v6, 7 }
 0x1a2   : > { %vm2480_vm15 = vmand %vm2478_vm14, %vm2479_vm1 }
 0x1a3   : > { %v770_v8 = vmul.f32 %v4048_v30, %v759_v0  ;;  %vm4251_vm2 = vmpackc.low %vm2480_vm15, %vm2480_vm15 }
 0x1a5   : > { %v781_v13 = vadd.f32 %v4056_v45, %v770_v8  ;;  %v5612_v45 = vmov 0 }
 0x1a6   : > { %v5613_v45 = vsel %vm4123_vm12, 4294967295, %v5612_v45  ;;  %vm4141_vm12 = vmpackc.low %vm1820_vm4, %vm1820_vm4 }
 0x1a7   : > { %v809_v46 = vpack.c.bf16 %v781_v13, %v780_v21  ;;  %vm5623_vm8 = vnez %v5613_v45 }
 0x1a9   : > { %3282 = vmatmul.msk.bf16.gmra.mxu0 %vm5580_vm0, %v809_v46  ;;  %vm4137_vm0 = vmpackc.low %vm2040_vm3, %vm2040_vm3 }
 0x1ab   : > { %v847_v17 = vpop.f32.mrf.mxu0 }
 0x1ac   : > { %v929_v19 = vmul.f32 0.17677669, %v847_v17 }
 0x1ae   : > { %v4135_v20 = vpack.c.bf16 %v929_v19, %v929_v19 }
 0x1b0   : > { %v2044_v29 = vsel %vm4137_vm0, %v4135_v20, 0  ;;  %v955_v62 = vsel %vm4110_vm6, %v4135_v20, 0  ;;  %v1127_v52 = vsel %vm4117_vm9, %v4135_v20, 0  ;;  %v1384_v63 = vsel %vm5623_vm8, %v4135_v20, 0 }
 0x1b1   : > { %v1824_v27 = vsel %vm4141_vm12, %v4135_v20, 0  ;;  %v2264_v35 = vsel %vm4145_vm7, %v4135_v20, 0  ;;  %v971_v15 = vunpack.c.l.b16 %v955_v62  ;;  %v1143_v39 = vunpack.c.l.b16 %v1127_v52 }
 0x1b2   : > { %v4178_v40 = vunpack.c.l.b16 %v1384_v63  ;;  %v4183_v43 = vunpack.c.l.b16 %v1824_v27  ;;  %v4185_v44 = vunpack.c.l.b16 %v2264_v35  ;;  %v1604_v47 = vsel %vm4164_vm11, %v4135_v20, 0 }
 0x1b3   : > { %v849_v59 = vpop.f32.mrf.mxu0  ;;  %v4215_v58 = vunpack.c.l.b16 %v1604_v47 }
 0x1b4   : > { %v930_v31 = vmul.f32 0.17677669, %v849_v59  ;;  %v896_v32 = vpop.f32.mrf.mxu1 }
 0x1b5   : > { %v945_v37 = vpack.c.bf16 %v896_v32, %v896_v32 }
 0x1b6   : > { %v4176_v38 = vpack.c.bf16 %v930_v31, %v930_v31 }
 0x1b7   : > { %v4181_v41 = vsel %vm983_vm10, %v945_v37, 0  ;;  %v4271_v37 = vunpack.c.l.b16 %v2044_v29 }
 0x1b8   : > { %1006 = vmatpush.bf16.xpose.msra.mxu3 %v4181_v41  ;;  %1174 = vmatpush.bf16.xpose.msrb.mxu1 %v4181_v41  ;;  %v956_v48 = vsel %vm4110_vm6, %v4176_v38, 0  ;;  %v1128_v10 = vsel %vm4117_vm9, %v4176_v38, 0  ;;  %v1385_v49 = vsel %vm5623_vm8, %v4176_v38, 0  ;;  %v1825_v9 = vsel %vm4141_vm12, %v4176_v38, 0 }
 0x1b9   : > { %v972_v50 = vunpack.c.l.b16 %v956_v48  ;;  %v1144_v60 = vunpack.c.l.b16 %v1128_v10  ;;  %v4205_v51 = vunpack.c.l.b16 %v1385_v49  ;;  %v4207_v53 = vunpack.c.l.b16 %v1825_v9 }
 0x1ba   : > { %v925_v54 = vpop.f32.mrf.mxu2  ;;  %v2265_v56 = vsel %vm4145_vm7, %v4176_v38, 0  ;;  %v1605_v57 = vsel %vm4164_vm11, %v4176_v38, 0  ;;  %v2045_v61 = vsel %vm4137_vm0, %v4176_v38, 0 }
 0x1bb   : > { %v4220_v2 = vpack.c.bf16 %v925_v54, %v925_v54  ;;  %v852_v36 = vpop.f32.mrf.mxu0  ;;  %v979_v3 = vpack.c.b16 %v972_v50, %v971_v15  ;;  %v1151_v4 = vpack.c.b16 %v1144_v60, %v1143_v39  ;;  %v4230_v8 = vunpack.c.l.b16 %v2265_v56 }
 0x1bc   : > { %v931_v7 = vmul.f32 0.17677669, %v852_v36  ;;  %v898_v0 = vpop.f32.mrf.mxu1  ;;  %v4232_v21 = vunpack.c.l.b16 %v1605_v57  ;;  %v2484_v15 = vsel %vm4251_vm2, %v4135_v20, 0  ;;  %v2485_v39 = vsel %vm4251_vm2, %v4176_v38, 0 }
 0x1bd   : > { %v1284_v13 = vsel %vm4117_vm9, %v4220_v2, 0  ;;  %v1116_v46 = vsel %vm4110_vm6, %v4220_v2, 0  ;;  %v1541_v6 = vsel %vm5623_vm8, %v4220_v2, 0  ;;  %v1761_v17 = vsel %vm4164_vm11, %v4220_v2, 0 }
 0x1be   : > { %v4246_v18 = vpack.c.bf16 %v931_v7, %v931_v7  ;;  %v1303_v19 = vsel %vm1301_vm13, %v1284_v13, 0  ;;  %v1347_v59 = vsel %vm1301_vm13, %v1116_v46, 0  ;;  %v1559_v62 = vsel %vm1301_vm13, %v1541_v6, 0 }
 0x1bf   : > { %3301 = vmatmul.msk.bf16.vlgmr.msra.gmra.mxu3 %vm983_vm10, %v979_v3  ;;  %3305 = vmatmul.msk.bf16.vlgmr.msrb.gmra.mxu1 %vm983_vm10, %v1151_v4  ;;  %v1779_v63 = vsel %vm1301_vm13, %v1761_v17, 0  ;;  %v1981_v31 = vsel %vm4141_vm12, %v4220_v2, 0  ;;  %v4289_v10 = vunpack.c.l.b16 %v2045_v61  ;;  %v4308_v3 = vunpack.c.l.b16 %v2484_v15 }
 0x1c0   : > { %1431 = vmatpush.bf16.xpose.msrb.mxu3 %v4181_v41  ;;  %1312 = vmatpush.bf16.msrb.mxu2 %v1303_v19  ;;  %v1999_v35 = vsel %vm1301_vm13, %v1981_v31, 0  ;;  %v957_v48 = vsel %vm4110_vm6, %v4246_v18, 0  ;;  %v1129_v29 = vsel %vm4117_vm9, %v4246_v18, 0  ;;  %v1386_v20 = vsel %vm5623_vm8, %v4246_v18, 0 }
 0x1c1   : > { %1356 = vmatpush.bf16.msrb.mxu0 %v1347_v59  ;;  %1568 = vmatpush.bf16.msra.mxu1 %v1559_v62  ;;  %v1826_v49 = vsel %vm4141_vm12, %v4246_v18, 0  ;;  %v2266_v9 = vsel %vm4145_vm7, %v4246_v18, 0  ;;  %v2046_v50 = vsel %vm4137_vm0, %v4246_v18, 0  ;;  %v1606_v56 = vsel %vm4164_vm11, %v4246_v18, 0 }
 0x1c2   : > { %v927_v47 = vpop.f32.mrf.mxu2  ;;  %v973_v61 = vunpack.c.l.b16 %v957_v48  ;;  %v1145_v36 = vunpack.c.l.b16 %v1129_v29  ;;  %v4310_v4 = vunpack.c.l.b16 %v2485_v39  ;;  %v4312_v0 = vunpack.c.l.b16 %v1386_v20 }
 0x1c3   : > { %v854_v38 = vpop.f32.mrf.mxu0  ;;  %v4314_v13 = vunpack.c.l.b16 %v1826_v49  ;;  %v4316_v46 = vunpack.c.l.b16 %v2266_v9  ;;  %v4318_v6 = vunpack.c.l.b16 %v1606_v56  ;;  %v4320_v17 = vunpack.c.l.b16 %v2046_v50 }
 0x1c4   : > { %1651 = vmatpush.bf16.xpose.msra.mxu2 %v4181_v41  ;;  %v932_v54 = vmul.f32 0.17677669, %v854_v38  ;;  %v2486_v59 = vsel %vm4251_vm2, %v4246_v18, 0 }
 0x1c5   : > { %1788 = vmatpush.bf16.msra.mxu0 %v1779_v63  ;;  %2008 = vmatpush.bf16.msrb.mxu1 %v1999_v35  ;;  %v4357_v19 = vunpack.c.l.b16 %v2486_v59 }
 0x1c6   : > { %v940_v7 = vpack.c.bf16 %v932_v54, %v932_v54 }
 0x1c8   : > { %1871 = vmatpush.bf16.xpose.msra.mxu3 %v4181_v41  ;;  %v958_v62 = vsel %vm4110_vm6, %v940_v7, 0  ;;  %v1130_v63 = vsel %vm4117_vm9, %v940_v7, 0  ;;  %v1387_v31 = vsel %vm5623_vm8, %v940_v7, 0  ;;  %v1827_v35 = vsel %vm4141_vm12, %v940_v7, 0 }
 0x1c9   : > { %v974_v15 = vunpack.c.l.b16 %v958_v62  ;;  %v1146_v39 = vunpack.c.l.b16 %v1130_v63  ;;  %v4335_v47 = vunpack.c.l.b16 %v1387_v31  ;;  %v4337_v48 = vunpack.c.l.b16 %v1827_v35 }
 0x1ca   : > { %v2267_v18 = vsel %vm4145_vm7, %v940_v7, 0  ;;  %v1607_v29 = vsel %vm4164_vm11, %v940_v7, 0  ;;  %v2047_v20 = vsel %vm4137_vm0, %v940_v7, 0  ;;  %v2487_v38 = vsel %vm4251_vm2, %v940_v7, 0 }
 0x1cb   : > { %v857_v49 = vpop.f32.mrf.mxu0  ;;  %v980_v9 = vpack.c.b16 %v974_v15, %v973_v61  ;;  %v1152_v50 = vpack.c.b16 %v1146_v39, %v1145_v36  ;;  %v4351_v63 = vunpack.c.l.b16 %v2267_v18  ;;  %v4353_v31 = vunpack.c.l.b16 %v1607_v29 }
 0x1cc   : > { %v933_v62 = vmul.f32 0.17677669, %v857_v49  ;;  %v4355_v35 = vunpack.c.l.b16 %v2047_v20  ;;  %v4359_v60 = vunpack.c.l.b16 %v2487_v38 }
 0x1ce   : > { %v941_v7 = vpack.c.bf16 %v933_v62, %v933_v62 }
 0x1cf   : > { %3302 = vmatmul.msk.bf16.gmra.mxu3 %vm983_vm10, %v980_v9  ;;  %3306 = vmatmul.msk.bf16.gmra.mxu1 %vm983_vm10, %v1152_v50 }
 0x1d0   : > { %v959_v39 = vsel %vm4110_vm6, %v941_v7, 0  ;;  %v2048_v18 = vsel %vm4137_vm0, %v941_v7, 0  ;;  %v1131_v20 = vsel %vm4117_vm9, %v941_v7, 0  ;;  %v1388_v38 = vsel %vm5623_vm8, %v941_v7, 0 }
 0x1d1   : > { %v1828_v49 = vsel %vm4141_vm12, %v941_v7, 0  ;;  %v2268_v50 = vsel %vm4145_vm7, %v941_v7, 0  ;;  %v1608_v62 = vsel %vm4164_vm11, %v941_v7, 0  ;;  %v2488_v59 = vsel %vm4251_vm2, %v941_v7, 0 }
 0x1d2   : > { %v975_v15 = vunpack.c.l.b16 %v959_v39  ;;  %v1147_v36 = vunpack.c.l.b16 %v1131_v20  ;;  %v4387_v27 = vunpack.c.l.b16 %v1388_v38  ;;  %v4389_v61 = vunpack.c.l.b16 %v1828_v49 }
 0x1d3   : > { %v859_v29 = vpop.f32.mrf.mxu0  ;;  %v4391_v32 = vunpack.c.l.b16 %v2268_v50  ;;  %v4393_v56 = vunpack.c.l.b16 %v1608_v62  ;;  %v4397_v1 = vunpack.c.l.b16 %v2488_v59 }
 0x1d4   : > { %v934_v9 = vmul.f32 0.17677669, %v859_v29  ;;  %v4395_v29 = vunpack.c.l.b16 %v2048_v18 }
 0x1d5   : > { %5628 = vst [vmem:[#allocation12_spill] sm:$0xff] %v4397_v1 }
 0x1d6   : > { %v942_v57 = vpack.c.bf16 %v934_v9, %v934_v9 }
 0x1d8   : > { %v960_v54 = vsel %vm4110_vm6, %v942_v57, 0  ;;  %v1132_v7 = vsel %vm4117_vm9, %v942_v57, 0  ;;  %v1389_v39 = vsel %vm5623_vm8, %v942_v57, 0  ;;  %v1829_v20 = vsel %vm4141_vm12, %v942_v57, 0 }
 0x1d9   : > { %v976_v38 = vunpack.c.l.b16 %v960_v54  ;;  %v1148_v49 = vunpack.c.l.b16 %v1132_v7  ;;  %v4407_v9 = vunpack.c.l.b16 %v1389_v39  ;;  %v4409_v18 = vunpack.c.l.b16 %v1829_v20 }
 0x1da   : > { %v2269_v59 = vsel %vm4145_vm7, %v942_v57, 0  ;;  %v1609_v50 = vsel %vm4164_vm11, %v942_v57, 0  ;;  %v2049_v62 = vsel %vm4137_vm0, %v942_v57, 0  ;;  %v2489_v5 = vsel %vm4251_vm2, %v942_v57, 0 }
 0x1db   : > { %v981_v55 = vpack.c.b16 %v976_v38, %v975_v15  ;;  %v1153_v42 = vpack.c.b16 %v1148_v49, %v1147_v36  ;;  %v4423_v39 = vunpack.c.l.b16 %v2269_v59  ;;  %v4425_v20 = vunpack.c.l.b16 %v1609_v50 }
 0x1dc   : > { %v4427_v33 = vunpack.c.l.b16 %v2049_v62  ;;  %v4429_v28 = vunpack.c.l.b16 %v2489_v5 }
 0x1de   : > { %5629 = vst [vmem:[#allocation13_spill] sm:$0xff] %v4429_v28 }
 0x1df   : > { %3303 = vmatmul.msk.bf16.gmra.mxu3 %vm983_vm10, %v981_v55  ;;  %3307 = vmatmul.msk.bf16.gmra.mxu1 %vm983_vm10, %v1153_v42 }
 0x226   : > { %v862_v38 = vpop.f32.mrf.mxu0 }
 0x227   : > { %v935_v49 = vmul.f32 0.17677669, %v862_v38 }
 0x229   : > { %v943_v5 = vpack.c.bf16 %v935_v49, %v935_v49 }
 0x22b   : > { %v961_v59 = vsel %vm4110_vm6, %v943_v5, 0  ;;  %v2050_v50 = vsel %vm4137_vm0, %v943_v5, 0  ;;  %v1133_v36 = vsel %vm4117_vm9, %v943_v5, 0  ;;  %v1390_v15 = vsel %vm5623_vm8, %v943_v5, 0 }
 0x22c   : > { %v1830_v55 = vsel %vm4141_vm12, %v943_v5, 0  ;;  %v2270_v38 = vsel %vm4145_vm7, %v943_v5, 0  ;;  %v1610_v49 = vsel %vm4164_vm11, %v943_v5, 0  ;;  %v2490_v57 = vsel %vm4251_vm2, %v943_v5, 0 }
 0x22d   : > { %v977_v23 = vunpack.c.l.b16 %v961_v59  ;;  %v1149_v54 = vunpack.c.l.b16 %v1133_v36  ;;  %v1406_v16 = vunpack.c.l.b16 %v1390_v15  ;;  %v4457_v12 = vunpack.c.l.b16 %v1830_v55 }
 0x22e   : > { %v864_v62 = vpop.f32.mrf.mxu0  ;;  %v4459_v22 = vunpack.c.l.b16 %v2270_v38  ;;  %v4461_v11 = vunpack.c.l.b16 %v1610_v49  ;;  %v4465_v1 = vunpack.c.l.b16 %v2490_v57 }
 0x22f   : > { %v936_v42 = vmul.f32 0.17677669, %v864_v62  ;;  %v4463_v62 = vunpack.c.l.b16 %v2050_v50 }
 0x231   : > { %v944_v7 = vpack.c.bf16 %v936_v42, %v936_v42 }
 0x233   : > { %v962_v28 = vsel %vm4110_vm6, %v944_v7, 0  ;;  %v1134_v5 = vsel %vm4117_vm9, %v944_v7, 0  ;;  %v1391_v36 = vsel %vm5623_vm8, %v944_v7, 0  ;;  %v1831_v15 = vsel %vm4141_vm12, %v944_v7, 0 }
 0x234   : > { %v978_v59 = vunpack.c.l.b16 %v962_v28  ;;  %v1150_v55 = vunpack.c.l.b16 %v1134_v5  ;;  %v1407_v42 = vunpack.c.l.b16 %v1391_v36  ;;  %v1847_v38 = vunpack.c.l.b16 %v1831_v15 }
 0x235   : > { %v2271_v57 = vsel %vm4145_vm7, %v944_v7, 0  ;;  %v1611_v14 = vsel %vm4164_vm11, %v944_v7, 0  ;;  %v2051_v30 = vsel %vm4137_vm0, %v944_v7, 0  ;;  %v2491_v45 = vsel %vm4251_vm2, %v944_v7, 0 }
 0x236   : > { %v982_v50 = vpack.c.b16 %v978_v59, %v977_v23  ;;  %v1154_v49 = vpack.c.b16 %v1150_v55, %v1149_v54  ;;  %v1411_v25 = vpack.c.b16 %v1407_v42, %v1406_v16  ;;  %v1851_v28 = vpack.c.b16 %v1847_v38, %v4457_v12 }
 0x237   : > { %v4484_v5 = vunpack.c.l.b16 %v2271_v57  ;;  %v4486_v36 = vunpack.c.l.b16 %v1611_v14  ;;  %v4488_v15 = vunpack.c.l.b16 %v2051_v30  ;;  %v4490_v26 = vunpack.c.l.b16 %v2491_v45 }
 0x238   : > { %3304 = vmatmul.msk.bf16.gmra.mxu3 %vm983_vm10, %v982_v50  ;;  %3308 = vmatmul.msk.bf16.gmra.mxu1 %vm983_vm10, %v1154_v49  ;;  %v5630_v42 = vpack.c.b16 %v4205_v51, %v4178_v40  ;;  %v5631_v45 = vpack.c.b16 %v4335_v47, %v4312_v0  ;;  %v5633_v0 = vpack.c.b16 %v4207_v53, %v4183_v43 }
 0x239   : > { %v2291_v34 = vpack.c.b16 %v4484_v5, %v4459_v22  ;;  %v1631_v16 = vpack.c.b16 %v4486_v36, %v4461_v11  ;;  %v2071_v12 = vpack.c.b16 %v4488_v15, %v4463_v62  ;;  %v5634_v47 = vpack.c.b16 %v4337_v48, %v4314_v13 }
 0x23a   : > { %v5644_v11 = vpack.c.b16 %v4355_v35, %v4320_v17 }
 0x23c   : > { %v1176_v54 = vpop.f32.mrf.mxu1 }
 0x23d   : > { %v1196_v7 = vsel %vm983_vm10, %v1176_v54, -inf }
 0x23e   : > { %1197 = vmax.xlane.f32.xlu0 %v1196_v7  ;;  %v5632_v7 = vpack.c.b16 %v4407_v9, %v4387_v27 }
 0x244   : > { %v1178_v59 = vpop.f32.mrf.mxu1 }
 0x245   : > { %v1199_v55 = vsel %vm983_vm10, %v1178_v59, -inf }
 0x246   : > { %1200 = vmax.xlane.f32.xlu1 %v1199_v55  ;;  %v5635_v55 = vpack.c.b16 %v4409_v18, %v4389_v61 }
 0x248   : > { %3317 = vmatmul.msk.bf16.vlgmr.msrb.gmra.mxu3 %vm983_vm10, %v5630_v42  ;;  %v4534_v42 = vpop.f32.mrf.mxu3 }
 0x249   : > { %2311 = vmatpush.bf16.xpose.msrb.mxu3 %v4181_v41 }
 0x24c   : > { %v1181_v38 = vpop.f32.mrf.mxu1 }
 0x24d   : > { %v1202_v57 = vsel %vm983_vm10, %v1181_v38, -inf }
 0x24e   : > { %1203 = vmax.xlane.f32.xlu2 %v1202_v57 }
 0x254   : > { %v1183_v14 = vpop.f32.mrf.mxu1 }
 0x255   : > { %v1205_v30 = vsel %vm983_vm10, %v1183_v14, -inf }
 0x256   : > { %1206 = vmax.xlane.f32.xlu0 %v1205_v30  ;;  %v4547_v30 = vpop.f32.mrf.mxu3 }
 0x258   : > { %3318 = vmatmul.msk.bf16.gmra.mxu3 %vm983_vm10, %v5631_v45 }
 0x25c   : > { %v1186_v50 = vpop.f32.mrf.mxu1 }
 0x25d   : > { %v1208_v40 = vsel %vm983_vm10, %v1186_v50, -inf }
 0x25e   : > { %1209 = vmax.xlane.f32.xlu1 %v1208_v40 }
 0x264   : > { %v1188_v51 = vpop.f32.mrf.mxu1 }
 0x265   : > { %v1211_v49 = vsel %vm983_vm10, %v1188_v51, -inf }
 0x266   : > { %1212 = vmax.xlane.f32.xlu2 %v1211_v49 }
 0x268   : > { %3319 = vmatmul.msk.bf16.gmra.mxu3 %vm983_vm10, %v5632_v7 }
 0x278   : > { %3320 = vmatmul.msk.bf16.gmra.mxu3 %vm983_vm10, %v1411_v25 }
 0x288   : > { %3333 = vmatmul.msk.bf16.vlgmr.msra.gmra.mxu3 %vm983_vm10, %v5633_v0  ;;  %v4555_v0 = vpop.f32.mrf.mxu3 }
 0x298   : > { %3334 = vmatmul.msk.bf16.gmra.mxu3 %vm983_vm10, %v5634_v47  ;;  %v5636_v47 = vpack.c.b16 %v4230_v8, %v4185_v44  ;;  %v5637_v8 = vpack.c.b16 %v4351_v63, %v4316_v46  ;;  %v5638_v63 = vpack.c.b16 %v4423_v39, %v4391_v32 }
 0x2a8   : > { %3335 = vmatmul.msk.bf16.gmra.mxu3 %vm983_vm10, %v5635_v55 }
 0x2b1   : > { %v1198_v27 = vpop.xlane.xlu0 %1197 }
 0x2b2   : > { %v1220_v9 = vsub.f32 %v1176_v54, %v1198_v27 }
 0x2b4   : > { %v1228_v25 = vmul.f32 1.442695, %v1220_v9 }
 0x2b5   : > { %v4536_v57 = vpop.f32.mrf.mxu1 }
 0x2b6   : > { %3472 = vpow2.f32 %v1228_v25  ;;  %v1214_v43 = vsel %vm983_vm10, %v4536_v57, -inf }
 0x2b7   : > { %1215 = vmax.xlane.f32.xlu0 %v1214_v43 }
 0x2b8   : > { %3336 = vmatmul.msk.bf16.gmra.mxu3 %vm983_vm10, %v1851_v28 }
 0x2b9   : > { %v1201_v53 = vpop.xlane.xlu1 %1200 }
 0x2ba   : > { %v1221_v13 = vsub.f32 %v1178_v59, %v1201_v53  ;;  %v4565_v53 = vpop.f32.mrf.mxu3 }
 0x2bc   : > { %v4541_v48 = vpop.eup %3472  ;;  %v1230_v61 = vmul.f32 1.442695, %v1221_v13 }
 0x2bd   : > { %v4543_v18 = vpop.f32.mrf.mxu1  ;;  %v1244_v54 = vsel %vm983_vm10, %v4541_v48, 0.0 }
 0x2be   : > { %3474 = vpow2.f32 %v1230_v61  ;;  %1245 = vadd.xlane.f32.xlu2 %v1244_v54  ;;  %v1217_v45 = vsel %vm983_vm10, %v4543_v18, -inf }
 0x2bf   : > { %1218 = vmax.xlane.f32.xlu1 %v1217_v45 }
 0x2c1   : > { %v1204_v40 = vpop.xlane.xlu2 %1203 }
 0x2c2   : > { %v1222_v28 = vsub.f32 %v1181_v38, %v1204_v40 }
 0x2c4   : > { %v4551_v49 = vpop.eup %3474  ;;  %v1232_v59 = vmul.f32 1.442695, %v1222_v28  ;;  %v4577_v28 = vpop.f32.mrf.mxu3 }
 0x2c5   : > { %v1247_v7 = vsel %vm983_vm10, %v4551_v49, 0.0 }
 0x2c6   : > { %3476 = vpow2.f32 %v1232_v59  ;;  %1248 = vadd.xlane.f32.xlu0 %v1247_v7 }
 0x2c8   : > { %3349 = vmatmul.msk.bf16.vlgmr.msrb.gmra.mxu3 %vm983_vm10, %v5636_v47 }
 0x2c9   : > { %v1207_v55 = vpop.xlane.xlu0 %1206 }
 0x2ca   : > { %v1223_v27 = vsub.f32 %v1183_v14, %v1207_v55 }
 0x2cc   : > { %v4561_v9 = vpop.eup %3476  ;;  %v1234_v38 = vmul.f32 1.442695, %v1223_v27  ;;  %v4585_v46 = vpop.f32.mrf.mxu3  ;;  %v1037_v27 = vsel %vm983_vm10, %v4565_v53, -inf }
 0x2cd   : > { %v1250_v25 = vsel %vm983_vm10, %v4561_v9, 0.0 }
 0x2ce   : > { %3478 = vpow2.f32 %v1234_v38  ;;  %1251 = vadd.xlane.f32.xlu1 %v1250_v25 }
 0x2d1   : > { %v1210_v43 = vpop.xlane.xlu1 %1209 }
 0x2d2   : > { %v1224_v13 = vsub.f32 %v1186_v50, %v1210_v43 }
 0x2d4   : > { %v4567_v61 = vpop.eup %3478  ;;  %v1236_v54 = vmul.f32 1.442695, %v1224_v13  ;;  %v4593_v55 = vpop.f32.mrf.mxu3 }
 0x2d5   : > { %v1253_v44 = vsel %vm983_vm10, %v4567_v61, 0.0  ;;  %v1046_v32 = vsel %vm983_vm10, %v4593_v55, -inf }
 0x2d6   : > { %3480 = vpow2.f32 %v1236_v54  ;;  %1254 = vadd.xlane.f32.xlu2 %v1253_v44 }
 0x2d8   : > { %3350 = vmatmul.msk.bf16.gmra.mxu3 %vm983_vm10, %v5637_v8 }
 0x2d9   : > { %v1213_v14 = vpop.xlane.xlu2 %1212 }
 0x2da   : > { %v1225_v45 = vsub.f32 %v1188_v51, %v1213_v14  ;;  %v1028_v51 = vsel %vm983_vm10, %v4534_v42, -inf }
 0x2dc   : > { %v4575_v40 = vpop.eup %3480  ;;  %v1238_v50 = vmul.f32 1.442695, %v1225_v45  ;;  %v4597_v38 = vpop.f32.mrf.mxu3 }
 0x2dd   : > { %v1256_v59 = vsel %vm983_vm10, %v4575_v40, 0.0 }
 0x2de   : > { %3482 = vpow2.f32 %v1238_v50  ;;  %1257 = vadd.xlane.f32.xlu0 %v1256_v59 }
 0x2e4   : > { %v4581_v7 = vpop.eup %3482  ;;  %v4605_v39 = vpop.f32.mrf.mxu3 }
 0x2e5   : > { %v1259_v47 = vsel %vm983_vm10, %v4581_v7, 0.0 }
 0x2e6   : > { %1260 = vadd.xlane.f32.xlu1 %v1259_v47 }
 0x2e8   : > { %3351 = vmatmul.msk.bf16.gmra.mxu3 %vm983_vm10, %v5638_v63  ;;  %v1031_v63 = vsel %vm983_vm10, %v4547_v30, -inf }
 0x2ec   : > { %v4607_v25 = vpop.f32.mrf.mxu3 }
 0x2ee   : > { %1029 = vmax.xlane.f32.xlu1 %v1028_v51 }
 0x2f4   : > { %v4610_v54 = vpop.f32.mrf.mxu3 }
 0x2f6   : > { %1038 = vmax.xlane.f32.xlu1 %v1037_v27 }
 0x2f8   : > { %3352 = vmatmul.msk.bf16.gmra.mxu3 %vm983_vm10, %v2291_v34 }
 0x2fc   : > { %v4617_v50 = vpop.f32.mrf.mxu3 }
 0x2fe   : > { %1047 = vmax.xlane.f32.xlu1 %v1046_v32 }
 0x304   : > { %v4625_v27 = vpop.f32.mrf.mxu3 }
 0x32a   : > { %v1216_v43 = vpop.xlane.xlu0 %1215 }
 0x32b   : > { %v1226_v13 = vsub.f32 %v4536_v57, %v1216_v43 }
 0x32d   : > { %v1240_v44 = vmul.f32 1.442695, %v1226_v13 }
 0x32f   : > { %3484 = vpow2.f32 %v1240_v44 }
 0x331   : > { %v1246_v34 = vpop.xlane.xlu2 %1245 }
 0x332   : > { %v1219_v8 = vpop.xlane.xlu1 %1218 }
 0x333   : > { %v1227_v22 = vsub.f32 %v4543_v18, %v1219_v8  ;;  %v1034_v8 = vsel %vm983_vm10, %v4555_v0, -inf }
 0x335   : > { %v4613_v5 = vpop.eup %3484  ;;  %v1242_v14 = vmul.f32 1.442695, %v1227_v22  ;;  %v1040_v22 = vsel %vm983_vm10, %v4577_v28, -inf }
 0x336   : > { %v1262_v45 = vsel %vm983_vm10, %v4613_v5, 0.0 }
 0x337   : > { %3486 = vpow2.f32 %v1242_v14  ;;  %1263 = vadd.xlane.f32.xlu2 %v1262_v45  ;;  %v1043_v14 = vsel %vm983_vm10, %v4585_v46, -inf  ;;  %v1049_v45 = vsel %vm983_vm10, %v4597_v38, -inf }
 0x338   : > { %3488 = vrcp.f32 %v1246_v34 }
 0x339   : > { %v1249_v57 = vpop.xlane.xlu0 %1248 }
 0x33a   : > { %3490 = vrcp.f32 %v1249_v57 }
 0x33d   : > { %v4619_v59 = vpop.eup %3486 }
 0x33e   : > { %v3489_v47 = vpop.eup %3488  ;;  %v1265_v18 = vsel %vm983_vm10, %v4619_v59, 0.0 }
 0x33f   : > { %1266 = vadd.xlane.f32.xlu0 %v1265_v18  ;;  %1032 = vmax.xlane.f32.xlu2 %v1031_v63  ;;  %v1276_v32 = vmul.f32 %v3489_v47, %v4541_v48  ;;  %v4635_v48 = vpop.f32.mrf.mxu3 }
 0x340   : > { %v3491_v51 = vpop.eup %3490 }
 0x341   : > { %v1277_v43 = vmul.f32 %v3491_v51, %v4551_v49  ;;  %v1252_v44 = vpop.xlane.xlu1 %1251 }
 0x342   : > { %3492 = vrcp.f32 %v1252_v44 }
 0x343   : > { %v1285_v13 = vpack.c.bf16 %v1277_v43, %v1276_v32  ;;  %v1453_v43 = vsel %vm983_vm10, %v4605_v39, -inf }
 0x345   : > { %3309 = vmatmul.msk.bf16.vlgmr.msrb.gmra.mxu2 %vm983_vm10, %v1285_v13 }
 0x346   : > { %2091 = vmatpush.bf16.xpose.msrb.mxu2 %v4181_v41 }
 0x347   : > { %1035 = vmax.xlane.f32.xlu0 %v1034_v8  ;;  %1041 = vmax.xlane.f32.xlu2 %v1040_v22  ;;  %v4643_v51 = vpop.f32.mrf.mxu3  ;;  %v1459_v8 = vsel %vm983_vm10, %v4610_v54, -inf }
 0x348   : > { %v3493_v49 = vpop.eup %3492 }
 0x349   : > { %v1255_v34 = vpop.xlane.xlu2 %1254  ;;  %v1278_v47 = vmul.f32 %v3493_v49, %v4561_v9 }
 0x34a   : > { %3494 = vrcp.f32 %v1255_v34 }
 0x34f   : > { %1044 = vmax.xlane.f32.xlu0 %v1043_v14  ;;  %1050 = vmax.xlane.f32.xlu2 %v1049_v45  ;;  %v4650_v9 = vpop.f32.mrf.mxu3 }
 0x350   : > { %v3495_v57 = vpop.eup %3494 }
 0x351   : > { %v1279_v18 = vmul.f32 %v3495_v57, %v4567_v61  ;;  %v1258_v32 = vpop.xlane.xlu0 %1257 }
 0x352   : > { %3496 = vrcp.f32 %v1258_v32  ;;  %v1456_v32 = vsel %vm983_vm10, %v4607_v25, -inf }
 0x353   : > { %v1286_v63 = vpack.c.bf16 %v1279_v18, %v1278_v47  ;;  %v1465_v47 = vsel %vm983_vm10, %v4625_v27, -inf }
 0x355   : > { %3310 = vmatmul.msk.bf16.gmra.mxu2 %vm983_vm10, %v1286_v63 }
 0x357   : > { %1454 = vmax.xlane.f32.xlu2 %v1453_v43  ;;  %v4658_v18 = vpop.f32.mrf.mxu3 }
 0x358   : > { %v3497_v44 = vpop.eup %3496 }
 0x359   : > { %v1261_v13 = vpop.xlane.xlu1 %1260  ;;  %v1280_v34 = vmul.f32 %v3497_v44, %v4575_v40 }
 0x35a   : > { %3498 = vrcp.f32 %v1261_v13 }
 0x35f   : > { %1460 = vmax.xlane.f32.xlu2 %v1459_v8 }
 0x360   : > { %v3499_v61 = vpop.eup %3498 }
 0x361   : > { %v1030_v22 = vpop.xlane.xlu1 %1029  ;;  %v1281_v49 = vmul.f32 %v3499_v61, %v4581_v7  ;;  %v4666_v7 = vpop.f32.mrf.mxu3 }
 0x362   : > { %v1052_v14 = vsub.f32 %v4534_v42, %v1030_v22  ;;  %v1471_v42 = vsel %vm983_vm10, %v4643_v51, -inf  ;;  %v1896_v43 = vsel %vm983_vm10, %v4666_v7, -inf }
 0x363   : > { %v1287_v45 = vpack.c.bf16 %v1281_v49, %v1280_v34 }
 0x364   : > { %v1060_v57 = vmul.f32 1.442695, %v1052_v14 }
 0x365   : > { %3311 = vmatmul.msk.bf16.gmra.mxu2 %vm983_vm10, %v1287_v45 }
 0x366   : > { %3500 = vpow2.f32 %v1060_v57 }
 0x367   : > { %1466 = vmax.xlane.f32.xlu2 %v1465_v47 }
 0x369   : > { %v1039_v44 = vpop.xlane.xlu1 %1038 }
 0x36a   : > { %v1055_v34 = vsub.f32 %v4565_v53, %v1039_v44 }
 0x36c   : > { %v4660_v63 = vpop.eup %3500  ;;  %v1066_v57 = vmul.f32 1.442695, %v1055_v34 }
 0x36d   : > { %v1076_v40 = vsel %vm983_vm10, %v4660_v63, 0.0 }
 0x36e   : > { %1077 = vadd.xlane.f32.xlu0 %v1076_v40 }
 0x36f   : > { %1472 = vmax.xlane.f32.xlu2 %v1471_v42 }
 0x376   : > { %1457 = vmax.xlane.f32.xlu0 %v1456_v32 }
 0x377   : > { %1897 = vmax.xlane.f32.xlu2 %v1896_v43 }
 0x3aa   : > { %v1264_v13 = vpop.xlane.xlu2 %1263 }
 0x3ab   : > { %3502 = vrcp.f32 %v1264_v13 }
 0x3b1   : > { %v3503_v14 = vpop.eup %3502 }
 0x3b2   : > { %v1033_v8 = vpop.xlane.xlu2 %1032  ;;  %v1267_v61 = vpop.xlane.xlu0 %1266  ;;  %v1282_v42 = vmul.f32 %v3503_v14, %v4613_v5 }
 0x3b3   : > { %v1053_v22 = vsub.f32 %v4547_v30, %v1033_v8  ;;  %3504 = vrcp.f32 %v1267_v61 }
 0x3b5   : > { %v1062_v49 = vmul.f32 1.442695, %v1053_v22 }
 0x3b7   : > { %3506 = vpow2.f32 %v1062_v49 }
 0x3b8   : > { %3508 = vpow2.f32 %v1066_v57 }
 0x3b9   : > { %v3505_v45 = vpop.eup %3504 }
 0x3ba   : > { %v1042_v47 = vpop.xlane.xlu2 %1041  ;;  %v1036_v40 = vpop.xlane.xlu0 %1035  ;;  %v1283_v32 = vmul.f32 %v3505_v45, %v4619_v59 }
 0x3bb   : > { %v1054_v43 = vsub.f32 %v4555_v0, %v1036_v40  ;;  %v1056_v22 = vsub.f32 %v4577_v28, %v1042_v47  ;;  %v1462_v28 = vsel %vm983_vm10, %v4617_v50, -inf  ;;  %v4703_v40 = vpop.f32.mrf.mxu3 }
 0x3bc   : > { %v1288_v13 = vpack.c.bf16 %v1283_v32, %v1282_v42  ;;  %v1048_v42 = vpop.xlane.xlu1 %1047 }
 0x3bd   : > { %v4677_v23 = vpop.eup %3506  ;;  %v1064_v30 = vmul.f32 1.442695, %v1054_v43  ;;  %v1068_v14 = vmul.f32 1.442695, %v1056_v22 }
 0x3be   : > { %3312 = vmatmul.msk.bf16.gmra.mxu2 %vm983_vm10, %v1288_v13  ;;  %v1079_v53 = vsel %vm983_vm10, %v4677_v23, 0.0  ;;  %v4682_v61 = vpop.eup %3508 }
 0x3bf   : > { %1080 = vadd.xlane.f32.xlu1 %v1079_v53  ;;  %3510 = vpow2.f32 %v1064_v30  ;;  %v1085_v34 = vsel %vm983_vm10, %v4682_v61, 0.0  ;;  %v1893_v53 = vsel %vm983_vm10, %v4658_v18, -inf }
 0x3c2   : > { %v1051_v44 = vpop.xlane.xlu2 %1050  ;;  %v1045_v8 = vpop.xlane.xlu0 %1044 }
 0x3c3   : > { %v1057_v5 = vsub.f32 %v4585_v46, %v1045_v8  ;;  %v5639_v46 = vpack.c.b16 %v4232_v21, %v4215_v58  ;;  %v1058_v58 = vsub.f32 %v4593_v55, %v1048_v42  ;;  %v5640_v55 = vpack.c.b16 %v4353_v31, %v4318_v6 }
 0x3c5   : > { %v1070_v59 = vmul.f32 1.442695, %v1057_v5  ;;  %v4685_v0 = vpop.eup %3510  ;;  %v1072_v8 = vmul.f32 1.442695, %v1058_v58 }
 0x3c6   : > { %v1082_v49 = vsel %vm983_vm10, %v4685_v0, 0.0 }
 0x3c7   : > { %1086 = vadd.xlane.f32.xlu1 %v1085_v34  ;;  %3512 = vpow2.f32 %v1070_v59  ;;  %1083 = vadd.xlane.f32.xlu0 %v1082_v49  ;;  %v4714_v59 = vpop.f32.mrf.mxu3 }
 0x3c8   : > { %3514 = vpow2.f32 %v1068_v14  ;;  %v1902_v22 = vsel %vm983_vm10, %v4714_v59, -inf }
 0x3ca   : > { %v1455_v45 = vpop.xlane.xlu2 %1454 }
 0x3cb   : > { %v1477_v42 = vsub.f32 %v4605_v39, %v1455_v45  ;;  %v1899_v39 = vsel %vm983_vm10, %v4703_v40, -inf  ;;  %v5642_v45 = vpack.c.b16 %v4289_v10, %v4271_v37 }
 0x3cd   : > { %v4692_v57 = vpop.eup %3512  ;;  %v1485_v58 = vmul.f32 1.442695, %v1477_v42 }
 0x3ce   : > { %3325 = vmatmul.msk.bf16.vlgmr.msra.gmra.mxu2 %vm983_vm10, %v5639_v46  ;;  %v1091_v47 = vsel %vm983_vm10, %v4692_v57, 0.0  ;;  %v4706_v13 = vpop.eup %3514 }
 0x3cf   : > { %2531 = vmatpush.bf16.xpose.msra.mxu2 %v4181_v41  ;;  %1463 = vmax.xlane.f32.xlu0 %v1462_v28  ;;  %v1059_v41 = vsub.f32 %v4597_v38, %v1051_v44  ;;  %v1088_v30 = vsel %vm983_vm10, %v4706_v13, 0.0  ;;  %v1468_v44 = vsel %vm983_vm10, %v4635_v48, -inf  ;;  %v4802_v42 = vpop.f32.mrf.mxu3 }
 0x3d0   : > { %1092 = vadd.xlane.f32.xlu1 %v1091_v47 }
 0x3d1   : > { %v1074_v5 = vmul.f32 1.442695, %v1059_v41 }
 0x3d2   : > { %v1461_v32 = vpop.xlane.xlu2 %1460 }
 0x3d3   : > { %v1479_v43 = vsub.f32 %v4610_v54, %v1461_v32  ;;  %v5641_v32 = vpack.c.b16 %v4425_v20, %v4393_v56  ;;  %v4758_v20 = vpop.f32.mrf.mxu2 }
 0x3d5   : > { %v1489_v21 = vmul.f32 1.442695, %v1479_v43  ;;  %v1474_v43 = vsel %vm983_vm10, %v4650_v9, -inf }
 0x3d7   : > { %3516 = vpow2.f32 %v1489_v21  ;;  %1089 = vadd.xlane.f32.xlu0 %v1088_v30 }
 0x3d8   : > { %1894 = vmax.xlane.f32.xlu1 %v1893_v53  ;;  %3518 = vpow2.f32 %v1072_v8 }
 0x3d9   : > { %3520 = vpow2.f32 %v1074_v5 }
 0x3db   : > { %v4764_v30 = vpop.f32.mrf.mxu2 }
 0x3dc   : > { %5643 = vst [vmem:[#allocation14_spill] sm:$0xff] %v4764_v30 }
 0x3dd   : > { %v4716_v54 = vpop.eup %3516 }
 0x3de   : > { %3326 = vmatmul.msk.bf16.gmra.mxu2 %vm983_vm10, %v5640_v55  ;;  %v1507_v38 = vsel %vm983_vm10, %v4716_v54, 0.0  ;;  %v4728_v49 = vpop.eup %3518 }
 0x3df   : > { %1508 = vadd.xlane.f32.xlu2 %v1507_v38  ;;  %1469 = vmax.xlane.f32.xlu0 %v1468_v44  ;;  %v4730_v14 = vpop.eup %3520  ;;  %v1094_v6 = vsel %vm983_vm10, %v4728_v49, 0.0 }
 0x3e0   : > { %1903 = vmax.xlane.f32.xlu1 %v1902_v22  ;;  %v1097_v31 = vsel %vm983_vm10, %v4730_v14, 0.0 }
 0x3e1   : > { %v1078_v34 = vpop.xlane.xlu0 %1077 }
 0x3e3   : > { %v4766_v53 = vpop.f32.mrf.mxu2 }
 0x3e7   : > { %1095 = vadd.xlane.f32.xlu0 %v1094_v6 }
 0x3e8   : > { %1098 = vadd.xlane.f32.xlu1 %v1097_v31 }
 0x3e9   : > { %v1458_v46 = vpop.xlane.xlu0 %1457 }
 0x3ea   : > { %v1478_v28 = vsub.f32 %v4607_v25, %v1458_v46 }
 0x3eb   : > { %v4772_v36 = vpop.f32.mrf.mxu2 }
 0x3ec   : > { %v1487_v47 = vmul.f32 1.442695, %v1478_v28  ;;  %v1467_v28 = vpop.xlane.xlu2 %1466 }
 0x3ed   : > { %v1481_v15 = vsub.f32 %v4625_v27, %v1467_v28  ;;  %v5647_v27 = vpack.c.b16 %v4310_v4, %v4308_v3 }
 0x3ee   : > { %3522 = vpow2.f32 %v1487_v47  ;;  %3327 = vmatmul.msk.bf16.gmra.mxu2 %vm983_vm10, %v5641_v32 }
 0x3ef   : > { %1475 = vmax.xlane.f32.xlu0 %v1474_v43  ;;  %3524 = vpow2.f32 %v1485_v58  ;;  %v1493_v58 = vmul.f32 1.442695, %v1481_v15 }
 0x3f0   : > { %3526 = vrcp.f32 %v1078_v34 }
 0x3f3   : > { %v4778_v8 = vpop.f32.mrf.mxu2 }
 0x3f4   : > { %v4744_v21 = vpop.eup %3522 }
 0x3f5   : > { %v1504_v41 = vsel %vm983_vm10, %v4744_v21, 0.0  ;;  %v4750_v25 = vpop.eup %3524 }
 0x3f6   : > { %1505 = vadd.xlane.f32.xlu1 %v1504_v41  ;;  %v1501_v56 = vsel %vm983_vm10, %v4750_v25, 0.0  ;;  %v3527_v10 = vpop.eup %3526 }
 0x3f7   : > { %1900 = vmax.xlane.f32.xlu0 %v1899_v39  ;;  %v1108_v17 = vmul.f32 %v3527_v10, %v4660_v63 }
 0x3fb   : > { %v4780_v55 = vpop.f32.mrf.mxu2 }
 0x3fe   : > { %3328 = vmatmul.msk.bf16.gmra.mxu2 %vm983_vm10, %v1631_v16  ;;  %v5645_v16 = vpack.c.b16 %v4427_v33, %v4395_v29  ;;  %v5646_v33 = vsel %vm4137_vm0, %v4220_v2, 0  ;;  %vm5660_vm0 = vcmask 261120  }
 0x3ff   : > { %1502 = vadd.xlane.f32.xlu0 %v1501_v56  ;;  %v2219_v29 = vsel %vm1301_vm13, %v5646_v33, 0  ;;  %vm5662_vm6 = vmmov %vm5660_vm0 }
 0x400   : > { %vm5664_vm9 = vmmov %vm5660_vm0 }
 0x401   : > { %vm5666_vm12 = vmmov %vm5660_vm0 }
 0x402   : > { %vm5668_vm3 = vmmov %vm5660_vm0 }
 0x403   : > { %vm5670_vm4 = vmmov %vm5660_vm0 }
 0x404   : > { %vm5672_vm5 = vmmov %vm5660_vm0 }
 0x405   : > { %vm5676_vm8 = vmmov %vm5660_vm0 }
 0x406   : > { %vm5678_vm11 = vmmov %vm5660_vm0 }
 0x407   : > { %vm5680_vm14 = vmmov %vm5660_vm0 }
 0x408   : > { %vm5681_vm1 = vmmov %vm5660_vm0 }
 0x409   : > { %vm5682_vm15 = vmmov %vm5660_vm0 }
 0x40e   : > { %3341 = vmatmul.msk.bf16.vlgmr.msrb.gmra.mxu2 %vm983_vm10, %v5642_v45 }
 0x41e   : > { %3342 = vmatmul.msk.bf16.gmra.mxu2 %vm983_vm10, %v5644_v11  ;;  %v4821_v11 = vpop.f32.mrf.mxu3 }
 0x42e   : > { %3343 = vmatmul.msk.bf16.gmra.mxu2 %vm983_vm10, %v5645_v16 }
 0x432   : > { %v1081_v37 = vpop.xlane.xlu1 %1080 }
 0x433   : > { %3528 = vrcp.f32 %v1081_v37 }
 0x439   : > { %v3529_v5 = vpop.eup %3528 }
 0x43a   : > { %v1109_v35 = vmul.f32 %v3529_v5, %v4677_v23  ;;  %v1087_v38 = vpop.xlane.xlu1 %1086  ;;  %v1084_v44 = vpop.xlane.xlu0 %1083  ;;  %v1908_v5 = vsel %vm983_vm10, %v4821_v11, -inf }
 0x43b   : > { %3530 = vrcp.f32 %v1087_v38 }
 0x43c   : > { %v1117_v22 = vpack.c.bf16 %v1109_v35, %v1108_v17  ;;  %3532 = vrcp.f32 %v1084_v44 }
 0x43e   : > { %3313 = vmatmul.msk.bf16.vlgmr.msrb.gmra.mxu0 %vm983_vm10, %v1117_v22  ;;  %3344 = vmatmul.msk.bf16.gmra.mxu2 %vm983_vm10, %v2071_v12 }
 0x43f   : > { %2228 = vmatpush.bf16.msrb.mxu0 %v2219_v29 }
 0x441   : > { %v4794_v23 = vpop.f32.mrf.mxu2  ;;  %v3531_v6 = vpop.eup %3530 }
 0x442   : > { %v1464_v34 = vpop.xlane.xlu0 %1463  ;;  %v3533_v46 = vpop.eup %3532  ;;  %v1111_v12 = vmul.f32 %v3531_v6, %v4682_v61 }
 0x443   : > { %v1093_v63 = vpop.xlane.xlu1 %1092  ;;  %v1480_v31 = vsub.f32 %v4617_v50, %v1464_v34  ;;  %v1110_v24 = vmul.f32 %v3533_v46, %v4685_v0 }
 0x445   : > { %v1491_v62 = vmul.f32 1.442695, %v1480_v31  ;;  %v1118_v41 = vpack.c.bf16 %v1111_v12, %v1110_v24 }
 0x447   : > { %3534 = vpow2.f32 %v1491_v62 }
 0x449   : > { %v4800_v47 = vpop.f32.mrf.mxu2 }
 0x44a   : > { %v1090_v43 = vpop.xlane.xlu0 %1089 }
 0x44b   : > { %v4804_v32 = vpop.xlane.xlu1 %1894  ;;  %3536 = vrcp.f32 %v1090_v43  ;;  %v5649_v43 = vld [vmem:[#allocation13_spill] sm:$0xff] }
 0x44c   : > { %3538 = vpow2.f32 %v1493_v58  ;;  %v5650_v58 = vld [vmem:[#allocation12_spill] sm:$0xff] }
 0x44d   : > { %v4806_v50 = vpop.eup %3534  ;;  %3540 = vrcp.f32 %v1093_v63 }
 0x44e   : > { %3314 = vmatmul.msk.bf16.gmra.mxu0 %vm983_vm10, %v1118_v41  ;;  %3357 = vmatmul.msk.bf16.vlgmr.msra.gmra.mxu2 %vm983_vm10, %v5647_v27  ;;  %v1510_v61 = vsel %vm983_vm10, %v4806_v50, 0.0  ;;  %v5651_v41 = vpack.c.b16 %v5649_v43, %v5650_v58 }
 0x44f   : > { %1511 = vadd.xlane.f32.xlu0 %v1510_v61  ;;  %v1905_v61 = vsel %vm983_vm10, %v4802_v42, -inf }
 0x451   : > { %v4815_v0 = vpop.f32.mrf.mxu2  ;;  %v3537_v4 = vpop.eup %3536 }
 0x452   : > { %v1673_v39 = vsel %vm983_vm10, %v4815_v0, -inf  ;;  %v1470_v45 = vpop.xlane.xlu0 %1469  ;;  %v4824_v16 = vpop.eup %3538  ;;  %v1112_v17 = vmul.f32 %v3537_v4, %v4706_v13  ;;  %v5648_v13 = vpack.c.b16 %v4359_v60, %v4357_v19 }
 0x453   : > { %v4819_v56 = vpop.xlane.xlu1 %1903  ;;  %1674 = vmax.xlane.f32.xlu1 %v1673_v39  ;;  %v1482_v3 = vsub.f32 %v4635_v48, %v1470_v45  ;;  %v3541_v10 = vpop.eup %3540  ;;  %v1513_v48 = vsel %vm983_vm10, %v4824_v16, 0.0 }
 0x454   : > { %v1113_v44 = vmul.f32 %v3541_v10, %v4692_v57 }
 0x455   : > { %v1495_v37 = vmul.f32 1.442695, %v1482_v3 }
 0x456   : > { %v1119_v29 = vpack.c.bf16 %v1113_v44, %v1112_v17  ;;  %v5653_v44 = vpack.c.b16 %v4490_v26, %v4465_v1 }
 0x457   : > { %1909 = vmax.xlane.f32.xlu0 %v1908_v5  ;;  %3542 = vpow2.f32 %v1495_v37 }
 0x459   : > { %v4829_v35 = vpop.f32.mrf.mxu2 }
 0x45a   : > { %v1676_v38 = vsel %vm983_vm10, %v4829_v35, -inf  ;;  %v1096_v33 = vpop.xlane.xlu0 %1095 }
 0x45b   : > { %v1099_v22 = vpop.xlane.xlu1 %1098  ;;  %1677 = vmax.xlane.f32.xlu2 %v1676_v38  ;;  %1514 = vadd.xlane.f32.xlu1 %v1513_v48  ;;  %v2421_v38 = vsel %vm4145_vm7, %v4220_v2, 0  ;;  %vm5674_vm7 = vmmov %vm5660_vm0 }
 0x45c   : > { %3544 = vrcp.f32 %v1099_v22  ;;  %v2439_v22 = vsel %vm1301_vm13, %v2421_v38, 0 }
 0x45d   : > { %v4841_v63 = vpop.eup %3542  ;;  %3546 = vrcp.f32 %v1096_v33 }
 0x45e   : > { %3315 = vmatmul.msk.bf16.gmra.mxu0 %vm983_vm10, %v1119_v29  ;;  %3358 = vmatmul.msk.bf16.gmra.mxu2 %vm983_vm10, %v5648_v13  ;;  %v1516_v6 = vsel %vm983_vm10, %v4841_v63, 0.0 }
 0x461   : > { %v4843_v34 = vpop.f32.mrf.mxu2 }
 0x462   : > { %v1679_v57 = vsel %vm983_vm10, %v4843_v34, -inf  ;;  %v1476_v31 = vpop.xlane.xlu0 %1475  ;;  %v3545_v46 = vpop.eup %3544 }
 0x463   : > { %1680 = vmax.xlane.f32.xlu1 %v1679_v57  ;;  %1517 = vadd.xlane.f32.xlu2 %v1516_v6  ;;  %v3547_v28 = vpop.eup %3546  ;;  %v1115_v19 = vmul.f32 %v3545_v46, %v4730_v14 }
 0x464   : > { %v1114_v60 = vmul.f32 %v3547_v28, %v4728_v49  ;;  %v1484_v28 = vsub.f32 %v4650_v9, %v1476_v31  ;;  %v4916_v31 = vpop.f32.mrf.mxu3 }
 0x466   : > { %v1120_v12 = vpack.c.bf16 %v1115_v19, %v1114_v60 }
 0x469   : > { %v4851_v62 = vpop.f32.mrf.mxu2  ;;  %v1506_v27 = vpop.xlane.xlu1 %1505 }
 0x46a   : > { %v1682_v15 = vsel %vm983_vm10, %v4851_v62, -inf  ;;  %v4855_v24 = vpop.xlane.xlu0 %1900  ;;  %3548 = vrcp.f32 %v1506_v27 }
 0x46b   : > { %1683 = vmax.xlane.f32.xlu2 %v1682_v15  ;;  %v1473_v15 = vpop.xlane.xlu2 %1472 }
 0x46e   : > { %3316 = vmatmul.msk.bf16.gmra.mxu0 %vm983_vm10, %v1120_v12  ;;  %3359 = vmatmul.msk.bf16.gmra.mxu2 %vm983_vm10, %v5651_v41  ;;  %v1499_v12 = vmul.f32 1.442695, %v1484_v28 }
 0x470   : > { %v3549_v45 = vpop.eup %3548 }
 0x471   : > { %v4862_v49 = vpop.f32.mrf.mxu2  ;;  %v1534_v10 = vmul.f32 %v3549_v45, %v4744_v21 }
 0x472   : > { %v1685_v14 = vsel %vm983_vm10, %v4862_v49, -inf  ;;  %v1503_v39 = vpop.xlane.xlu0 %1502 }
 0x473   : > { %1686 = vmax.xlane.f32.xlu1 %v1685_v14  ;;  %1906 = vmax.xlane.f32.xlu2 %v1905_v61  ;;  %3550 = vrcp.f32 %v1503_v39  ;;  %v1898_v27 = vpop.xlane.xlu2 %1897  ;;  %v1911_v61 = vsel %vm983_vm10, %v4916_v31, -inf }
 0x474   : > { %3552 = vpow2.f32 %v1499_v12 }
 0x479   : > { %v4868_v3 = vpop.f32.mrf.mxu2  ;;  %v3551_v4 = vpop.eup %3550 }
 0x47a   : > { %v1688_v37 = vsel %vm983_vm10, %v4868_v3, -inf  ;;  %v1533_v5 = vmul.f32 %v3551_v4, %v4750_v25  ;;  %v4912_v41 = vpop.eup %3552 }
 0x47b   : > { %1689 = vmax.xlane.f32.xlu2 %v1688_v37  ;;  %v1522_v9 = vsel %vm983_vm10, %v4912_v41, 0.0  ;;  %v1509_v14 = vpop.xlane.xlu2 %1508 }
 0x47c   : > { %v1542_v48 = vpack.c.bf16 %v1534_v10, %v1533_v5  ;;  %3554 = vrcp.f32 %v1509_v14 }
 0x47e   : > { %3360 = vmatmul.msk.bf16.gmra.mxu2 %vm983_vm10, %v5653_v44  ;;  %3321 = vmatmul.msk.bf16.vlgmr.msra.gmra.mxu1 %vm983_vm10, %v1542_v48 }
 0x47f   : > { %2448 = vmatpush.bf16.msra.mxu1 %v2439_v22 }
 0x481   : > { %v4883_v33 = vpop.f32.mrf.mxu2 }
 0x482   : > { %v1691_v21 = vsel %vm983_vm10, %v4883_v33, -inf  ;;  %v3555_v37 = vpop.eup %3554 }
 0x483   : > { %1692 = vmax.xlane.f32.xlu1 %v1691_v21  ;;  %v1535_v17 = vmul.f32 %v3555_v37, %v4716_v54 }
 0x489   : > { %v4887_v25 = vpop.f32.mrf.mxu2 }
 0x48a   : > { %v1694_v29 = vsel %vm983_vm10, %v4887_v25, -inf }
 0x48b   : > { %1695 = vmax.xlane.f32.xlu2 %v1694_v29 }
 0x491   : > { %v4891_v26 = vpop.f32.mrf.mxu2 }
 0x492   : > { %v2113_v1 = vsel %vm983_vm10, %v4891_v26, -inf }
 0x493   : > { %2114 = vmax.xlane.f32.xlu0 %v2113_v1  ;;  %v1483_v1 = vsub.f32 %v4643_v51, %v1473_v15 }
 0x499   : > { %v4895_v13 = vpop.f32.mrf.mxu2 }
 0x49a   : > { %v2116_v57 = vsel %vm983_vm10, %v4895_v13, -inf }
 0x49b   : > { %2117 = vmax.xlane.f32.xlu1 %v2116_v57 }
 0x4a1   : > { %v4899_v6 = vpop.f32.mrf.mxu2 }
 0x4a2   : > { %v2119_v46 = vsel %vm983_vm10, %v4899_v6, -inf }
 0x4a3   : > { %2120 = vmax.xlane.f32.xlu2 %v2119_v46 }
 0x4a9   : > { %v4904_v60 = vpop.f32.mrf.mxu2 }
 0x4aa   : > { %v2122_v19 = vsel %vm983_vm10, %v4904_v60, -inf }
 0x4ab   : > { %2123 = vmax.xlane.f32.xlu0 %v2122_v19 }
 0x4b1   : > { %v4908_v43 = vpop.f32.mrf.mxu2 }
 0x4b2   : > { %v2125_v58 = vsel %vm983_vm10, %v4908_v43, -inf }
 0x4b3   : > { %2126 = vmax.xlane.f32.xlu1 %v2125_v58 }
 0x4b9   : > { %v4930_v54 = vpop.f32.mrf.mxu2 }
 0x4ba   : > { %v2128_v15 = vsel %vm983_vm10, %v4930_v54, -inf }
 0x4bb   : > { %1523 = vadd.xlane.f32.xlu1 %v1522_v9 }
 0x4c1   : > { %v4939_v14 = vpop.f32.mrf.mxu2 }
 0x4c2   : > { %v1512_v39 = vpop.xlane.xlu0 %1511 }
 0x4c3   : > { %1912 = vmax.xlane.f32.xlu1 %v1911_v61  ;;  %3556 = vrcp.f32 %v1512_v39 }
 0x4c6   : > { %v1675_v45 = vpop.xlane.xlu1 %1674 }
 0x4c7   : > { %v1697_v4 = vsub.f32 %v4815_v0, %v1675_v45 }
 0x4c9   : > { %v1705_v10 = vmul.f32 1.442695, %v1697_v4  ;;  %v3557_v5 = vpop.eup %3556 }
 0x4ca   : > { %v1536_v38 = vmul.f32 %v3557_v5, %v4806_v50  ;;  %v1497_v50 = vmul.f32 1.442695, %v1483_v1  ;;  %v1918_v5 = vsub.f32 %v4666_v7, %v1898_v27  ;;  %v4958_v7 = vpop.f32.mrf.mxu2 }
 0x4cb   : > { %3558 = vpow2.f32 %v1705_v10 }
 0x4cc   : > { %v1543_v48 = vpack.c.bf16 %v1536_v38, %v1535_v17 }
 0x4ce   : > { %v1678_v44 = vpop.xlane.xlu2 %1677  ;;  %v1515_v22 = vpop.xlane.xlu1 %1514  ;;  %3322 = vmatmul.msk.bf16.gmra.mxu1 %vm983_vm10, %v1543_v48 }
 0x4cf   : > { %v1698_v21 = vsub.f32 %v4829_v35, %v1678_v44  ;;  %v1917_v44 = vsub.f32 %v4658_v18, %v4804_v32 }
 0x4d1   : > { %v4925_v29 = vpop.eup %3558  ;;  %v1707_v0 = vmul.f32 1.442695, %v1698_v21  ;;  %v2131_v21 = vsel %vm983_vm10, %v4939_v14, -inf  ;;  %v1925_v18 = vmul.f32 1.442695, %v1917_v44 }
 0x4d2   : > { %v1721_v57 = vsel %vm983_vm10, %v4925_v29, 0.0 }
 0x4d3   : > { %3560 = vpow2.f32 %v1707_v0  ;;  %1722 = vadd.xlane.f32.xlu2 %v1721_v57  ;;  %v2134_v0 = vsel %vm983_vm10, %v4958_v7, -inf  ;;  %v4969_v57 = vpop.f32.mrf.mxu3 }
 0x4d4   : > { %3562 = vrcp.f32 %v1515_v22 }
 0x4d6   : > { %v1681_v46 = vpop.xlane.xlu1 %1680  ;;  %v1518_v28 = vpop.xlane.xlu2 %1517 }
 0x4d7   : > { %v1699_v35 = vsub.f32 %v4843_v34, %v1681_v46  ;;  %3564 = vrcp.f32 %v1518_v28 }
 0x4d8   : > { %3566 = vpow2.f32 %v1497_v50 }
 0x4d9   : > { %v4933_v19 = vpop.eup %3560  ;;  %v1709_v12 = vmul.f32 1.442695, %v1699_v35 }
 0x4da   : > { %v1724_v51 = vsel %vm983_vm10, %v4933_v19, 0.0  ;;  %v3563_v58 = vpop.eup %3562 }
 0x4db   : > { %3568 = vpow2.f32 %v1709_v12  ;;  %1725 = vadd.xlane.f32.xlu0 %v1724_v51  ;;  %2129 = vmax.xlane.f32.xlu2 %v2128_v15  ;;  %v1537_v34 = vmul.f32 %v3563_v58, %v4824_v16  ;;  %v1914_v12 = vsel %vm983_vm10, %v4969_v57, -inf  ;;  %v4980_v15 = vpop.f32.mrf.mxu3 }
 0x4dd   : > { %v3565_v9 = vpop.eup %3564 }
 0x4de   : > { %v1684_v61 = vpop.xlane.xlu2 %1683  ;;  %v1538_v39 = vmul.f32 %v3565_v9, %v4841_v63  ;;  %v4943_v45 = vpop.eup %3566  ;;  %v1927_v63 = vmul.f32 1.442695, %v1918_v5 }
 0x4df   : > { %v1700_v4 = vsub.f32 %v4851_v62, %v1684_v61  ;;  %v1519_v38 = vsel %vm983_vm10, %v4943_v45, 0.0 }
 0x4e0   : > { %v1544_v37 = vpack.c.bf16 %v1538_v39, %v1537_v34  ;;  %v1919_v39 = vsub.f32 %v4703_v40, %v4855_v24  ;;  %v1910_v40 = vpop.xlane.xlu0 %1909 }
 0x4e1   : > { %v4946_v10 = vpop.eup %3568  ;;  %v1711_v17 = vmul.f32 1.442695, %v1700_v4 }
 0x4e2   : > { %3323 = vmatmul.msk.bf16.gmra.mxu1 %vm983_vm10, %v1544_v37  ;;  %v1727_v16 = vsel %vm983_vm10, %v4946_v10, 0.0 }
 0x4e3   : > { %3570 = vpow2.f32 %v1711_v17  ;;  %1520 = vadd.xlane.f32.xlu0 %v1519_v38  ;;  %1728 = vadd.xlane.f32.xlu1 %v1727_v16 }
 0x4e4   : > { %3572 = vpow2.f32 %v1927_v63  ;;  %v1929_v63 = vmul.f32 1.442695, %v1919_v39 }
 0x4e5   : > { %3574 = vpow2.f32 %v1925_v18 }
 0x4e6   : > { %v1687_v48 = vpop.xlane.xlu1 %1686  ;;  %v4954_v62 = vpop.xlane.xlu2 %1906 }
 0x4e7   : > { %v1701_v22 = vsub.f32 %v4862_v49, %v1687_v48  ;;  %v4998_v48 = vpop.f32.mrf.mxu2 }
 0x4e9   : > { %v4960_v27 = vpop.eup %3570  ;;  %v1713_v32 = vmul.f32 1.442695, %v1701_v22  ;;  %v5001_v22 = vpop.f32.mrf.mxu3 }
 0x4ea   : > { %v1730_v1 = vsel %vm983_vm10, %v4960_v27, 0.0  ;;  %v4971_v46 = vpop.eup %3572 }
 0x4eb   : > { %2132 = vmax.xlane.f32.xlu0 %v2131_v21  ;;  %1731 = vadd.xlane.f32.xlu2 %v1730_v1  ;;  %3576 = vpow2.f32 %v1713_v32  ;;  %v1944_v35 = vsel %vm983_vm10, %v4971_v46, 0.0  ;;  %v4978_v51 = vpop.eup %3574  ;;  %v1920_v21 = vsub.f32 %v4714_v59, %v4819_v56  ;;  %v2333_v1 = vsel %vm983_vm10, %v4980_v15, -inf }
 0x4ec   : > { %2135 = vmax.xlane.f32.xlu1 %v2134_v0  ;;  %v1941_v37 = vsel %vm983_vm10, %v4978_v51, 0.0  ;;  %v2553_v0 = vsel %vm983_vm10, %v4998_v48, -inf }
 0x4ed   : > { %v1931_v18 = vmul.f32 1.442695, %v1920_v21 }
 0x4ee   : > { %v1690_v50 = vpop.xlane.xlu2 %1689 }
 0x4ef   : > { %v1702_v49 = vsub.f32 %v4868_v3, %v1690_v50  ;;  %v1358_v3 = vpop.f32.mrf.mxu0 }
 0x4f0   : > { %v1359_v17 = vadd.f32 %v1358_v3, %v4758_v20  ;;  %v5026_v3 = vpop.f32.mrf.mxu2 }
 0x4f1   : > { %v1715_v28 = vmul.f32 1.442695, %v1702_v49  ;;  %v4982_v9 = vpop.eup %3576 }
 0x4f2   : > { %v1733_v4 = vsel %vm983_vm10, %v4982_v9, 0.0 }
 0x4f3   : > { %3578 = vpow2.f32 %v1715_v28  ;;  %1945 = vadd.xlane.f32.xlu0 %v1944_v35  ;;  %1915 = vmax.xlane.f32.xlu2 %v1914_v12 }
 0x4f6   : > { %v1693_v58 = vpop.xlane.xlu1 %1692 }
 0x4f7   : > { %v1703_v34 = vsub.f32 %v4883_v33, %v1693_v58 }
 0x4f9   : > { %v4984_v61 = vpop.eup %3578  ;;  %v1717_v16 = vmul.f32 1.442695, %v1703_v34 }
 0x4fa   : > { %v1736_v5 = vsel %vm983_vm10, %v4984_v61, 0.0 }
 0x4fb   : > { %1734 = vadd.xlane.f32.xlu0 %v1733_v4  ;;  %1942 = vadd.xlane.f32.xlu2 %v1941_v37  ;;  %v1570_v38 = vpop.f32.mrf.mxu1  ;;  %3580 = vpow2.f32 %v1717_v16 }
 0x4fc   : > { %1737 = vadd.xlane.f32.xlu1 %v1736_v5  ;;  %v4996_v33 = vadd.f32 %v1570_v38, %v1359_v17  ;;  %3582 = vpow2.f32 %v1929_v63  ;;  %v1921_v5 = vsub.f32 %v4802_v42, %v4954_v62  ;;  %v1922_v38 = vsub.f32 %v4821_v11, %v1910_v40  ;;  %v5044_v62 = vpop.f32.mrf.mxu2 }
 0x4fd   : > { %v2556_v63 = vsel %vm983_vm10, %v5026_v3, -inf }
 0x4fe   : > { %v1696_v24 = vpop.xlane.xlu2 %1695 }
 0x4ff   : > { %v1704_v44 = vsub.f32 %v4887_v25, %v1696_v24  ;;  %v2336_v25 = vsel %vm983_vm10, %v5001_v22, -inf }
 0x501   : > { %v1719_v20 = vmul.f32 1.442695, %v1704_v44  ;;  %v5011_v50 = vpop.eup %3580  ;;  %v1935_v44 = vmul.f32 1.442695, %v1922_v38 }
 0x502   : > { %v5014_v56 = vpop.eup %3582  ;;  %v1739_v35 = vsel %vm983_vm10, %v5011_v50, 0.0 }
 0x503   : > { %3584 = vpow2.f32 %v1719_v20  ;;  %2334 = vmax.xlane.f32.xlu0 %v2333_v1  ;;  %2554 = vmax.xlane.f32.xlu2 %v2553_v0  ;;  %v1947_v58 = vsel %vm983_vm10, %v5014_v56, 0.0  ;;  %v2559_v0 = vsel %vm983_vm10, %v5044_v62, -inf }
 0x504   : > { %2337 = vmax.xlane.f32.xlu1 %v2336_v25  ;;  %3586 = vpow2.f32 %v1931_v18 }
 0x506   : > { %v2115_v32 = vpop.xlane.xlu0 %2114 }
 0x507   : > { %v2137_v59 = vsub.f32 %v4891_v26, %v2115_v32  ;;  %v5024_v26 = vpop.f32.mrf.mxu3 }
 0x509   : > { %v5016_v49 = vpop.eup %3584  ;;  %v2145_v28 = vmul.f32 1.442695, %v2137_v59 }
 0x50a   : > { %v1742_v12 = vsel %vm983_vm10, %v5016_v49, 0.0  ;;  %v5028_v39 = vpop.eup %3586 }
 0x50b   : > { %3588 = vpow2.f32 %v2145_v28  ;;  %1740 = vadd.xlane.f32.xlu2 %v1739_v35  ;;  %1743 = vadd.xlane.f32.xlu0 %v1742_v12  ;;  %v1950_v16 = vsel %vm983_vm10, %v5028_v39, 0.0  ;;  %v2339_v12 = vsel %vm983_vm10, %v5024_v26, -inf }
 0x50c   : > { %1948 = vadd.xlane.f32.xlu1 %v1947_v58 }
 0x50e   : > { %v2118_v34 = vpop.xlane.xlu1 %2117 }
 0x50f   : > { %v2138_v4 = vsub.f32 %v4895_v13, %v2118_v34  ;;  %v1933_v13 = vmul.f32 1.442695, %v1921_v5  ;;  %v5042_v42 = vpop.f32.mrf.mxu3 }
 0x510   : > { %v2342_v1 = vsel %vm983_vm10, %v5042_v42, -inf }
 0x511   : > { %v5031_v37 = vpop.eup %3588  ;;  %v2147_v17 = vmul.f32 1.442695, %v2138_v4  ;;  %v5068_v4 = vpop.f32.mrf.mxu2 }
 0x512   : > { %v2161_v24 = vsel %vm983_vm10, %v5031_v37, 0.0 }
 0x513   : > { %3590 = vpow2.f32 %v2147_v17  ;;  %1951 = vadd.xlane.f32.xlu2 %v1950_v16  ;;  %2557 = vmax.xlane.f32.xlu0 %v2556_v63  ;;  %v2562_v16 = vsel %vm983_vm10, %v5068_v4, -inf }
 0x514   : > { %2162 = vadd.xlane.f32.xlu1 %v2161_v24  ;;  %3592 = vpow2.f32 %v1933_v13 }
 0x515   : > { %3594 = vpow2.f32 %v1935_v44 }
 0x516   : > { %v2121_v21 = vpop.xlane.xlu2 %2120 }
 0x517   : > { %v2139_v40 = vsub.f32 %v4899_v6, %v2121_v21  ;;  %v5060_v35 = vpop.f32.mrf.mxu3 }
 0x519   : > { %v5046_v11 = vpop.eup %3590  ;;  %v2149_v25 = vmul.f32 1.442695, %v2139_v40  ;;  %v5083_v21 = vpop.f32.mrf.mxu2 }
 0x51a   : > { %v2164_v20 = vsel %vm983_vm10, %v5046_v11, 0.0  ;;  %v5055_v32 = vpop.eup %3592 }
 0x51b   : > { %2165 = vadd.xlane.f32.xlu2 %v2164_v20  ;;  %2343 = vmax.xlane.f32.xlu0 %v2342_v1  ;;  %v5058_v6 = vpop.eup %3594  ;;  %3596 = vpow2.f32 %v2149_v25  ;;  %v1953_v58 = vsel %vm983_vm10, %v5055_v32, 0.0  ;;  %v2565_v20 = vsel %vm983_vm10, %v5083_v21, -inf  ;;  %v2345_v1 = vsel %vm983_vm10, %v5060_v35, -inf }
 0x51c   : > { %2560 = vmax.xlane.f32.xlu1 %v2559_v0  ;;  %v1956_v34 = vsel %vm983_vm10, %v5058_v6, 0.0 }
 0x51e   : > { %v2124_v18 = vpop.xlane.xlu0 %2123 }
 0x51f   : > { %v2140_v59 = vsub.f32 %v4904_v60, %v2124_v18  ;;  %v5081_v13 = vpop.f32.mrf.mxu3 }
 0x521   : > { %v2151_v28 = vmul.f32 1.442695, %v2140_v59  ;;  %v5070_v5 = vpop.eup %3596 }
 0x522   : > { %v2167_v63 = vsel %vm983_vm10, %v5070_v5, 0.0 }
 0x523   : > { %3598 = vpow2.f32 %v2151_v28  ;;  %2340 = vmax.xlane.f32.xlu2 %v2339_v12  ;;  %1954 = vadd.xlane.f32.xlu0 %v1953_v58  ;;  %v5096_v28 = vpop.f32.mrf.mxu2 }
 0x524   : > { %1957 = vadd.xlane.f32.xlu1 %v1956_v34  ;;  %v2568_v34 = vsel %vm983_vm10, %v5096_v28, -inf }
 0x526   : > { %v2127_v60 = vpop.xlane.xlu1 %2126 }
 0x527   : > { %v2141_v38 = vsub.f32 %v4908_v43, %v2127_v60  ;;  %v2348_v43 = vsel %vm983_vm10, %v5081_v13, -inf  ;;  %v5091_v0 = vpop.f32.mrf.mxu3  ;;  %v5102_v60 = vpop.f32.mrf.mxu0 }
 0x528   : > { %5654 = vst [vmem:[#allocation13_spill] sm:$0xff] %v5102_v60 }
 0x529   : > { %v5072_v17 = vpop.eup %3598  ;;  %v2153_v44 = vmul.f32 1.442695, %v2141_v38 }
 0x52a   : > { %v2170_v24 = vsel %vm983_vm10, %v5072_v17, 0.0 }
 0x52b   : > { %2563 = vmax.xlane.f32.xlu2 %v2562_v16  ;;  %2168 = vadd.xlane.f32.xlu0 %v2167_v63  ;;  %3600 = vpow2.f32 %v2153_v44 }
 0x52c   : > { %2171 = vadd.xlane.f32.xlu1 %v2170_v24  ;;  %v5112_v24 = vpop.f32.mrf.mxu1 }
 0x52d   : > { %5655 = vst [vmem:[#allocation12_spill] sm:$0xff] %v5112_v24 }
 0x52e   : > { %v1524_v40 = vpop.xlane.xlu1 %1523 }
 0x52f   : > { %v5104_v38 = vpop.f32.mrf.mxu3 }
 0x530   : > { %v2354_v63 = vsel %vm983_vm10, %v5104_v38, -inf }
 0x531   : > { %v5093_v18 = vpop.eup %3600 }
 0x532   : > { %v2173_v58 = vsel %vm983_vm10, %v5093_v18, 0.0 }
 0x533   : > { %2349 = vmax.xlane.f32.xlu2 %v2348_v43  ;;  %2566 = vmax.xlane.f32.xlu0 %v2565_v20  ;;  %v1363_v43 = vpop.f32.mrf.mxu0 }
 0x534   : > { %2346 = vmax.xlane.f32.xlu1 %v2345_v1  ;;  %v1364_v20 = vadd.f32 %v1363_v43, %v4766_v53 }
 0x536   : > { %v1913_v25 = vpop.xlane.xlu1 %1912 }
 0x537   : > { %v1923_v59 = vsub.f32 %v4916_v31, %v1913_v25 }
 0x539   : > { %v1937_v12 = vmul.f32 1.442695, %v1923_v59 }
 0x53b   : > { %3602 = vpow2.f32 %v1937_v12  ;;  %2174 = vadd.xlane.f32.xlu2 %v2173_v58 }
 0x53c   : > { %2569 = vmax.xlane.f32.xlu1 %v2568_v34  ;;  %v5118_v34 = vpop.f32.mrf.mxu0 }
 0x541   : > { %v5106_v16 = vpop.eup %3602 }
 0x542   : > { %v1959_v31 = vsel %vm983_vm10, %v5106_v16, 0.0 }
 0x543   : > { %1960 = vadd.xlane.f32.xlu2 %v1959_v31 }
 0x544   : > { %2355 = vmax.xlane.f32.xlu1 %v2354_v63 }
 0x546   : > { %v1723_v44 = vpop.xlane.xlu2 %1722 }
 0x547   : > { %3604 = vrcp.f32 %v1723_v44 }
 0x54b   : > { %v1575_v1 = vpop.f32.mrf.mxu1 }
 0x54c   : > { %v5115_v25 = vadd.f32 %v1575_v1, %v1364_v20 }
 0x54d   : > { %v3605_v60 = vpop.eup %3604 }
 0x54e   : > { %v2130_v59 = vpop.xlane.xlu2 %2129  ;;  %v1726_v12 = vpop.xlane.xlu0 %1725  ;;  %v1753_v63 = vmul.f32 %v3605_v60, %v4925_v29 }
 0x54f   : > { %v2142_v58 = vsub.f32 %v4930_v54, %v2130_v59  ;;  %3606 = vrcp.f32 %v1726_v12  ;;  %v2641_v54 = vsel %vm4251_vm2, %v4220_v2, 0  ;;  %vm5683_vm2 = vmmov %vm5660_vm0 }
 0x551   : > { %v2155_v31 = vmul.f32 1.442695, %v2142_v58 }
 0x553   : > { %3608 = vpow2.f32 %v2155_v31  ;;  %v5122_v20 = vpop.f32.mrf.mxu1 }
 0x554   : > { %3610 = vrcp.f32 %v1524_v40  ;;  %v2659_v40 = vsel %vm1301_vm13, %v2641_v54, 0 }
 0x555   : > { %v3607_v24 = vpop.eup %3606 }
 0x556   : > { %v1754_v53 = vmul.f32 %v3607_v24, %v4933_v19  ;;  %v1729_v43 = vpop.xlane.xlu1 %1728  ;;  %v1521_v44 = vpop.xlane.xlu0 %1520 }
 0x557   : > { %3612 = vrcp.f32 %v1521_v44  ;;  %v1368_v19 = vpop.f32.mrf.mxu0 }
 0x558   : > { %v1762_v1 = vpack.c.bf16 %v1754_v53, %v1753_v63  ;;  %3614 = vrcp.f32 %v1729_v43  ;;  %v1369_v52 = vadd.f32 %v1368_v19, %v4778_v8 }
 0x559   : > { %v5127_v59 = vpop.eup %3608 }
 0x55a   : > { %3329 = vmatmul.msk.bf16.vlgmr.msra.gmra.mxu0 %vm983_vm10, %v1762_v1  ;;  %v2176_v29 = vsel %vm983_vm10, %v5127_v59, 0.0  ;;  %v3611_v60 = vpop.eup %3610 }
 0x55b   : > { %2668 = vmatpush.bf16.msra.mxu0 %v2659_v40  ;;  %2177 = vadd.xlane.f32.xlu0 %v2176_v29  ;;  %v1540_v44 = vmul.f32 %v3611_v60, %v4912_v41 }
 0x55d   : > { %v3613_v24 = vpop.eup %3612 }
 0x55e   : > { %v1732_v2 = vpop.xlane.xlu2 %1731  ;;  %v2133_v12 = vpop.xlane.xlu0 %2132  ;;  %v1539_v53 = vmul.f32 %v3613_v24, %v4943_v45 }
 0x55f   : > { %3616 = vrcp.f32 %v1732_v2  ;;  %v2136_v58 = vpop.xlane.xlu1 %2135  ;;  %v2143_v31 = vsub.f32 %v4939_v14, %v2133_v12  ;;  %v1580_v63 = vpop.f32.mrf.mxu1 }
 0x560   : > { %v2144_v54 = vsub.f32 %v4958_v7, %v2136_v58  ;;  %v5138_v1 = vadd.f32 %v1580_v63, %v1369_v52  ;;  %v1545_v43 = vpack.c.bf16 %v1540_v44, %v1539_v53  ;;  %v3615_v30 = vpop.eup %3614 }
 0x561   : > { %v2157_v40 = vmul.f32 1.442695, %v2143_v31  ;;  %v1755_v2 = vmul.f32 %v3615_v30, %v4946_v10 }
 0x562   : > { %v2159_v29 = vmul.f32 1.442695, %v2144_v54  ;;  %3324 = vmatmul.msk.bf16.gmra.mxu1 %vm983_vm10, %v1545_v43 }
 0x563   : > { %3618 = vpow2.f32 %v2157_v40 }
 0x564   : > { %3620 = vpow2.f32 %v2159_v29 }
 0x565   : > { %v3617_v8 = vpop.eup %3616 }
 0x566   : > { %v1916_v19 = vpop.xlane.xlu2 %1915  ;;  %v1946_v14 = vpop.xlane.xlu0 %1945  ;;  %v1756_v45 = vmul.f32 %v3617_v8, %v4960_v27 }
 0x567   : > { %v1924_v41 = vsub.f32 %v4969_v57, %v1916_v19  ;;  %v5153_v57 = vpop.f32.mrf.mxu2 }
 0x568   : > { %v1763_v7 = vpack.c.bf16 %v1756_v45, %v1755_v2  ;;  %v2571_v44 = vsel %vm983_vm10, %v5153_v57, -inf }
 0x569   : > { %v5144_v60 = vpop.eup %3618  ;;  %v1939_v24 = vmul.f32 1.442695, %v1924_v41 }
 0x56a   : > { %v5146_v52 = vpop.eup %3620  ;;  %3330 = vmatmul.msk.bf16.gmra.mxu0 %vm983_vm10, %v1763_v7  ;;  %v2179_v12 = vsel %vm983_vm10, %v5144_v60, 0.0 }
 0x56b   : > { %3622 = vpow2.f32 %v1939_v24  ;;  %v2182_v58 = vsel %vm983_vm10, %v5146_v52, 0.0  ;;  %2180 = vadd.xlane.f32.xlu1 %v2179_v12 }
 0x56c   : > { %2183 = vadd.xlane.f32.xlu2 %v2182_v58  ;;  %3624 = vrcp.f32 %v1946_v14 }
 0x56e   : > { %v1943_v30 = vpop.xlane.xlu2 %1942  ;;  %v1735_v10 = vpop.xlane.xlu0 %1734 }
 0x56f   : > { %3626 = vrcp.f32 %v1943_v30  ;;  %v1738_v27 = vpop.xlane.xlu1 %1737 }
 0x570   : > { %3628 = vrcp.f32 %v1738_v27 }
 0x571   : > { %v5155_v31 = vpop.eup %3622  ;;  %3630 = vrcp.f32 %v1735_v10 }
 0x572   : > { %v1962_v63 = vsel %vm983_vm10, %v5155_v31, 0.0  ;;  %v3625_v53 = vpop.eup %3624 }
 0x573   : > { %1963 = vadd.xlane.f32.xlu0 %v1962_v63  ;;  %v1974_v43 = vmul.f32 %v3625_v53, %v4971_v46 }
 0x574   : > { %2572 = vmax.xlane.f32.xlu2 %v2571_v44 }
 0x575   : > { %v3627_v54 = vpop.eup %3626 }
 0x576   : > { %v3629_v40 = vpop.eup %3628  ;;  %v1973_v29 = vmul.f32 %v3627_v54, %v4978_v51  ;;  %v2555_v8 = vpop.xlane.xlu2 %2554  ;;  %v2351_v51 = vsel %vm983_vm10, %v5091_v0, -inf }
 0x577   : > { %v2335_v19 = vpop.xlane.xlu0 %2334  ;;  %v3631_v14 = vpop.eup %3630  ;;  %v1758_v41 = vmul.f32 %v3629_v40, %v4984_v61  ;;  %v2577_v24 = vsub.f32 %v4998_v48, %v2555_v8 }
 0x578   : > { %v2338_v2 = vpop.xlane.xlu1 %2337  ;;  %v2357_v45 = vsub.f32 %v4980_v15, %v2335_v19  ;;  %v1982_v7 = vpack.c.bf16 %v1974_v43, %v1973_v29  ;;  %v1757_v58 = vmul.f32 %v3631_v14, %v4982_v9  ;;  %v5172_v48 = vpop.f32.mrf.mxu2 }
 0x579   : > { %v2358_v12 = vsub.f32 %v5001_v22, %v2338_v2  ;;  %v2585_v27 = vmul.f32 1.442695, %v2577_v24  ;;  %v2574_v63 = vsel %vm983_vm10, %v5172_v48, -inf }
 0x57a   : > { %v2365_v30 = vmul.f32 1.442695, %v2357_v45  ;;  %v1764_v46 = vpack.c.bf16 %v1758_v41, %v1757_v58  ;;  %3337 = vmatmul.msk.bf16.vlgmr.msrb.gmra.mxu1 %vm983_vm10, %v1982_v7 }
 0x57b   : > { %v2367_v10 = vmul.f32 1.442695, %v2358_v12  ;;  %2352 = vmax.xlane.f32.xlu0 %v2351_v51 }
 0x57c   : > { %3331 = vmatmul.msk.bf16.gmra.mxu0 %vm983_vm10, %v1764_v46 }
 0x57d   : > { %3632 = vpow2.f32 %v2367_v10 }
 0x57e   : > { %3634 = vpow2.f32 %v2365_v30  ;;  %v1741_v15 = vpop.xlane.xlu2 %1740 }
 0x57f   : > { %v1744_v61 = vpop.xlane.xlu0 %1743  ;;  %3636 = vrcp.f32 %v1741_v15 }
 0x580   : > { %v1949_v9 = vpop.xlane.xlu1 %1948  ;;  %3638 = vpow2.f32 %v2585_v27 }
 0x581   : > { %3640 = vrcp.f32 %v1744_v61 }
 0x582   : > { %3642 = vrcp.f32 %v1949_v9 }
 0x583   : > { %v5174_v22 = vpop.eup %3632  ;;  %2575 = vmax.xlane.f32.xlu0 %v2574_v63 }
 0x584   : > { %v5178_v53 = vpop.eup %3634  ;;  %v2384_v44 = vsel %vm983_vm10, %v5174_v22, 0.0 }
 0x585   : > { %2385 = vadd.xlane.f32.xlu2 %v2384_v44  ;;  %v2381_v54 = vsel %vm983_vm10, %v5178_v53, 0.0  ;;  %v3637_v40 = vpop.eup %3636 }
 0x586   : > { %2382 = vadd.xlane.f32.xlu1 %v2381_v54  ;;  %v5184_v43 = vpop.eup %3638  ;;  %v1952_v29 = vpop.xlane.xlu2 %1951  ;;  %v1759_v19 = vmul.f32 %v3637_v40, %v5011_v50 }
 0x587   : > { %v2558_v8 = vpop.xlane.xlu0 %2557  ;;  %v3641_v14 = vpop.eup %3640  ;;  %3644 = vrcp.f32 %v1952_v29  ;;  %v2601_v12 = vsel %vm983_vm10, %v5184_v43, 0.0 }
 0x588   : > { %v2163_v2 = vpop.xlane.xlu1 %2162  ;;  %v2578_v45 = vsub.f32 %v5026_v3, %v2558_v8  ;;  %v1760_v41 = vmul.f32 %v3641_v14, %v5016_v49  ;;  %v3643_v58 = vpop.eup %3642 }
 0x589   : > { %v1975_v46 = vmul.f32 %v3643_v58, %v5014_v56 }
 0x58a   : > { %v2587_v7 = vmul.f32 1.442695, %v2578_v45  ;;  %v1765_v24 = vpack.c.bf16 %v1760_v41, %v1759_v19 }
 0x58b   : > { %2602 = vadd.xlane.f32.xlu0 %v2601_v12 }
 0x58c   : > { %3646 = vpow2.f32 %v2587_v7  ;;  %3332 = vmatmul.msk.bf16.gmra.mxu0 %vm983_vm10, %v1765_v24 }
 0x58d   : > { %v3645_v30 = vpop.eup %3644  ;;  %3648 = vrcp.f32 %v2163_v2 }
 0x58e   : > { %v2166_v50 = vpop.xlane.xlu2 %2165  ;;  %v1976_v3 = vmul.f32 %v3645_v30, %v5028_v39 }
 0x58f   : > { %v2344_v10 = vpop.xlane.xlu0 %2343  ;;  %3650 = vrcp.f32 %v2166_v50 }
 0x590   : > { %v2561_v49 = vpop.xlane.xlu1 %2560  ;;  %v2360_v51 = vsub.f32 %v5042_v42, %v2344_v10  ;;  %v1983_v15 = vpack.c.bf16 %v1976_v3, %v1975_v46 }
 0x591   : > { %v2579_v27 = vsub.f32 %v5044_v62, %v2561_v49 }
 0x592   : > { %v5196_v61 = vpop.eup %3646  ;;  %v2371_v9 = vmul.f32 1.442695, %v2360_v51  ;;  %3338 = vmatmul.msk.bf16.gmra.mxu1 %vm983_vm10, %v1983_v15 }
 0x593   : > { %v2589_v63 = vmul.f32 1.442695, %v2579_v27  ;;  %v2604_v44 = vsel %vm983_vm10, %v5196_v61, 0.0  ;;  %v3649_v54 = vpop.eup %3648 }
 0x594   : > { %3652 = vpow2.f32 %v2371_v9  ;;  %2605 = vadd.xlane.f32.xlu1 %v2604_v44  ;;  %v2193_v39 = vmul.f32 %v3649_v54, %v5031_v37 }
 0x595   : > { %3654 = vpow2.f32 %v2589_v63  ;;  %v3651_v56 = vpop.eup %3650 }
 0x596   : > { %v2194_v42 = vmul.f32 %v3651_v56, %v5046_v11  ;;  %v2341_v62 = vpop.xlane.xlu2 %2340 }
 0x597   : > { %v1955_v40 = vpop.xlane.xlu0 %1954  ;;  %v2359_v29 = vsub.f32 %v5024_v26, %v2341_v62 }
 0x598   : > { %v1958_v8 = vpop.xlane.xlu1 %1957  ;;  %3656 = vrcp.f32 %v1955_v40  ;;  %v2202_v19 = vpack.c.bf16 %v2194_v42, %v2193_v39 }
 0x599   : > { %3658 = vrcp.f32 %v1958_v8  ;;  %v2369_v2 = vmul.f32 1.442695, %v2359_v29 }
 0x59a   : > { %v5204_v14 = vpop.eup %3652 }
 0x59b   : > { %v5206_v45 = vpop.eup %3654  ;;  %v2390_v41 = vsel %vm983_vm10, %v5204_v14, 0.0  ;;  %3660 = vpow2.f32 %v2369_v2 }
 0x59c   : > { %v2607_v37 = vsel %vm983_vm10, %v5206_v45, 0.0  ;;  %2391 = vadd.xlane.f32.xlu0 %v2390_v41  ;;  %3345 = vmatmul.msk.bf16.vlgmr.msrb.gmra.mxu0 %vm983_vm10, %v2202_v19 }
 0x59d   : > { %2608 = vadd.xlane.f32.xlu1 %v2607_v37 }
 0x59e   : > { %v3657_v26 = vpop.eup %3656  ;;  %v2564_v7 = vpop.xlane.xlu2 %2563 }
 0x59f   : > { %v3659_v11 = vpop.eup %3658  ;;  %v2169_v24 = vpop.xlane.xlu0 %2168  ;;  %v1977_v12 = vmul.f32 %v3657_v26, %v5055_v32  ;;  %v2580_v58 = vsub.f32 %v5068_v4, %v2564_v7 }
 0x5a0   : > { %v2172_v30 = vpop.xlane.xlu1 %2171  ;;  %3662 = vrcp.f32 %v2169_v24  ;;  %v1978_v50 = vmul.f32 %v3659_v11, %v5058_v6  ;;  %v5247_v7 = vpop.f32.mrf.mxu0 }
 0x5a1   : > { %3664 = vrcp.f32 %v2172_v30  ;;  %v5216_v10 = vpop.eup %3660  ;;  %v2591_v46 = vmul.f32 1.442695, %v2580_v58 }
 0x5a2   : > { %v1984_v3 = vpack.c.bf16 %v1978_v50, %v1977_v12  ;;  %v2387_v49 = vsel %vm983_vm10, %v5216_v10, 0.0 }
 0x5a3   : > { %3666 = vpow2.f32 %v2591_v46  ;;  %2388 = vadd.xlane.f32.xlu2 %v2387_v49 }
 0x5a4   : > { %3339 = vmatmul.msk.bf16.gmra.mxu1 %vm983_vm10, %v1984_v3 }
 0x5a6   : > { %v3663_v51 = vpop.eup %3662  ;;  %v2350_v27 = vpop.xlane.xlu2 %2349 }
 0x5a7   : > { %v3665_v32 = vpop.eup %3664  ;;  %v2195_v4 = vmul.f32 %v3663_v51, %v5070_v5  ;;  %v2567_v15 = vpop.xlane.xlu0 %2566  ;;  %v2362_v9 = vsub.f32 %v5081_v13, %v2350_v27 }
 0x5a8   : > { %v2196_v6 = vmul.f32 %v3665_v32, %v5072_v17  ;;  %v2347_v63 = vpop.xlane.xlu1 %2346  ;;  %v2581_v44 = vsub.f32 %v5083_v21, %v2567_v15  ;;  %v1373_v30 = vpop.f32.mrf.mxu0 }
 0x5a9   : > { %v2361_v54 = vsub.f32 %v5060_v35, %v2347_v63  ;;  %v5226_v56 = vpop.eup %3666  ;;  %v2375_v39 = vmul.f32 1.442695, %v2362_v9  ;;  %v5259_v15 = vpop.f32.mrf.mxu1 }
 0x5aa   : > { %v2593_v42 = vmul.f32 1.442695, %v2581_v44  ;;  %v2203_v62 = vpack.c.bf16 %v2196_v6, %v2195_v4  ;;  %v2610_v5 = vsel %vm983_vm10, %v5226_v56, 0.0  ;;  %v1374_v44 = vadd.f32 %v1373_v30, %v4794_v23 }
 0x5ab   : > { %v2373_v40 = vmul.f32 1.442695, %v2361_v54  ;;  %3668 = vpow2.f32 %v2375_v39  ;;  %2611 = vadd.xlane.f32.xlu2 %v2610_v5 }
 0x5ac   : > { %3346 = vmatmul.msk.bf16.gmra.mxu0 %vm983_vm10, %v2203_v62 }
 0x5ad   : > { %3670 = vpow2.f32 %v2373_v40 }
 0x5ae   : > { %3672 = vpow2.f32 %v2593_v42  ;;  %v2175_v50 = vpop.xlane.xlu2 %2174 }
 0x5b0   : > { %v2570_v17 = vpop.xlane.xlu1 %2569  ;;  %v5255_v46 = vpop.f32.mrf.mxu0 }
 0x5b1   : > { %v2582_v13 = vsub.f32 %v5096_v28, %v2570_v17  ;;  %v5232_v21 = vpop.eup %3668 }
 0x5b2   : > { %v2396_v8 = vsel %vm983_vm10, %v5232_v21, 0.0 }
 0x5b3   : > { %v5234_v35 = vpop.eup %3670  ;;  %v2595_v29 = vmul.f32 1.442695, %v2582_v13  ;;  %2397 = vadd.xlane.f32.xlu1 %v2396_v8 }
 0x5b4   : > { %v5238_v19 = vpop.eup %3672  ;;  %v2393_v2 = vsel %vm983_vm10, %v5234_v35, 0.0 }
 0x5b5   : > { %3674 = vpow2.f32 %v2595_v29  ;;  %2394 = vadd.xlane.f32.xlu0 %v2393_v2  ;;  %v2613_v41 = vsel %vm983_vm10, %v5238_v19, 0.0 }
 0x5b6   : > { %2614 = vadd.xlane.f32.xlu2 %v2613_v41  ;;  %v1961_v4 = vpop.xlane.xlu2 %1960 }
 0x5b8   : > { %v2356_v28 = vpop.xlane.xlu1 %2355 }
 0x5b9   : > { %v2364_v37 = vsub.f32 %v5104_v38, %v2356_v28 }
 0x5bb   : > { %v5245_v26 = vpop.eup %3674  ;;  %v2379_v11 = vmul.f32 1.442695, %v2364_v37 }
 0x5bc   : > { %v2616_v24 = vsel %vm983_vm10, %v5245_v26, 0.0 }
 0x5bd   : > { %3676 = vpow2.f32 %v2379_v11  ;;  %2617 = vadd.xlane.f32.xlu0 %v2616_v24 }
 0x5be   : > { %3678 = vrcp.f32 %v2175_v50 }
 0x5c3   : > { %v5251_v12 = vpop.eup %3676 }
 0x5c4   : > { %v2402_v58 = vsel %vm983_vm10, %v5251_v12, 0.0  ;;  %v3679_v3 = vpop.eup %3678 }
 0x5c5   : > { %2403 = vadd.xlane.f32.xlu2 %v2402_v58  ;;  %v2197_v51 = vmul.f32 %v3679_v3, %v5093_v18 }
 0x5ce   : > { %v2178_v38 = vpop.xlane.xlu0 %2177 }
 0x5cf   : > { %3680 = vrcp.f32 %v2178_v38 }
 0x5d5   : > { %v3681_v49 = vpop.eup %3680 }
 0x5d6   : > { %v2198_v32 = vmul.f32 %v3681_v49, %v5127_v59 }
 0x5d7   : > { %v1790_v27 = vpop.f32.mrf.mxu0 }
 0x5d8   : > { %v1810_v6 = vadd.f32 %v1790_v27, %v4996_v33  ;;  %v2204_v9 = vpack.c.bf16 %v2198_v32, %v2197_v51 }
 0x5da   : > { %3347 = vmatmul.msk.bf16.gmra.mxu0 %vm983_vm10, %v2204_v9 }
 0x5de   : > { %v2181_v63 = vpop.xlane.xlu1 %2180 }
 0x5df   : > { %v2184_v54 = vpop.xlane.xlu2 %2183  ;;  %3682 = vrcp.f32 %v2181_v63  ;;  %v5264_v39 = vpop.f32.mrf.mxu0 }
 0x5e0   : > { %3684 = vrcp.f32 %v2184_v54  ;;  %v1585_v18 = vpop.f32.mrf.mxu1 }
 0x5e1   : > { %v1596_v42 = vadd.f32 %v1585_v18, %v1374_v44  ;;  %3686 = vrcp.f32 %v1961_v4 }
 0x5e5   : > { %v3683_v59 = vpop.eup %3682 }
 0x5e6   : > { %v3685_v62 = vpop.eup %3684  ;;  %v2199_v40 = vmul.f32 %v3683_v59, %v5144_v60  ;;  %v1964_v5 = vpop.xlane.xlu0 %1963 }
 0x5e7   : > { %v2200_v33 = vmul.f32 %v3685_v62, %v5146_v52  ;;  %v2573_v17 = vpop.xlane.xlu2 %2572  ;;  %3688 = vrcp.f32 %v1964_v5  ;;  %v1795_v13 = vpop.f32.mrf.mxu0 }
 0x5e8   : > { %v2583_v23 = vsub.f32 %v5153_v57, %v2573_v17  ;;  %v1812_v29 = vadd.f32 %v1795_v13, %v5115_v25  ;;  %v3687_v41 = vpop.eup %3686  ;;  %v5273_v52 = vpop.f32.mrf.mxu1 }
 0x5e9   : > { %v2205_v8 = vpack.c.bf16 %v2200_v33, %v2199_v40  ;;  %v1979_v37 = vmul.f32 %v3687_v41, %v5106_v16 }
 0x5ea   : > { %v2597_v2 = vmul.f32 1.442695, %v2583_v23 }
 0x5eb   : > { %3348 = vmatmul.msk.bf16.gmra.mxu0 %vm983_vm10, %v2205_v8 }
 0x5ec   : > { %3690 = vpow2.f32 %v2597_v2 }
 0x5ed   : > { %v3689_v28 = vpop.eup %3688 }
 0x5ee   : > { %v1980_v60 = vmul.f32 %v3689_v28, %v5155_v31  ;;  %v2353_v11 = vpop.xlane.xlu0 %2352 }
 0x5ef   : > { %v2363_v24 = vsub.f32 %v5091_v0, %v2353_v11  ;;  %v1797_v58 = vpop.f32.mrf.mxu0 }
 0x5f0   : > { %v1985_v57 = vpack.c.bf16 %v1980_v60, %v1979_v37  ;;  %v1366_v37 = vadd.f32 %v5118_v34, %v4772_v36 }
 0x5f1   : > { %v2377_v30 = vmul.f32 1.442695, %v2363_v24 }
 0x5f2   : > { %v5276_v25 = vpop.eup %3690  ;;  %3340 = vmatmul.msk.bf16.gmra.mxu1 %vm983_vm10, %v1985_v57 }
 0x5f3   : > { %3692 = vpow2.f32 %v2377_v30  ;;  %v2619_v50 = vsel %vm983_vm10, %v5276_v25, 0.0 }
 0x5f4   : > { %2620 = vadd.xlane.f32.xlu0 %v2619_v50 }
 0x5f6   : > { %v2576_v16 = vpop.xlane.xlu0 %2575 }
 0x5f7   : > { %v2584_v31 = vsub.f32 %v5172_v48, %v2576_v16  ;;  %v2010_v3 = vpop.f32.mrf.mxu1 }
 0x5f8   : > { %v2386_v38 = vpop.xlane.xlu2 %2385  ;;  %v2030_v0 = vadd.f32 %v2010_v3, %v1810_v6 }
 0x5f9   : > { %3694 = vrcp.f32 %v2386_v38  ;;  %v2383_v49 = vpop.xlane.xlu1 %2382  ;;  %v5282_v51 = vpop.eup %3692  ;;  %v2599_v32 = vmul.f32 1.442695, %v2584_v31 }
 0x5fa   : > { %3696 = vrcp.f32 %v2383_v49  ;;  %v1800_v4 = vpop.f32.mrf.mxu0  ;;  %v2399_v9 = vsel %vm983_vm10, %v5282_v51, 0.0 }
 0x5fb   : > { %v1814_v27 = vadd.f32 %v1800_v4, %v5138_v1  ;;  %3698 = vpow2.f32 %v2599_v32  ;;  %2400 = vadd.xlane.f32.xlu1 %v2399_v9 }
 0x5fe   : > { %v2603_v62 = vpop.xlane.xlu0 %2602 }
 0x5ff   : > { %v3695_v63 = vpop.eup %3694  ;;  %3700 = vrcp.f32 %v2603_v62  ;;  %v5294_v5 = vpop.f32.mrf.mxu1 }
 0x600   : > { %v3697_v44 = vpop.eup %3696  ;;  %v2414_v48 = vmul.f32 %v3695_v63, %v5174_v22 }
 0x601   : > { %v2413_v54 = vmul.f32 %v3697_v44, %v5178_v53  ;;  %v5289_v18 = vpop.eup %3698 }
 0x602   : > { %v1802_v6 = vpop.f32.mrf.mxu0  ;;  %v2622_v40 = vsel %vm983_vm10, %v5289_v18, 0.0 }
 0x603   : > { %v2422_v59 = vpack.c.bf16 %v2414_v48, %v2413_v54  ;;  %2623 = vadd.xlane.f32.xlu1 %v2622_v40 }
 0x605   : > { %3353 = vmatmul.msk.bf16.vlgmr.msra.gmra.mxu1 %vm983_vm10, %v2422_v59  ;;  %v3701_v53 = vpop.eup %3700 }
 0x606   : > { %v2633_v13 = vmul.f32 %v3701_v53, %v5184_v43 }
 0x607   : > { %v2606_v1 = vpop.xlane.xlu1 %2605 }
 0x608   : > { %3702 = vrcp.f32 %v2606_v1 }
 0x60a   : > { %v1805_v33 = vpop.f32.mrf.mxu0 }
 0x60b   : > { %v5296_v22 = vadd.f32 %v1805_v33, %v1596_v42  ;;  %v1593_v42 = vadd.f32 %v5122_v20, %v1366_v37 }
 0x60d   : > { %v1813_v11 = vadd.f32 %v1797_v58, %v1593_v42 }
 0x60e   : > { %v3703_v17 = vpop.eup %3702 }
 0x60f   : > { %v2634_v23 = vmul.f32 %v3703_v17, %v5196_v61  ;;  %v2015_v8 = vpop.f32.mrf.mxu1  ;;  %v2392_v60 = vpop.xlane.xlu0 %2391 }
 0x610   : > { %v2032_v41 = vadd.f32 %v2015_v8, %v1812_v29  ;;  %3704 = vrcp.f32 %v2392_v60  ;;  %v2609_v30 = vpop.xlane.xlu1 %2608 }
 0x611   : > { %v2642_v2 = vpack.c.bf16 %v2634_v23, %v2633_v13 }
 0x612   : > { %v5300_v28 = vpop.f32.mrf.mxu0 }
 0x613   : > { %3361 = vmatmul.msk.bf16.vlgmr.msra.gmra.mxu0 %vm983_vm10, %v2642_v2 }
 0x616   : > { %v2389_v24 = vpop.xlane.xlu2 %2388  ;;  %v3705_v29 = vpop.eup %3704 }
 0x617   : > { %3706 = vrcp.f32 %v2389_v24  ;;  %v2017_v43 = vpop.f32.mrf.mxu1  ;;  %v2416_v36 = vmul.f32 %v3705_v29, %v5204_v14 }
 0x618   : > { %v2033_v57 = vadd.f32 %v2017_v43, %v1813_v11  ;;  %3708 = vrcp.f32 %v2609_v30  ;;  %v1376_v43 = vadd.f32 %v5255_v46, %v4800_v47 }
 0x61a   : > { %v2230_v61 = vpop.f32.mrf.mxu0  ;;  %v1597_v29 = vadd.f32 %v5273_v52, %v1376_v43 }
 0x61b   : > { %v5306_v50 = vadd.f32 %v2230_v61, %v2030_v0  ;;  %v1371_v0 = vadd.f32 %v5247_v7, %v4780_v55 }
 0x61d   : > { %v3707_v16 = vpop.eup %3706  ;;  %v1595_v4 = vadd.f32 %v5259_v15, %v1371_v0 }
 0x61e   : > { %v2415_v34 = vmul.f32 %v3707_v16, %v5216_v10  ;;  %v2612_v38 = vpop.xlane.xlu2 %2611  ;;  %v3709_v49 = vpop.eup %3708 }
 0x61f   : > { %3710 = vrcp.f32 %v2612_v38  ;;  %v2635_v14 = vmul.f32 %v3709_v49, %v5206_v45  ;;  %v1815_v63 = vadd.f32 %v1802_v6, %v1595_v4  ;;  %v5657_v4 = vld [vmem:[#allocation13_spill] sm:$0xff] }
 0x620   : > { %v2423_v31 = vpack.c.bf16 %v2416_v36, %v2415_v34  ;;  %v1817_v36 = vadd.f32 %v5300_v28, %v1597_v29  ;;  %v5659_v29 = vld [vmem:[#allocation2_spill] sm:$0xff] }
 0x621   : > { %v2020_v20 = vpop.f32.mrf.mxu1 }
 0x622   : > { %v2034_v58 = vadd.f32 %v2020_v20, %v1814_v27  ;;  %v5310_v3 = vpop.f32.mrf.mxu0  ;;  %3354 = vmatmul.msk.bf16.gmra.mxu1 %vm983_vm10, %v2423_v31 }
 0x625   : > { %v3711_v32 = vpop.eup %3710 }
 0x626   : > { %v2636_v10 = vmul.f32 %v3711_v32, %v5226_v56  ;;  %v2398_v9 = vpop.xlane.xlu1 %2397 }
 0x627   : > { %3712 = vrcp.f32 %v2398_v9 }
 0x628   : > { %v2395_v44 = vpop.xlane.xlu0 %2394  ;;  %v2643_v48 = vpack.c.bf16 %v2636_v10, %v2635_v14  ;;  %v5658_v10 = vld [vmem:[#allocation12_spill] sm:$0xff] }
 0x629   : > { %3714 = vrcp.f32 %v2395_v44  ;;  %v2022_v27 = vpop.f32.mrf.mxu1  ;;  %v2615_v55 = vpop.xlane.xlu2 %2614 }
 0x62a   : > { %v2035_v54 = vadd.f32 %v2022_v27, %v1815_v63  ;;  %v2235_v59 = vpop.f32.mrf.mxu0  ;;  %3362 = vmatmul.msk.bf16.gmra.mxu0 %vm983_vm10, %v2643_v48  ;;  %3716 = vrcp.f32 %v2615_v55 }
 0x62b   : > { %v5318_v62 = vadd.f32 %v2235_v59, %v2032_v41 }
 0x62d   : > { %v3713_v7 = vpop.eup %3712 }
 0x62e   : > { %v2418_v45 = vmul.f32 %v3713_v7, %v5232_v21  ;;  %v2702_v21 = vld [vmem:[%s5571_s8] sm:$0xf] }
 0x62f   : > { %v3715_v15 = vpop.eup %3714 }
 0x630   : > { %v2417_v56 = vmul.f32 %v3715_v15, %v5234_v35  ;;  %v2618_v6 = vpop.xlane.xlu0 %2617  ;;  %v3717_v53 = vpop.eup %3716  ;;  %v2720_v35 = vsel %vm1301_vm13, %v2702_v21, 0  ;;  %vm5679_vm13 = vmmov %vm5660_vm0 }
 0x631   : > { %3718 = vrcp.f32 %v2618_v6  ;;  %v2637_v13 = vmul.f32 %v3717_v53, %v5238_v19  ;;  %2729 = vmatpush.bf16.msra.mxu3 %v2720_v35 }
 0x632   : > { %v2237_v40 = vpop.f32.mrf.mxu0  ;;  %v2424_v1 = vpack.c.bf16 %v2418_v45, %v2417_v56 }
 0x633   : > { %v5323_v33 = vadd.f32 %v2237_v40, %v2033_v57 }
 0x634   : > { %3355 = vmatmul.msk.bf16.gmra.mxu1 %vm983_vm10, %v2424_v1 }
 0x637   : > { %v3719_v17 = vpop.eup %3718 }
 0x638   : > { %v2638_v23 = vmul.f32 %v3719_v17, %v5245_v26  ;;  %v2404_v42 = vpop.xlane.xlu2 %2403 }
 0x639   : > { %3720 = vrcp.f32 %v2404_v42 }
 0x63a   : > { %v2644_v8 = vpack.c.bf16 %v2638_v23, %v2637_v13 }
 0x63c   : > { %3363 = vmatmul.msk.bf16.gmra.mxu0 %vm983_vm10, %v2644_v8 }
 0x63f   : > { %v3721_v30 = vpop.eup %3720 }
 0x640   : > { %v2420_v34 = vmul.f32 %v3721_v30, %v5251_v12 }
 0x657   : > { %v2240_v2 = vpop.f32.mrf.mxu0 }
 0x658   : > { %v2254_v41 = vadd.f32 %v2240_v2, %v2034_v58 }
 0x65f   : > { %v2242_v37 = vpop.f32.mrf.mxu0 }
 0x660   : > { %v2255_v60 = vadd.f32 %v2242_v37, %v2035_v54 }
 0x667   : > { %v2621_v57 = vpop.xlane.xlu0 %2620 }
 0x668   : > { %v2245_v19 = vpop.f32.mrf.mxu0 }
 0x66e   : > { %v2401_v11 = vpop.xlane.xlu1 %2400 }
 0x66f   : > { %3722 = vrcp.f32 %v2401_v11  ;;  %v2025_v26 = vpop.f32.mrf.mxu1 }
 0x670   : > { %v2036_v24 = vadd.f32 %v2025_v26, %v5296_v22  ;;  %3724 = vrcp.f32 %v2621_v57  ;;  %v2247_v49 = vpop.f32.mrf.mxu0 }
 0x672   : > { %v2256_v61 = vadd.f32 %v2245_v19, %v2036_v24 }
 0x675   : > { %v3723_v16 = vpop.eup %3722 }
 0x676   : > { %v2419_v38 = vmul.f32 %v3723_v16, %v5282_v51  ;;  %v2624_v20 = vpop.xlane.xlu1 %2623  ;;  %v3725_v46 = vpop.eup %3724  ;;  %v5656_v51 = vld [vmem:[#allocation14_spill] sm:$0xff] }
 0x677   : > { %3726 = vrcp.f32 %v2624_v20  ;;  %v2027_v31 = vpop.f32.mrf.mxu1  ;;  %v2639_v52 = vmul.f32 %v3725_v46, %v5276_v25  ;;  %v1361_v14 = vadd.f32 %v5657_v4, %v5656_v51 }
 0x678   : > { %v2037_v22 = vadd.f32 %v2027_v31, %v1817_v36  ;;  %v2425_v58 = vpack.c.bf16 %v2420_v34, %v2419_v38  ;;  %v5661_v38 = vld [vmem:[#allocation5_spill] sm:$0xff] }
 0x679   : > { %v1591_v9 = vadd.f32 %v5658_v10, %v1361_v14  ;;  %v5667_v14 = vld [vmem:[#allocation6_spill] sm:$0xff] }
 0x67a   : > { %3356 = vmatmul.msk.bf16.gmra.mxu1 %vm983_vm10, %v2425_v58  ;;  %v2257_v47 = vadd.f32 %v2247_v49, %v2037_v22  ;;  %v5663_v49 = vld [vmem:[#allocation3_spill] sm:$0xff] }
 0x67b   : > { %v1811_v44 = vadd.f32 %v5264_v39, %v1591_v9 }
 0x67d   : > { %v3727_v0 = vpop.eup %3726  ;;  %v2031_v27 = vadd.f32 %v5294_v5, %v1811_v44 }
 0x67e   : > { %v2640_v32 = vmul.f32 %v3727_v0, %v5289_v18 }
 0x67f   : > { %v2251_v54 = vadd.f32 %v5310_v3, %v2031_v27  ;;  %v5669_v27 = vld [vmem:[#allocation7_spill] sm:$0xff] }
 0x680   : > { %v2645_v28 = vpack.c.bf16 %v2640_v32, %v2639_v52  ;;  %v5665_v32 = vld [vmem:[#allocation4_spill] sm:$0xff] }
 0x682   : > { %3364 = vmatmul.msk.bf16.gmra.mxu0 %vm983_vm10, %v2645_v28  ;;  %v2450_v12 = vpop.f32.mrf.mxu1 }
 0x683   : > { %v2470_v25 = vadd.f32 %v2450_v12, %v5306_v50 }
 0x68a   : > { %v2452_v48 = vpop.f32.mrf.mxu1 }
 0x68b   : > { %v2471_v18 = vadd.f32 %v2452_v48, %v2251_v54 }
 0x690   : > { %v2670_v63 = vpop.f32.mrf.mxu0 }
 0x691   : > { %v2690_v55 = vadd.f32 %v2670_v63, %v2470_v25 }
 0x698   : > { %v2672_v59 = vpop.f32.mrf.mxu0 }
 0x699   : > { %v2691_v7 = vadd.f32 %v2672_v59, %v2471_v18  ;;  %v5671_v59 = vld [vmem:[#allocation8_spill] sm:$0xff] }
 0x69b   : > { %v2698_v15 = vpack.c.bf16 %v2691_v7, %v2690_v55 }
 0x69d   : > { %3365 = vmatmul.msk.bf16.vlgmr.msra.gmra.mxu3 %vm983_vm10, %v2698_v15 }
 0x69f   : > { %v2455_v45 = vpop.f32.mrf.mxu1 }
 0x6a0   : > { %v2472_v40 = vadd.f32 %v2455_v45, %v5318_v62  ;;  %v5673_v45 = vld [vmem:[#allocation9_spill] sm:$0xff] }
 0x6a7   : > { %v2675_v56 = vpop.f32.mrf.mxu0  ;;  %v2457_v6 = vpop.f32.mrf.mxu1 }
 0x6a8   : > { %v2473_v39 = vadd.f32 %v2457_v6, %v5323_v33  ;;  %v2692_v1 = vadd.f32 %v2675_v56, %v2472_v40 }
 0x6af   : > { %v2677_v5 = vpop.f32.mrf.mxu0 }
 0x6b0   : > { %v2693_v53 = vadd.f32 %v2677_v5, %v2473_v39 }
 0x6b1   : > { %v2460_v3 = vpop.f32.mrf.mxu1 }
 0x6b2   : > { %v2699_v17 = vpack.c.bf16 %v2693_v53, %v2692_v1  ;;  %v2474_v23 = vadd.f32 %v2460_v3, %v2254_v41  ;;  %v3447_v41 = vld [vmem:[%s5572_s9] ss:$0 sm:$0xff] }
 0x6b4   : > { %3366 = vmatmul.msk.bf16.gmra.mxu3 %vm983_vm10, %v2699_v17  ;;  %v5675_v17 = vld [vmem:[#allocation10_spill] sm:$0xff] }
 0x6b9   : > { %v2680_v50 = vpop.f32.mrf.mxu0  ;;  %v2462_v13 = vpop.f32.mrf.mxu1 }
 0x6ba   : > { %v2475_v21 = vadd.f32 %v2462_v13, %v2255_v60  ;;  %v2694_v35 = vadd.f32 %v2680_v50, %v2474_v23 }
 0x6c1   : > { %v2682_v8 = vpop.f32.mrf.mxu0 }
 0x6c2   : > { %v2695_v2 = vadd.f32 %v2682_v8, %v2475_v21 }
 0x6c4   : > { %v2700_v37 = vpack.c.bf16 %v2695_v2, %v2694_v35 }
 0x6c6   : > { %3367 = vmatmul.msk.bf16.gmra.mxu3 %vm983_vm10, %v2700_v37 }
 0x6f7   : > { %v2465_v62 = vpop.f32.mrf.mxu1 }
 0x6f8   : > { %v2476_v11 = vadd.f32 %v2465_v62, %v2256_v61 }
 0x6ff   : > { %v2685_v42 = vpop.f32.mrf.mxu0  ;;  %v2467_v33 = vpop.f32.mrf.mxu1 }
 0x700   : > { %v2477_v19 = vadd.f32 %v2467_v33, %v2257_v47  ;;  %v2696_v24 = vadd.f32 %v2685_v42, %v2476_v11 }
 0x707   : > { %v2687_v26 = vpop.f32.mrf.mxu0 }
 0x708   : > { %v2697_v43 = vadd.f32 %v2687_v26, %v2477_v19 }
 0x70a   : > { %v2701_v57 = vpack.c.bf16 %v2697_v43, %v2696_v24 }
 0x70c   : > { %3368 = vmatmul.msk.bf16.gmra.mxu3 %vm983_vm10, %v2701_v57  ;;  %vm5677_vm10 = vmmov %vm5660_vm0 }
 0x720   : > { %v2731_v60 = vpop.f32.mrf.mxu3 }
 0x721   : > { %v2732_v30 = vadd.f32 %v3447_v41, %v2731_v60 }
 0x723   : > { %v5361_v16 = vadd.f32 %v2732_v30, %v5659_v29 }
 0x725   : > { %v2761_v36 = vsel %vm5660_vm0, %v5361_v16, 0.0 }
 0x726   : > { %2762 = vadd.xlane.f32.xlu2 %v2761_v36 }
 0x728   : > { %v2733_v61 = vpop.f32.mrf.mxu3 }
 0x729   : > { %v2734_v34 = vadd.f32 %v3447_v41, %v2733_v61 }
 0x72b   : > { %v5366_v20 = vadd.f32 %v2734_v34, %v5661_v38 }
 0x72d   : > { %v2764_v31 = vsel %vm5662_vm6, %v5366_v20, 0.0 }
 0x72e   : > { %2765 = vadd.xlane.f32.xlu0 %v2764_v31 }
 0x737   : > { %v2736_v22 = vpop.f32.mrf.mxu3 }
 0x738   : > { %v2737_v58 = vadd.f32 %v3447_v41, %v2736_v22 }
 0x73a   : > { %v5371_v47 = vadd.f32 %v2737_v58, %v5663_v49 }
 0x73c   : > { %v2767_v46 = vsel %vm5664_vm9, %v5371_v47, 0.0 }
 0x73d   : > { %2768 = vadd.xlane.f32.xlu1 %v2767_v46 }
 0x73f   : > { %v2738_v0 = vpop.f32.mrf.mxu3 }
 0x740   : > { %v2739_v52 = vadd.f32 %v3447_v41, %v2738_v0 }
 0x742   : > { %v5376_v28 = vadd.f32 %v2739_v52, %v5665_v32 }
 0x744   : > { %v2770_v12 = vsel %vm5666_vm12, %v5376_v28, 0.0 }
 0x745   : > { %2771 = vadd.xlane.f32.xlu2 %v2770_v12 }
 0x749   : > { %v2741_v51 = vpop.f32.mrf.mxu3 }
 0x74a   : > { %v2742_v4 = vadd.f32 %v3447_v41, %v2741_v51 }
 0x74c   : > { %v5381_v10 = vadd.f32 %v2742_v4, %v5667_v14 }
 0x74e   : > { %v2773_v9 = vsel %vm5668_vm3, %v5381_v10, 0.0 }
 0x74f   : > { %2774 = vadd.xlane.f32.xlu0 %v2773_v9  ;;  %v3412_v9 = vld [vmem:[%s5575_s12 + $0x8] sm:$0xff] }
 0x750   : > { %3001 = vmatpush.bf16.msrb.mxu1 %v3412_v9 }
 0x751   : > { %v2743_v63 = vpop.f32.mrf.mxu3 }
 0x752   : > { %v2744_v44 = vadd.f32 %v3447_v41, %v2743_v63 }
 0x754   : > { %v5386_v48 = vadd.f32 %v2744_v44, %v5669_v27 }
 0x756   : > { %v2776_v54 = vsel %vm5670_vm4, %v5386_v48, 0.0 }
 0x757   : > { %2777 = vadd.xlane.f32.xlu1 %v2776_v54 }
 0x78f   : > { %v2746_v25 = vpop.f32.mrf.mxu3 }
 0x790   : > { %v2747_v18 = vadd.f32 %v3447_v41, %v2746_v25 }
 0x792   : > { %v5391_v55 = vadd.f32 %v2747_v18, %v5671_v59  ;;  %v3411_v59 = vld [vmem:[%s5575_s12] sm:$0xff] }
 0x793   : > { %3002 = vmatpush.bf16.msrb.mxu1 %v3411_v59 }
 0x794   : > { %v2779_v7 = vsel %vm5672_vm5, %v5391_v55, 0.0  ;;  %vm5684_vm5 = vmmov %vm5681_vm1 }
 0x795   : > { %2780 = vadd.xlane.f32.xlu1 %v2779_v7 }
 0x797   : > { %v2748_v40 = vpop.f32.mrf.mxu3 }
 0x798   : > { %v2749_v5 = vadd.f32 %v3447_v41, %v2748_v40 }
 0x799   : > { %v2763_v15 = vpop.xlane.xlu2 %2762 }
 0x79a   : > { %v2785_v56 = vmul.f32 %v2763_v15, %v5673_v45  ;;  %v5404_v50 = vadd.f32 %v2749_v5, %v5675_v17 }
 0x79c   : > { %v5397_v6 = vsub.f32 %v5361_v16, %v2785_v56  ;;  %v2782_v21 = vsel %vm5676_vm8, %v5404_v50, 0.0 }
 0x79e   : > { %v2801_v39 = vmul.f32 %v5397_v6, %v5397_v6 }
 0x7a0   : > { %v2809_v1 = vsel %vm5674_vm7, %v2801_v39, 0.0 }
 0x7a1   : > { %2810 = vadd.xlane.f32.xlu2 %v2809_v1  ;;  %v2766_v53 = vpop.xlane.xlu0 %2765 }
 0x7a2   : > { %v2786_v3 = vmul.f32 %v2766_v53, %v5673_v45 }
 0x7a4   : > { %v5407_v13 = vsub.f32 %v5366_v20, %v2786_v3 }
 0x7a6   : > { %v2802_v23 = vmul.f32 %v5407_v13, %v5407_v13 }
 0x7a8   : > { %v2812_v8 = vsel %vm5677_vm10, %v2802_v23, 0.0 }
 0x7a9   : > { %2783 = vadd.xlane.f32.xlu2 %v2782_v21  ;;  %2813 = vadd.xlane.f32.xlu0 %v2812_v8  ;;  %v5468_v8 = vld [vmem:[%s5573_s10] ss:$0 sm:$0xff] }
 0x7b0   : > { %v2769_v35 = vpop.xlane.xlu1 %2768 }
 0x7b1   : > { %v2787_v2 = vmul.f32 %v2769_v35, %v5673_v45 }
 0x7b3   : > { %v5416_v37 = vsub.f32 %v5371_v47, %v2787_v2 }
 0x7b5   : > { %v2803_v62 = vmul.f32 %v5416_v37, %v5416_v37 }
 0x7b7   : > { %v2815_v42 = vsel %vm5678_vm11, %v2803_v62, 0.0 }
 0x7b8   : > { %v2772_v33 = vpop.xlane.xlu2 %2771  ;;  %2816 = vadd.xlane.f32.xlu0 %v2815_v42 }
 0x7b9   : > { %v2788_v11 = vmul.f32 %v2772_v33, %v5673_v45  ;;  %v5474_v33 = vld [vmem:[%s5574_s11] ss:$0 sm:$0xff] }
 0x7bb   : > { %v5423_v19 = vsub.f32 %v5376_v28, %v2788_v11 }
 0x7bd   : > { %v2804_v26 = vmul.f32 %v5423_v19, %v5423_v19 }
 0x7bf   : > { %v2818_v24 = vsel %vm5679_vm13, %v2804_v26, 0.0 }
 0x7c0   : > { %2819 = vadd.xlane.f32.xlu1 %v2818_v24 }
 0x7c2   : > { %v2775_v43 = vpop.xlane.xlu0 %2774 }
 0x7c3   : > { %v2789_v57 = vmul.f32 %v2775_v43, %v5673_v45 }
 0x7c5   : > { %v5430_v41 = vsub.f32 %v5381_v10, %v2789_v57 }
 0x7c7   : > { %v2805_v60 = vmul.f32 %v5430_v41, %v5430_v41 }
 0x7c9   : > { %v2821_v30 = vsel %vm5680_vm14, %v2805_v60, 0.0 }
 0x7ca   : > { %v2778_v29 = vpop.xlane.xlu1 %2777  ;;  %2822 = vadd.xlane.f32.xlu2 %v2821_v30 }
 0x7cb   : > { %v2790_v36 = vmul.f32 %v2778_v29, %v5673_v45 }
 0x7cd   : > { %v5437_v61 = vsub.f32 %v5386_v48, %v2790_v36 }
 0x7cf   : > { %v2806_v34 = vmul.f32 %v5437_v61, %v5437_v61 }
 0x7d1   : > { %v2824_v38 = vsel %vm5681_vm1, %v2806_v34, 0.0 }
 0x7d2   : > { %2825 = vadd.xlane.f32.xlu0 %v2824_v38 }
 0x808   : > { %v2781_v31 = vpop.xlane.xlu1 %2780 }
 0x809   : > { %v2791_v22 = vmul.f32 %v2781_v31, %v5673_v45 }
 0x80b   : > { %v5444_v58 = vsub.f32 %v5391_v55, %v2791_v22 }
 0x80d   : > { %v2807_v49 = vmul.f32 %v5444_v58, %v5444_v58 }
 0x80f   : > { %v2827_v46 = vsel %vm5682_vm15, %v2807_v49, 0.0 }
 0x810   : > { %2828 = vadd.xlane.f32.xlu1 %v2827_v46 }
 0x814   : > { %v2811_v0 = vpop.xlane.xlu2 %2810 }
 0x815   : > { %v2833_v52 = vmul.f32 %v2811_v0, %v5673_v45 }
 0x817   : > { %v2841_v32 = vadd.f32 1e-05, %v2833_v52 }
 0x819   : > { %3728 = vrsqrt.f32 %v2841_v32  ;;  %vm2855_vm6 = vweird.f32 %v2841_v32 }
 0x81c   : > { %v2784_v12 = vpop.xlane.xlu2 %2783  ;;  %v2814_v51 = vpop.xlane.xlu0 %2813 }
 0x81d   : > { %v2792_v4 = vmul.f32 %v2784_v12, %v5673_v45  ;;  %v2834_v14 = vmul.f32 %v2814_v51, %v5673_v45 }
 0x81f   : > { %v3729_v63 = vpop.eup %3728  ;;  %v5456_v44 = vsub.f32 %v5404_v50, %v2792_v4  ;;  %v2842_v27 = vadd.f32 1e-05, %v2834_v14 }
 0x820   : > { %v2850_v54 = vmul.f32 %v3729_v63, %v2841_v32  ;;  %vm2856_vm0 = vweird.f32 %v3729_v63 }
 0x821   : > { %3730 = vrsqrt.f32 %v2842_v27  ;;  %v2808_v25 = vmul.f32 %v5456_v44, %v5456_v44  ;;  %vm2857_vm9 = vmor %vm2855_vm6, %vm2856_vm0  ;;  %vm2865_vm3 = vweird.f32 %v2842_v27 }
 0x822   : > { %v2851_v18 = vmul.f32 %v3729_v63, %v2850_v54 }
 0x823   : > { %v2830_v7 = vsel %vm5683_vm2, %v2808_v25, 0.0 }
 0x824   : > { %v2852_v15 = vmul.f32 0.5, %v2851_v18  ;;  %2831 = vadd.xlane.f32.xlu2 %v2830_v7 }
 0x826   : > { %v2853_v56 = vsub.f32 1.5, %v2852_v15 }
 0x827   : > { %v3731_v40 = vpop.eup %3730 }
 0x828   : > { %v2854_v39 = vmul.f32 %v3729_v63, %v2853_v56  ;;  %v2860_v5 = vmul.f32 %v3731_v40, %v2842_v27  ;;  %vm2866_vm12 = vweird.f32 %v3731_v40 }
 0x829   : > { %vm2867_vm4 = vmor %vm2865_vm3, %vm2866_vm12 }
 0x82a   : > { %v2861_v1 = vmul.f32 %v3731_v40, %v2860_v5  ;;  %v2858_v53 = vsel %vm2857_vm9, %v3729_v63, %v2854_v39  ;;  %vm5685_vm3 = vmmov %vm5683_vm2 }
 0x82b   : > { %v2817_v17 = vpop.xlane.xlu0 %2816  ;;  %v2929_v35 = vmul.f32 %v2858_v53, %v5397_v6 }
 0x82c   : > { %v2862_v3 = vmul.f32 0.5, %v2861_v1  ;;  %v2835_v23 = vmul.f32 %v2817_v17, %v5673_v45 }
 0x82d   : > { %v2940_v11 = vmul.f32 %v5468_v8, %v2929_v35 }
 0x82e   : > { %v2863_v21 = vsub.f32 1.5, %v2862_v3  ;;  %v2843_v2 = vadd.f32 1e-05, %v2835_v23 }
 0x82f   : > { %v2951_v60 = vadd.f32 %v5474_v33, %v2940_v11 }
 0x830   : > { %v2864_v62 = vmul.f32 %v3731_v40, %v2863_v21  ;;  %3732 = vrsqrt.f32 %v2843_v2  ;;  %vm2875_vm8 = vweird.f32 %v2843_v2 }
 0x832   : > { %v2868_v42 = vsel %vm2867_vm4, %v3731_v40, %v2864_v62 }
 0x833   : > { %v2930_v26 = vmul.f32 %v2868_v42, %v5407_v13  ;;  %v2820_v24 = vpop.xlane.xlu1 %2819 }
 0x834   : > { %v2836_v6 = vmul.f32 %v2820_v24, %v5673_v45 }
 0x835   : > { %v2941_v43 = vmul.f32 %v5468_v8, %v2930_v26 }
 0x836   : > { %v3733_v57 = vpop.eup %3732  ;;  %v2844_v29 = vadd.f32 1e-05, %v2836_v6 }
 0x837   : > { %v2952_v30 = vadd.f32 %v5474_v33, %v2941_v43  ;;  %v2870_v36 = vmul.f32 %v3733_v57, %v2843_v2  ;;  %vm2876_vm7 = vweird.f32 %v3733_v57 }
 0x838   : > { %3734 = vrsqrt.f32 %v2844_v29  ;;  %vm2877_vm10 = vmor %vm2875_vm8, %vm2876_vm7  ;;  %vm2885_vm13 = vweird.f32 %v2844_v29 }
 0x839   : > { %v2959_v34 = vpack.c.bf16 %v2952_v30, %v2951_v60  ;;  %v2871_v38 = vmul.f32 %v3733_v57, %v2870_v36 }
 0x83b   : > { %3377 = vmatmul.msk.bf16.vlgmr.msrb.gmra.mxu1 %vm5684_vm5, %v2959_v34  ;;  %v2872_v31 = vmul.f32 0.5, %v2871_v38 }
 0x83d   : > { %v2823_v22 = vpop.xlane.xlu2 %2822  ;;  %v2873_v13 = vsub.f32 1.5, %v2872_v31 }
 0x83e   : > { %v2837_v49 = vmul.f32 %v2823_v22, %v5673_v45  ;;  %v3735_v46 = vpop.eup %3734 }
 0x83f   : > { %v2874_v0 = vmul.f32 %v3733_v57, %v2873_v13  ;;  %v2880_v52 = vmul.f32 %v3735_v46, %v2844_v29  ;;  %vm2886_vm11 = vweird.f32 %v3735_v46 }
 0x840   : > { %v2845_v32 = vadd.f32 1e-05, %v2837_v49  ;;  %vm2887_vm14 = vmor %vm2885_vm13, %vm2886_vm11 }
 0x841   : > { %v2881_v12 = vmul.f32 %v3735_v46, %v2880_v52  ;;  %v2878_v51 = vsel %vm2877_vm10, %v3733_v57, %v2874_v0  ;;  %vm5686_vm13 = vmmov %vm5683_vm2 }
 0x842   : > { %3736 = vrsqrt.f32 %v2845_v32  ;;  %v2931_v27 = vmul.f32 %v2878_v51, %v5416_v37  ;;  %vm2895_vm15 = vweird.f32 %v2845_v32 }
 0x843   : > { %v2882_v4 = vmul.f32 0.5, %v2881_v12 }
 0x844   : > { %v2942_v40 = vmul.f32 %v5468_v8, %v2931_v27 }
 0x845   : > { %v2826_v14 = vpop.xlane.xlu0 %2825  ;;  %v2883_v9 = vsub.f32 1.5, %v2882_v4 }
 0x846   : > { %v2838_v63 = vmul.f32 %v2826_v14, %v5673_v45  ;;  %v2953_v53 = vadd.f32 %v5474_v33, %v2942_v40 }
 0x847   : > { %v2884_v25 = vmul.f32 %v3735_v46, %v2883_v9 }
 0x848   : > { %v3737_v54 = vpop.eup %3736  ;;  %v2846_v18 = vadd.f32 1e-05, %v2838_v63 }
 0x849   : > { %v2890_v59 = vmul.f32 %v3737_v54, %v2845_v32  ;;  %v2888_v7 = vsel %vm2887_vm14, %v3735_v46, %v2884_v25  ;;  %vm2896_vm1 = vweird.f32 %v3737_v54  ;;  %vm3136_vm14 = vcmask 523264  }
 0x84a   : > { %3738 = vrsqrt.f32 %v2846_v18  ;;  %v2932_v15 = vmul.f32 %v2888_v7, %v5423_v19  ;;  %vm2897_vm0 = vmor %vm2895_vm15, %vm2896_vm1  ;;  %vm2905_vm9 = vweird.f32 %v2846_v18 }
 0x84b   : > { %v2891_v56 = vmul.f32 %v3737_v54, %v2890_v59  ;;  %vm5687_vm1 = vmmov %vm5683_vm2 }
 0x84c   : > { %v2943_v5 = vmul.f32 %v5468_v8, %v2932_v15  ;;  %v5510_v15 = vld [vmem:[%s5576_s13] ss:$0 sm:$0xff]  ;;  %vm5688_vm15 = vmmov %vm5687_vm1 }
 0x84d   : > { %v2892_v39 = vmul.f32 0.5, %v2891_v56 }
 0x84e   : > { %v2954_v37 = vadd.f32 %v5474_v33, %v2943_v5 }
 0x84f   : > { %v2893_v1 = vsub.f32 1.5, %v2892_v39  ;;  %v3414_v39 = vld [vmem:[%s5577_s14 + $0x8] sm:$0xff] }
 0x850   : > { %v3739_v3 = vpop.eup %3738  ;;  %v2960_v21 = vpack.c.bf16 %v2954_v37, %v2953_v53 }
 0x851   : > { %v2894_v17 = vmul.f32 %v3737_v54, %v2893_v1  ;;  %v2900_v23 = vmul.f32 %v3739_v3, %v2846_v18  ;;  %vm2906_vm6 = vweird.f32 %v3739_v3 }
 0x852   : > { %3378 = vmatmul.msk.bf16.gmra.mxu1 %vm5683_vm2, %v2960_v21  ;;  %vm2907_vm12 = vmor %vm2905_vm9, %vm2906_vm6 }
 0x853   : > { %v2901_v35 = vmul.f32 %v3739_v3, %v2900_v23  ;;  %v2898_v19 = vsel %vm2897_vm0, %v3737_v54, %v2894_v17  ;;  %vm5689_vm2 = vmmov %vm5687_vm1 }
 0x854   : > { %v2933_v42 = vmul.f32 %v2898_v19, %v5430_v41  ;;  %vm5690_vm0 = vmmov %vm5687_vm1 }
 0x855   : > { %v2902_v2 = vmul.f32 0.5, %v2901_v35  ;;  %vm5691_vm6 = vmmov %vm5690_vm0 }
 0x856   : > { %v2944_v43 = vmul.f32 %v5468_v8, %v2933_v42  ;;  %vm5692_vm9 = vmmov %vm5690_vm0 }
 0x857   : > { %v2903_v62 = vsub.f32 1.5, %v2902_v2 }
 0x858   : > { %v2955_v57 = vadd.f32 %v5474_v33, %v2944_v43 }
 0x859   : > { %v2904_v11 = vmul.f32 %v3739_v3, %v2903_v62 }
 0x85b   : > { %v2908_v26 = vsel %vm2907_vm12, %v3739_v3, %v2904_v11  ;;  %v3413_v3 = vld [vmem:[%s5577_s14] sm:$0xff]  ;;  %vm5693_vm12 = vmmov %vm5690_vm0 }
 0x85c   : > { %v2934_v24 = vmul.f32 %v2908_v26, %v5437_v61 }
 0x85e   : > { %v2945_v6 = vmul.f32 %v5468_v8, %v2934_v24 }
 0x860   : > { %v2956_v60 = vadd.f32 %v5474_v33, %v2945_v6 }
 0x862   : > { %v2961_v30 = vpack.c.bf16 %v2956_v60, %v2955_v57 }
 0x864   : > { %3379 = vmatmul.msk.bf16.gmra.mxu1 %vm5685_vm3, %v2961_v30  ;;  %vm5694_vm3 = vmmov %vm5690_vm0 }
 0x883   : > { %v2829_v29 = vpop.xlane.xlu1 %2828 }
 0x884   : > { %v2839_v41 = vmul.f32 %v2829_v29, %v5673_v45 }
 0x886   : > { %v2847_v36 = vadd.f32 1e-05, %v2839_v41 }
 0x888   : > { %3740 = vrsqrt.f32 %v2847_v36  ;;  %vm2915_vm5 = vweird.f32 %v2847_v36 }
 0x88e   : > { %v3741_v34 = vpop.eup %3740 }
 0x88f   : > { %v2910_v38 = vmul.f32 %v3741_v34, %v2847_v36  ;;  %vm2916_vm4 = vweird.f32 %v3741_v34 }
 0x890   : > { %vm2917_vm7 = vmor %vm2915_vm5, %vm2916_vm4 }
 0x891   : > { %v2911_v31 = vmul.f32 %v3741_v34, %v2910_v38 }
 0x893   : > { %v2912_v49 = vmul.f32 0.5, %v2911_v31 }
 0x895   : > { %v2913_v46 = vsub.f32 1.5, %v2912_v49 }
 0x897   : > { %v2832_v61 = vpop.xlane.xlu2 %2831  ;;  %v2914_v52 = vmul.f32 %v3741_v34, %v2913_v46 }
 0x898   : > { %v2840_v22 = vmul.f32 %v2832_v61, %v5673_v45 }
 0x899   : > { %v2918_v51 = vsel %vm2917_vm7, %v3741_v34, %v2914_v52 }
 0x89a   : > { %v2848_v13 = vadd.f32 1e-05, %v2840_v22  ;;  %v2935_v9 = vmul.f32 %v2918_v51, %v5444_v58  ;;  %v3416_v58 = vld [vmem:[%s5577_s14 + $0x18] sm:$0xff] }
 0x89b   : > { %3153 = vmatpush.bf16.msrb.mxu2 %v3416_v58 }
 0x89c   : > { %3742 = vrsqrt.f32 %v2848_v13  ;;  %vm2925_vm10 = vweird.f32 %v2848_v13  ;;  %v2946_v54 = vmul.f32 %v5468_v8, %v2935_v9 }
 0x89e   : > { %v2957_v18 = vadd.f32 %v5474_v33, %v2946_v54 }
 0x8a2   : > { %v3743_v0 = vpop.eup %3742 }
 0x8a3   : > { %v2920_v32 = vmul.f32 %v3743_v0, %v2848_v13  ;;  %vm2926_vm8 = vweird.f32 %v3743_v0 }
 0x8a4   : > { %vm2927_vm11 = vmor %vm2925_vm10, %vm2926_vm8 }
 0x8a5   : > { %v2921_v12 = vmul.f32 %v3743_v0, %v2920_v32 }
 0x8a7   : > { %v2922_v4 = vmul.f32 0.5, %v2921_v12 }
 0x8a9   : > { %v2923_v14 = vsub.f32 1.5, %v2922_v4 }
 0x8ab   : > { %v2924_v63 = vmul.f32 %v3743_v0, %v2923_v14 }
 0x8ad   : > { %v2928_v45 = vsel %vm2927_vm11, %v3743_v0, %v2924_v63 }
 0x8ae   : > { %v2936_v27 = vmul.f32 %v2928_v45, %v5456_v44 }
 0x8b0   : > { %v2947_v25 = vmul.f32 %v5468_v8, %v2936_v27  ;;  %v3415_v8 = vld [vmem:[%s5577_s14 + $0x10] sm:$0xff] }
 0x8b1   : > { %3154 = vmatpush.bf16.msrb.mxu2 %v3415_v8 }
 0x8b2   : > { %v2958_v59 = vadd.f32 %v5474_v33, %v2947_v25 }
 0x8b4   : > { %v2962_v7 = vpack.c.bf16 %v2958_v59, %v2957_v18 }
 0x8b5   : > { %3155 = vmatpush.bf16.msrb.mxu2 %v3414_v39 }
 0x8b6   : > { %3380 = vmatmul.msk.bf16.gmra.mxu1 %vm5686_vm13, %v2962_v7 }
 0x8b8   : > { %v3004_v44 = vpop.f32.mrf.mxu1 }
 0x8b9   : > { %v3005_v33 = vadd.f32 %v5510_v15, %v3004_v44  ;;  %3156 = vmatpush.bf16.msrb.mxu2 %v3413_v3 }
 0x8bb   : > { %v3032_v56 = vmul.f32 %v3005_v33, %v3005_v33  ;;  %v3024_v6 = vmul.f32 0.5, %v3005_v33 }
 0x8bd   : > { %v3040_v40 = vmul.f32 %v3032_v56, %v3005_v33 }
 0x8bf   : > { %v3048_v5 = vmul.f32 0.044715, %v3040_v40 }
 0x8c0   : > { %v3006_v1 = vpop.f32.mrf.mxu1 }
 0x8c1   : > { %v3056_v53 = vadd.f32 %v3048_v5, %v3005_v33  ;;  %v3007_v37 = vadd.f32 %v5510_v15, %v3006_v1 }
 0x8c3   : > { %v3033_v17 = vmul.f32 %v3007_v37, %v3007_v37  ;;  %v3064_v23 = vmul.f32 0.7978846, %v3056_v53  ;;  %v3025_v57 = vmul.f32 0.5, %v3007_v37 }
 0x8c5   : > { %v3041_v21 = vmul.f32 %v3033_v17, %v3007_v37  ;;  %3744 = vtanh.f32 %v3064_v23 }
 0x8c7   : > { %v3049_v35 = vmul.f32 0.044715, %v3041_v21 }
 0x8c9   : > { %v3057_v19 = vadd.f32 %v3049_v35, %v3007_v37 }
 0x8cb   : > { %v3065_v2 = vmul.f32 0.7978846, %v3057_v19  ;;  %v3745_v62 = vpop.eup %3744 }
 0x8cc   : > { %v3080_v26 = vadd.f32 1.0, %v3745_v62 }
 0x8cd   : > { %3746 = vtanh.f32 %v3065_v2 }
 0x8ce   : > { %v3088_v29 = vmul.f32 %v3080_v26, %v3024_v6 }
 0x8cf   : > { %v3009_v42 = vpop.f32.mrf.mxu1 }
 0x8d0   : > { %v3010_v11 = vadd.f32 %v5510_v15, %v3009_v42 }
 0x8d2   : > { %v3034_v43 = vmul.f32 %v3010_v11, %v3010_v11  ;;  %v3026_v18 = vmul.f32 0.5, %v3010_v11 }
 0x8d3   : > { %v3747_v24 = vpop.eup %3746 }
 0x8d4   : > { %v3081_v60 = vadd.f32 1.0, %v3747_v24  ;;  %v3042_v30 = vmul.f32 %v3034_v43, %v3010_v11 }
 0x8d6   : > { %v3089_v41 = vmul.f32 %v3081_v60, %v3025_v57  ;;  %v3050_v36 = vmul.f32 0.044715, %v3042_v30 }
 0x8d7   : > { %v3011_v38 = vpop.f32.mrf.mxu1 }
 0x8d8   : > { %v3096_v34 = vpack.c.bf16 %v3089_v41, %v3088_v29  ;;  %v3058_v31 = vadd.f32 %v3050_v36, %v3010_v11  ;;  %v3012_v61 = vadd.f32 %v5510_v15, %v3011_v38 }
 0x8da   : > { %3397 = vmatmul.msk.bf16.vlgmr.msrb.gmra.mxu2 %vm3136_vm14, %v3096_v34  ;;  %v3035_v22 = vmul.f32 %v3012_v61, %v3012_v61  ;;  %v3066_v13 = vmul.f32 0.7978846, %v3058_v31  ;;  %v3027_v59 = vmul.f32 0.5, %v3012_v61 }
 0x8dc   : > { %v3043_v49 = vmul.f32 %v3035_v22, %v3012_v61  ;;  %3748 = vtanh.f32 %v3066_v13 }
 0x8de   : > { %v3051_v46 = vmul.f32 0.044715, %v3043_v49 }
 0x8e0   : > { %v3059_v0 = vadd.f32 %v3051_v46, %v3012_v61 }
 0x8e1   : > { %v3014_v52 = vpop.f32.mrf.mxu1 }
 0x8e2   : > { %v3015_v32 = vadd.f32 %v5510_v15, %v3014_v52  ;;  %v3067_v12 = vmul.f32 0.7978846, %v3059_v0  ;;  %v3749_v14 = vpop.eup %3748 }
 0x8e3   : > { %v3082_v45 = vadd.f32 1.0, %v3749_v14 }
 0x8e4   : > { %v3036_v51 = vmul.f32 %v3015_v32, %v3015_v32  ;;  %3750 = vtanh.f32 %v3067_v12  ;;  %v3028_v17 = vmul.f32 0.5, %v3015_v32 }
 0x8e5   : > { %v3090_v33 = vmul.f32 %v3082_v45, %v3026_v18 }
 0x8e6   : > { %v3044_v4 = vmul.f32 %v3036_v51, %v3015_v32 }
 0x8e8   : > { %v3052_v9 = vmul.f32 0.044715, %v3044_v4 }
 0x8e9   : > { %v3016_v63 = vpop.f32.mrf.mxu1 }
 0x8ea   : > { %v3060_v27 = vadd.f32 %v3052_v9, %v3015_v32  ;;  %v3017_v54 = vadd.f32 %v5510_v15, %v3016_v63  ;;  %v3751_v25 = vpop.eup %3750 }
 0x8eb   : > { %v3083_v7 = vadd.f32 1.0, %v3751_v25 }
 0x8ec   : > { %v3037_v58 = vmul.f32 %v3017_v54, %v3017_v54  ;;  %v3068_v44 = vmul.f32 0.7978846, %v3060_v27  ;;  %v3029_v23 = vmul.f32 0.5, %v3017_v54 }
 0x8ed   : > { %v3091_v56 = vmul.f32 %v3083_v7, %v3027_v59 }
 0x8ee   : > { %v3045_v8 = vmul.f32 %v3037_v58, %v3017_v54  ;;  %3752 = vtanh.f32 %v3068_v44 }
 0x8ef   : > { %v3097_v39 = vpack.c.bf16 %v3091_v56, %v3090_v33 }
 0x8f0   : > { %v3053_v40 = vmul.f32 0.044715, %v3045_v8 }
 0x8f1   : > { %3398 = vmatmul.msk.bf16.gmra.mxu2 %vm3136_vm14, %v3097_v39 }
 0x8f2   : > { %v3061_v5 = vadd.f32 %v3053_v40, %v3017_v54 }
 0x8f4   : > { %v3069_v1 = vmul.f32 0.7978846, %v3061_v5  ;;  %v3753_v53 = vpop.eup %3752 }
 0x8f5   : > { %v3084_v37 = vadd.f32 1.0, %v3753_v53 }
 0x8f6   : > { %3754 = vtanh.f32 %v3069_v1 }
 0x8f7   : > { %v3092_v35 = vmul.f32 %v3084_v37, %v3028_v17 }
 0x8fc   : > { %v3755_v3 = vpop.eup %3754 }
 0x8fd   : > { %v3085_v21 = vadd.f32 1.0, %v3755_v3 }
 0x8ff   : > { %v3093_v19 = vmul.f32 %v3085_v21, %v3029_v23 }
 0x901   : > { %v3098_v2 = vpack.c.bf16 %v3093_v19, %v3092_v35 }
 0x903   : > { %3399 = vmatmul.msk.bf16.gmra.mxu2 %vm3136_vm14, %v3098_v2 }
 0x933   : > { %v3019_v62 = vpop.f32.mrf.mxu1 }
 0x934   : > { %v3020_v42 = vadd.f32 %v5510_v15, %v3019_v62 }
 0x936   : > { %v3038_v11 = vmul.f32 %v3020_v42, %v3020_v42  ;;  %v3030_v22 = vmul.f32 0.5, %v3020_v42 }
 0x938   : > { %v3046_v26 = vmul.f32 %v3038_v11, %v3020_v42 }
 0x93a   : > { %v3054_v24 = vmul.f32 0.044715, %v3046_v26 }
 0x93b   : > { %v3021_v43 = vpop.f32.mrf.mxu1 }
 0x93c   : > { %v3062_v6 = vadd.f32 %v3054_v24, %v3020_v42  ;;  %v3022_v57 = vadd.f32 %v5510_v15, %v3021_v43  ;;  %v3451_v15 = vld [vmem:[%s5578_s15] ss:$0 sm:$0xff] }
 0x93e   : > { %v3039_v60 = vmul.f32 %v3022_v57, %v3022_v57  ;;  %v3070_v30 = vmul.f32 0.7978846, %v3062_v6  ;;  %v3031_v13 = vmul.f32 0.5, %v3022_v57 }
 0x940   : > { %v3047_v29 = vmul.f32 %v3039_v60, %v3022_v57  ;;  %3756 = vtanh.f32 %v3070_v30 }
 0x942   : > { %v3055_v41 = vmul.f32 0.044715, %v3047_v29 }
 0x944   : > { %v3063_v36 = vadd.f32 %v3055_v41, %v3022_v57 }
 0x946   : > { %v3071_v34 = vmul.f32 0.7978846, %v3063_v36  ;;  %v3757_v38 = vpop.eup %3756 }
 0x947   : > { %v3086_v31 = vadd.f32 1.0, %v3757_v38 }
 0x948   : > { %3758 = vtanh.f32 %v3071_v34 }
 0x949   : > { %v3094_v46 = vmul.f32 %v3086_v31, %v3030_v22 }
 0x94e   : > { %v3759_v61 = vpop.eup %3758 }
 0x94f   : > { %v3087_v49 = vadd.f32 1.0, %v3759_v61 }
 0x951   : > { %v3095_v0 = vmul.f32 %v3087_v49, %v3031_v13 }
 0x953   : > { %v3099_v52 = vpack.c.bf16 %v3095_v0, %v3094_v46 }
 0x955   : > { %3400 = vmatmul.msk.bf16.gmra.mxu2 %vm3136_vm14, %v3099_v52 }
 0x95d   : > { %v3158_v32 = vpop.f32.mrf.mxu2 }
 0x95e   : > { %v3159_v12 = vadd.f32 %v3451_v15, %v3158_v32 }
 0x960   : > { %v3178_v51 = vadd.f32 %v3159_v12, %v5361_v16 }
 0x962   : > { %3186 = vst.msk [vmem:[%s538_s26] sm:$0xff] %vm5687_vm1, %v3178_v51 }
 0x965   : > { %v3160_v4 = vpop.f32.mrf.mxu2 }
 0x966   : > { %v3161_v14 = vadd.f32 %v3451_v15, %v3160_v4 }
 0x968   : > { %v3179_v9 = vadd.f32 %v3161_v14, %v5366_v20 }
 0x96a   : > { %3187 = vst.msk [vmem:[%s538_s26 + $0x8] sm:$0xff] %vm5688_vm15, %v3179_v9 }
 0x974   : > { %v3163_v63 = vpop.f32.mrf.mxu2 }
 0x975   : > { %v3164_v45 = vadd.f32 %v3451_v15, %v3163_v63 }
 0x977   : > { %v3180_v27 = vadd.f32 %v3164_v45, %v5371_v47 }
 0x979   : > { %3188 = vst.msk [vmem:[%s538_s26 + $0x10] sm:$0xff] %vm5689_vm2, %v3180_v27 }
 0x97c   : > { %v3165_v54 = vpop.f32.mrf.mxu2 }
 0x97d   : > { %v3166_v25 = vadd.f32 %v3451_v15, %v3165_v54 }
 0x97f   : > { %v3181_v18 = vadd.f32 %v3166_v25, %v5376_v28 }
 0x981   : > { %3189 = vst.msk [vmem:[%s538_s26 + $0x18] sm:$0xff] %vm5690_vm0, %v3181_v18 }
 0x986   : > { %v3168_v16 = vpop.f32.mrf.mxu2 }
 0x987   : > { %v3169_v59 = vadd.f32 %v3451_v15, %v3168_v16 }
 0x989   : > { %v3182_v7 = vadd.f32 %v3169_v59, %v5381_v10 }
 0x98b   : > { %3190 = vst.msk [vmem:[%s538_s26 + $0x20] sm:$0xff] %vm5691_vm6, %v3182_v7 }
 0x98e   : > { %v3170_v20 = vpop.f32.mrf.mxu2 }
 0x98f   : > { %v3171_v58 = vadd.f32 %v3451_v15, %v3170_v20 }
 0x991   : > { %v3183_v44 = vadd.f32 %v3171_v58, %v5386_v48 }
 0x993   : > { %3191 = vst.msk [vmem:[%s538_s26 + $0x28] sm:$0xff] %vm5692_vm9, %v3183_v44 }
 0x9d8   : > { %v3173_v47 = vpop.f32.mrf.mxu2 }
 0x9d9   : > { %v3174_v8 = vadd.f32 %v3451_v15, %v3173_v47 }
 0x9db   : > { %v3184_v33 = vadd.f32 %v3174_v8, %v5391_v55 }
 0x9dd   : > { %3192 = vst.msk [vmem:[%s538_s26 + $0x30] sm:$0xff] %vm5693_vm12, %v3184_v33 }
 0x9e0   : > { %v3175_v28 = vpop.f32.mrf.mxu2 }
 0x9e1   : > { %v3176_v56 = vadd.f32 %v3451_v15, %v3175_v28 }
 0x9e3   : > { %v3185_v40 = vadd.f32 %v3176_v56, %v5404_v50 }
 0x9e5   : > { %3193 = vst.msk [vmem:[%s538_s26 + $0x38] sm:$0xff] %vm5694_vm3, %v3185_v40 }
 0x9e6 PF: > { %s26_s21 = sadd.s32 1, %s3766_s21  }
 0x9e7   : > { %p23_p4 = scmp.ge.s32.totalorder %s26_s21, 4  }
 0x9e9   :  { %25 = sbr.rel (!%p23_p4) target bundleno = 2 (0x2), region = 117 }

</bundles_post_ra>
